<compile_context>
chip_gen: v7x
topology: tpu7x:2x2x1
jax: 0.10.0
libtpu: 0.0.40
codegen_flags: <defaults>
</compile_context>

<pallas_src>
import functools
import math

import jax
import jax.numpy as jnp
from jax.experimental import pallas as pl
from jax.experimental.pallas import tpu as pltpu


_VMEM_LIMIT = 32 * 1024 * 1024   # explicit scoped-VMEM budget, safe on v5e/v6e/v7x


def _round_up(x, m):
    return ((x + m - 1) // m) * m


def _pick_bn(n):
    if n <= 8:
        return n
    return 8 if n % 8 == 0 else n


def _pick_tm(m):
    if m <= 512:
        return m
    for t in (512, 256, 128, 64, 32, 16, 8):
        if m % t == 0:
            return t
    return m


def _pick_tn(n):
    for t in (512, 256, 128):
        if n % t == 0:
            return t
    return n


def _pick_tk(k):
    if k <= 2048:
        return k
    for t in (2048, 1024, 512, 256, 128):
        if k % t == 0:
            return t
    return k


# ----------------------------------------------------------------------------
# Shared conv body: zero-padded NHWC VMEM tile -> 9 shifted MXU matmuls ->
# weight_gain + bias + lrelu + act_gain + clamp, stored as a lane-dense slab.
# ----------------------------------------------------------------------------
def _conv3x3_epilogue(xpad_ref, w_ref, b_ref, o_ref, *, wscale, act_gain, clamp,
                      bn, hh, ww):
    ct = xpad_ref.shape[-1]
    acc = jnp.zeros((bn * hh * ww, o_ref.shape[-1]), jnp.float32)
    for i in range(3):
        for j in range(3):
            xs = xpad_ref[:, i:i + hh, j:j + ww, :].reshape(bn * hh * ww, ct)
            acc = acc + jnp.dot(xs, w_ref[i, j],
                                preferred_element_type=jnp.float32)
    y = acc * wscale + b_ref[...]        # weight_gain folded into the epilogue
    y = jnp.where(y >= 0.0, y, 0.2 * y)  # lrelu
    y = y * act_gain
    if clamp is not None:
        y = jnp.clip(y, -clamp, clamp)
    o_ref[...] = y.astype(o_ref.dtype)


# ----------------------------------------------------------------------------
# Kernel 1a (preferred path): fully fused MinibatchStd + pad + 3x3 conv + lrelu.
# Valid when the whole batch is resident in one tile (groups are strided sets
# over the batch, so the statistics need the full batch).
# ----------------------------------------------------------------------------
def _mbstd_conv_fused_kernel(x_ref, w_ref, b_ref, o_ref, xpad_ref, *,
                             group, eps, wscale, act_gain, clamp):
    bn, hh, ww, cin = x_ref.shape
    xf = x_ref[...].astype(jnp.float32)

    # MinibatchStd statistics, entirely in-kernel (f32).
    m = bn // group
    y5 = xf.reshape(group, m, hh, ww, cin)
    mu = jnp.mean(y5, axis=0, keepdims=True)
    var = jnp.mean((y5 - mu) ** 2, axis=0)                         # (m, H, W, C)
    stat = jnp.mean(jnp.sqrt(var + eps), axis=(1, 2, 3), keepdims=True)  # (m,1,1,1)
    # sample n uses stat[n % m]  (matches torch reshape/repeat semantics)
    std_map = jnp.broadcast_to(stat[None], (group, m, hh, ww, 1)
                               ).reshape(bn, hh, ww, 1)

    # Zero-padded bf16 input tile with the mbstd channel appended, all in VMEM.
    xpad_ref[...] = jnp.zeros_like(xpad_ref)
    xpad_ref[:, 1:hh + 1, 1:ww + 1, 0:cin] = xf.astype(xpad_ref.dtype)
    xpad_ref[:, 1:hh + 1, 1:ww + 1, cin:cin + 1] = std_map.astype(xpad_ref.dtype)

    _conv3x3_epilogue(xpad_ref, w_ref, b_ref, o_ref, wscale=wscale,
                      act_gain=act_gain, clamp=clamp, bn=bn, hh=hh, ww=ww)


def mbstd_conv_lrelu_fused(x, w, b, *, group, wscale, act_gain, clamp=None):
    """x: (N,H,W,Cin) f32; w: (3,3,Ct,Cout) bf16 raw; returns (N*H*W, Cout) bf16."""
    n, hh, ww, cin = x.shape
    _, _, ct, cout = w.shape
    tn = _pick_tn(cout)
    grid = (cout // tn,)
    return pl.pallas_call(
        functools.partial(_mbstd_conv_fused_kernel, group=group, eps=1e-8,
                          wscale=float(wscale), act_gain=float(act_gain),
                          clamp=clamp),
        out_shape=jax.ShapeDtypeStruct((n * hh * ww, cout), jnp.bfloat16),
        grid=grid,
        in_specs=[
            pl.BlockSpec((n, hh, ww, cin), lambda co: (0, 0, 0, 0)),
            pl.BlockSpec((3, 3, ct, tn), lambda co: (0, 0, 0, co)),
            pl.BlockSpec((1, tn), lambda co: (0, co)),
        ],
        out_specs=pl.BlockSpec((n * hh * ww, tn), lambda co: (0, co)),
        scratch_shapes=[pltpu.VMEM((n, hh + 2, ww + 2, ct), jnp.bfloat16)],
        compiler_params=pltpu.CompilerParams(
            dimension_semantics=("parallel",),
            vmem_limit_bytes=_VMEM_LIMIT),
    )(x, w, b.reshape(1, cout))


# ----------------------------------------------------------------------------
# Kernel 1b (fallback): standalone MinibatchStd statistics kernel + conv kernel
# that takes the per-sample stat as an input (used when the batch is tiled).
# ----------------------------------------------------------------------------
def _mbstd_stats_kernel(x_ref, o_ref, *, group, eps):
    x = x_ref[...].astype(jnp.float32)            # (N, H, W, C), stats in f32
    n, h, w, c = x.shape
    m = n // group
    y = x.reshape(group, m, h, w, c)
    mu = jnp.mean(y, axis=0, keepdims=True)
    var = jnp.mean((y - mu) ** 2, axis=0)         # (m, H, W, C)
    std = jnp.sqrt(var + eps)
    o_ref[...] = jnp.mean(std, axis=(1, 2, 3)).reshape(m, 1)


def minibatch_std_stats(x, *, group_size):
    """x: (N, H, W, C) f32 -> (N, 1) f32; sample n gets the stat of subgroup n % (N//G)."""
    n, h, w, c = x.shape
    g = min(group_size, n) if group_size is not None else n
    assert n % g == 0, "batch size must be divisible by the mbstd group size"
    m = n // g
    stats = pl.pallas_call(
        functools.partial(_mbstd_stats_kernel, group=g, eps=1e-8),
        out_shape=jax.ShapeDtypeStruct((m, 1), jnp.float32),
        grid=(1,),
        in_specs=[pl.BlockSpec((n, h, w, c), lambda i: (0, 0, 0, 0))],
        out_specs=pl.BlockSpec((m, 1), lambda i: (0, 0)),
        compiler_params=pltpu.CompilerParams(
            dimension_semantics=("arbitrary",),
            vmem_limit_bytes=_VMEM_LIMIT),
    )(x)
    return jnp.tile(stats, (g, 1))                # (N, 1), a few scalars


def _mbstd_conv_kernel(x_ref, std_ref, w_ref, b_ref, o_ref, xpad_ref, *,
                       wscale, act_gain, clamp):
    bn, hh, ww, cin = x_ref.shape
    xpad_ref[...] = jnp.zeros_like(xpad_ref)
    xpad_ref[:, 1:hh + 1, 1:ww + 1, 0:cin] = x_ref[...].astype(xpad_ref.dtype)
    std = std_ref[...].astype(xpad_ref.dtype)                       # (bn, 1)
    xpad_ref[:, 1:hh + 1, 1:ww + 1, cin:cin + 1] = jnp.broadcast_to(
        std.reshape(bn, 1, 1, 1), (bn, hh, ww, 1))
    _conv3x3_epilogue(xpad_ref, w_ref, b_ref, o_ref, wscale=wscale,
                      act_gain=act_gain, clamp=clamp, bn=bn, hh=hh, ww=ww)


def mbstd_conv_lrelu(x, std, w, b, *, wscale, act_gain, clamp=None):
    """Batch-tiled variant: std (N,1) precomputed per sample."""
    n, hh, ww, cin = x.shape
    _, _, ct, cout = w.shape
    bn = _pick_bn(n)
    tn = _pick_tn(cout)
    grid = (n // bn, cout // tn)
    return pl.pallas_call(
        functools.partial(_mbstd_conv_kernel, wscale=float(wscale),
                          act_gain=float(act_gain), clamp=clamp),
        out_shape=jax.ShapeDtypeStruct((n * hh * ww, cout), jnp.bfloat16),
        grid=grid,
        in_specs=[
            pl.BlockSpec((bn, hh, ww, cin), lambda ni, co: (ni, 0, 0, 0)),
            pl.BlockSpec((bn, 1), lambda ni, co: (ni, 0)),
            pl.BlockSpec((3, 3, ct, tn), lambda ni, co: (0, 0, 0, co)),
            pl.BlockSpec((1, tn), lambda ni, co: (0, co)),
        ],
        out_specs=pl.BlockSpec((bn * hh * ww, tn), lambda ni, co: (ni, co)),
        scratch_shapes=[pltpu.VMEM((bn, hh + 2, ww + 2, ct), jnp.bfloat16)],
        compiler_params=pltpu.CompilerParams(
            dimension_semantics=("parallel", "parallel"),
            vmem_limit_bytes=_VMEM_LIMIT),
    )(x, std, w, b.reshape(1, cout))


# ----------------------------------------------------------------------------
# Kernel 2a (preferred path): fused fc (lrelu) + out (linear) layers.
# K-tiled accumulation into a VMEM f32 scratch; the lrelu + tiny final matmul
# run in the last-K epilogue.  Requires the fc output width to fit one N tile.
# ----------------------------------------------------------------------------
def _fc_out_fused_kernel(x_ref, w1_ref, b1_ref, w2_ref, b2_ref, o_ref, acc_ref, *,
                         wscale1, gain1, wscale2):
    @pl.when(pl.program_id(1) == 0)
    def _():
        acc_ref[...] = jnp.zeros_like(acc_ref)

    acc_ref[...] += jnp.dot(x_ref[...], w1_ref[...],
                            preferred_element_type=jnp.float32)

    @pl.when(pl.program_id(1) == pl.num_programs(1) - 1)
    def _():
        h = acc_ref[...] * wscale1 + b1_ref[...]
        h = jnp.where(h >= 0.0, h, 0.2 * h) * gain1            # lrelu + def_gain
        y = jnp.dot(h.astype(jnp.bfloat16), w2_ref[...],
                    preferred_element_type=jnp.float32)
        o_ref[...] = (y * wscale2 + b2_ref[...]).astype(o_ref.dtype)


def fc_out_fused(x, w1, b1, w2, b2, *, wscale1, gain1, wscale2,
                 out_dtype=jnp.float32):
    """out = (lrelu(x @ w1 * ws1 + b1) * gain1) @ w2 * ws2 + b2, fused."""
    m, k = x.shape
    k2, c = w1.shape
    assert k == k2
    c2, no = w2.shape
    assert c == c2
    tm, tk = _pick_tm(m), _pick_tk(k)
    grid = (m // tm, k // tk)
    return pl.pallas_call(
        functools.partial(_fc_out_fused_kernel, wscale1=float(wscale1),
                          gain1=float(gain1), wscale2=float(wscale2)),
        out_shape=jax.ShapeDtypeStruct((m, no), out_dtype),
        grid=grid,
        in_specs=[
            pl.BlockSpec((tm, tk), lambda i, kk: (i, kk)),
            pl.BlockSpec((tk, c), lambda i, kk: (kk, 0)),
            pl.BlockSpec((1, c), lambda i, kk: (0, 0)),
            pl.BlockSpec((c, no), lambda i, kk: (0, 0)),
            pl.BlockSpec((1, no), lambda i, kk: (0, 0)),
        ],
        out_specs=pl.BlockSpec((tm, no), lambda i, kk: (i, 0)),
        scratch_shapes=[pltpu.VMEM((tm, c), jnp.float32)],
        compiler_params=pltpu.CompilerParams(
            dimension_semantics=("parallel", "arbitrary"),
            vmem_limit_bytes=_VMEM_LIMIT),
    )(x.astype(jnp.bfloat16), w1, b1.reshape(1, c), w2, b2.reshape(1, no))


# ----------------------------------------------------------------------------
# Kernel 2b (fallback): generic tiled matmul + bias + activation.
# ----------------------------------------------------------------------------
def _mm_bias_act_kernel(x_ref, w_ref, b_ref, o_ref, acc_ref, *,
                        act, wscale, gain, clamp):
    @pl.when(pl.program_id(2) == 0)
    def _():
        acc_ref[...] = jnp.zeros_like(acc_ref)

    acc_ref[...] += jnp.dot(x_ref[...], w_ref[...],
                            preferred_element_type=jnp.float32)

    @pl.when(pl.program_id(2) == pl.num_programs(2) - 1)
    def _():
        y = acc_ref[...] * wscale + b_ref[...]
        if act == "lrelu":
            y = jnp.where(y >= 0.0, y, 0.2 * y)
        if gain != 1.0:
            y = y * gain
        if clamp is not None:
            y = jnp.clip(y, -clamp, clamp)
        o_ref[...] = y.astype(o_ref.dtype)


def matmul_bias_act(x, w, b, *, act="linear", wscale=1.0, gain=1.0, clamp=None,
                    out_dtype=jnp.float32):
    """y = clamp(act(x @ w * wscale + b) * gain); bf16 operands, f32 accumulation."""
    m, k = x.shape
    k2, n = w.shape
    assert k == k2
    tm, tn, tk = _pick_tm(m), _pick_tn(n), _pick_tk(k)
    grid = (m // tm, n // tn, k // tk)
    return pl.pallas_call(
        functools.partial(_mm_bias_act_kernel, act=act, wscale=float(wscale),
                          gain=float(gain), clamp=clamp),
        out_shape=jax.ShapeDtypeStruct((m, n), out_dtype),
        grid=grid,
        in_specs=[
            pl.BlockSpec((tm, tk), lambda i, j, kk: (i, kk)),
            pl.BlockSpec((tk, tn), lambda i, j, kk: (kk, j)),
            pl.BlockSpec((1, tn), lambda i, j, kk: (0, j)),
        ],
        out_specs=pl.BlockSpec((tm, tn), lambda i, j, kk: (i, j)),
        scratch_shapes=[pltpu.VMEM((tm, tn), jnp.float32)],
        compiler_params=pltpu.CompilerParams(
            dimension_semantics=("parallel", "parallel", "arbitrary"),
            vmem_limit_bytes=_VMEM_LIMIT),
    )(x.astype(jnp.bfloat16), w.astype(jnp.bfloat16), b.reshape(1, n))


# ----------------------------------------------------------------------------
# Parameters and forward pass (DiscriminatorEpilogue, architecture='resnet').
# ----------------------------------------------------------------------------
def build_epilogue_params(key, *, in_channels, resolution, img_channels=3,
                          cmap_dim=0, architecture="resnet",
                          mbstd_group_size=4, mbstd_num_channels=1,
                          conv_clamp=None, final_channels=1):
    assert architecture == "resnet"   # TODO(synk): 'skip' fromrgb branch not implemented
    assert mbstd_num_channels == 1    # TODO(synk): num_channels > 1 grouping not implemented
    assert cmap_dim == 0              # TODO(synk): cmap projection branch not implemented
    del img_channels
    kc, kf, ko = jax.random.split(key, 3)
    c, r = in_channels, resolution
    cin_tot = c + mbstd_num_channels
    ct = _round_up(cin_tot, 128)      # lane-aligned K for the conv matmul (zero rows padded)

    # Conv2dLayer(c+1, c, k=3, lrelu): torch OIHW init -> (kh, kw, Cin_pad, Cout), raw bf16.
    w_conv = jax.random.normal(kc, (c, cin_tot, 3, 3), jnp.float32)
    w_conv = jnp.transpose(w_conv, (2, 3, 1, 0))                       # (3,3,cin_tot,c)
    w_conv = jnp.pad(w_conv, ((0, 0), (0, 0), (0, ct - cin_tot), (0, 0)))
    conv = dict(w=w_conv.astype(jnp.bfloat16), b=jnp.zeros((c,), jnp.float32),
                wscale=1.0 / math.sqrt(cin_tot * 3 * 3),               # weight_gain
                act_gain=math.sqrt(2.0), clamp=conv_clamp)

    # FullyConnectedLayer(c*r*r, c, lrelu): permute columns once from torch's
    # NCHW flatten order to our NHWC flatten order; store as (K, N) bf16.
    fc_in = c * r * r
    w_fc = jax.random.normal(kf, (c, fc_in), jnp.float32)
    w_fc = w_fc.reshape(c, c, r, r).transpose(0, 2, 3, 1).reshape(c, fc_in)
    fc = dict(w=jnp.transpose(w_fc).astype(jnp.bfloat16),
              b=jnp.zeros((c,), jnp.float32),
              wscale=1.0 / math.sqrt(fc_in), act_gain=math.sqrt(2.0))

    # FullyConnectedLayer(c, final_channels, linear)
    w_out = jax.random.normal(ko, (final_channels, c), jnp.float32)
    out = dict(w=jnp.transpose(w_out).astype(jnp.bfloat16),
               b=jnp.zeros((final_channels,), jnp.float32),
               wscale=1.0 / math.sqrt(c), act_gain=1.0)

    return dict(in_channels=c, resolution=r, cmap_dim=cmap_dim,
                mbstd_group_size=mbstd_group_size,
                mbstd_num_channels=mbstd_num_channels,
                conv=conv, fc=fc, out=out)


def discriminator_epilogue_forward(params, x_nchw, img=None, cmap=None,
                                   force_fp32=False):
    """x_nchw: (N, in_channels, R, R) f32; architecture='resnet', cmap_dim=0."""
    del img, cmap, force_fp32
    c, r = params["in_channels"], params["resolution"]
    n = x_nchw.shape[0]
    assert x_nchw.shape == (n, c, r, r)
    x = jnp.transpose(x_nchw.astype(jnp.float32), (0, 2, 3, 1))        # NCHW -> NHWC once

    gs = params["mbstd_group_size"]
    g = min(gs, n) if gs is not None else n
    assert n % g == 0, "batch size must be divisible by the mbstd group size"

    cp = params["conv"]
    if _pick_bn(n) == n:
        # Whole batch resident in one conv tile -> fuse mbstd stats into the conv.
        y = mbstd_conv_lrelu_fused(x, cp["w"], cp["b"], group=g,
                                   wscale=cp["wscale"], act_gain=cp["act_gain"],
                                   clamp=cp["clamp"])                  # (N*R*R, C) bf16
    else:
        std = minibatch_std_stats(x, group_size=gs)
        y = mbstd_conv_lrelu(x, std, cp["w"], cp["b"], wscale=cp["wscale"],
                             act_gain=cp["act_gain"], clamp=cp["clamp"])

    # torch x.flatten(1): fc weight columns were permuted at init to NHWC flatten
    # order, so this reshape is a pure row-major regroup (no runtime transpose).
    xf = y.reshape(n, r * r * c)

    fp, op = params["fc"], params["out"]
    if _pick_tn(c) == c:
        # fc hidden width fits one lane tile -> fuse fc(lrelu) + out(linear).
        out = fc_out_fused(xf, fp["w"], fp["b"], op["w"], op["b"],
                           wscale1=fp["wscale"], gain1=fp["act_gain"],
                           wscale2=op["wscale"], out_dtype=jnp.float32)
    else:
        h = matmul_bias_act(xf, fp["w"], fp["b"], act="lrelu", wscale=fp["wscale"],
                            gain=fp["act_gain"], out_dtype=jnp.bfloat16)
        out = matmul_bias_act(h, op["w"], op["b"], act="linear", wscale=op["wscale"],
                              gain=op["act_gain"], out_dtype=jnp.float32)
    # TODO(synk): cmap_dim > 0 projection ((x*cmap).sum / sqrt(cmap_dim)) not implemented.
    return out                                                          # (N, 1) f32


# ----------------------------------------------------------------------------
if __name__ == "__main__":
    key = jax.random.PRNGKey(0)
    kp, kx = jax.random.split(key)

    batch, in_channels, resolution = 4, 64, 4
    params = build_epilogue_params(kp, in_channels=in_channels, resolution=resolution)

    x = jax.random.normal(kx, (batch, in_channels, resolution, resolution), jnp.float32)
    cmap = jnp.zeros((batch, 0), jnp.float32)     # cmap_dim=0

    fwd = jax.jit(lambda xin: discriminator_epilogue_forward(params, xin, None, cmap))
    out = jax.block_until_ready(fwd(x))

    assert out.shape == (batch, 1) and out.dtype == jnp.float32
    assert bool(jnp.all(jnp.isfinite(out)))
    print("KERNEL_OK")
</pallas_src>

<mosaic_0001>
module attributes {stable_mosaic.version = 11 : i64} {
  func.func @_fc_out_fused_kernel(%arg0: i32, %arg1: i32, %arg2: memref<4x1024xbf16, #tpu.memory_space<vmem>>, %arg3: memref<1024x64xbf16, #tpu.memory_space<vmem>>, %arg4: memref<1x64xf32, #tpu.memory_space<vmem>>, %arg5: memref<64x1xbf16, #tpu.memory_space<vmem>>, %arg6: memref<1x1xf32, #tpu.memory_space<vmem>>, %arg7: memref<4x1xf32, #tpu.memory_space<vmem>>, %arg8: memref<4x64xf32, #tpu.memory_space<vmem>>) attributes {dimension_semantics = [#tpu.dimension_semantics<parallel>, #tpu.dimension_semantics<arbitrary>], iteration_bounds = array<i64: 1, 1>, scalar_prefetch = 0 : i64, scratch_operands = 1 : i64, tpu.core_type = #tpu.core_type<tc>, window_params = [{transform_indices = @transform_0, window_bounds = array<i64: 4, 1024>}, {transform_indices = @transform_1, window_bounds = array<i64: 1024, 64>}, {pipeline_mode = #tpu.pipeline_mode<synchronous>, transform_indices = @transform_2, window_bounds = array<i64: 1, 64>}, {pipeline_mode = #tpu.pipeline_mode<synchronous>, transform_indices = @transform_3, window_bounds = array<i64: 64, 1>}, {pipeline_mode = #tpu.pipeline_mode<synchronous>, transform_indices = @transform_4, window_bounds = array<i64: 1, 1>}, {transform_indices = @transform_5, window_bounds = array<i64: 4, 1>}]} {
    %c0_i32 = arith.constant 0 : i32
    %0 = arith.cmpi eq, %arg1, %c0_i32 : i32
    %1 = arith.extui %0 : i1 to i32
    %c0_i32_0 = arith.constant 0 : i32
    %2 = arith.cmpi ne, %1, %c0_i32_0 : i32
    scf.if %2 {
      %cst_10 = arith.constant 0.000000e+00 : f32
      %12 = vector.broadcast %cst_10 : f32 to vector<4x64xf32>
      %c0_11 = arith.constant 0 : index
      %c0_12 = arith.constant 0 : index
      %13 = vector.load %arg8[%c0_11, %c0_12] : memref<4x64xf32, #tpu.memory_space<vmem>>, vector<4x64xf32>
      tpu.vector_store %arg8[%c0_11, %c0_12], %12 {strides = array<i32>} : memref<4x64xf32, #tpu.memory_space<vmem>>, vector<4x64xf32>,
    } else {
    }
    %c0 = arith.constant 0 : index
    %c0_1 = arith.constant 0 : index
    %3 = vector.load %arg8[%c0, %c0_1] : memref<4x64xf32, #tpu.memory_space<vmem>>, vector<4x64xf32>
    %c0_2 = arith.constant 0 : index
    %c0_3 = arith.constant 0 : index
    %4 = vector.load %arg2[%c0_2, %c0_3] : memref<4x1024xbf16, #tpu.memory_space<vmem>>, vector<4x1024xbf16>
    %c0_4 = arith.constant 0 : index
    %c0_5 = arith.constant 0 : index
    %5 = vector.load %arg3[%c0_4, %c0_5] : memref<1024x64xbf16, #tpu.memory_space<vmem>>, vector<1024x64xbf16>
    %cst = arith.constant dense<0.000000e+00> : vector<4x64xf32>
    %6 = tpu.matmul %4, %5, %cst {dimension_numbers = #tpu.dot_dimension_numbers<[1], [0], [0], [1], [0, 0, 1, 1], [], []>} : vector<4x1024xbf16>, vector<1024x64xbf16>, vector<4x64xf32> -> vector<4x64xf32>
    %7 = arith.addf %3, %6 : vector<4x64xf32>
    %c0_6 = arith.constant 0 : index
    %c0_7 = arith.constant 0 : index
    %8 = vector.load %arg8[%c0_6, %c0_7] : memref<4x64xf32, #tpu.memory_space<vmem>>, vector<4x64xf32>
    tpu.vector_store %arg8[%c0_6, %c0_7], %7 {strides = array<i32>} : memref<4x64xf32, #tpu.memory_space<vmem>>, vector<4x64xf32>,
    %c0_i32_8 = arith.constant 0 : i32
    %9 = arith.cmpi eq, %arg1, %c0_i32_8 : i32
    %10 = arith.extui %9 : i1 to i32
    %c0_i32_9 = arith.constant 0 : i32
    %11 = arith.cmpi ne, %10, %c0_i32_9 : i32
    scf.if %11 {
      %c0_10 = arith.constant 0 : index
      %c0_11 = arith.constant 0 : index
      %12 = vector.load %arg8[%c0_10, %c0_11] : memref<4x64xf32, #tpu.memory_space<vmem>>, vector<4x64xf32>
      %cst_12 = arith.constant 3.125000e-02 : f32
      %13 = vector.broadcast %cst_12 : f32 to vector<4x64xf32>
      %14 = arith.mulf %12, %13 : vector<4x64xf32>
      %c0_13 = arith.constant 0 : index
      %c0_14 = arith.constant 0 : index
      %15 = vector.load %arg4[%c0_13, %c0_14] : memref<1x64xf32, #tpu.memory_space<vmem>>, vector<1x64xf32>
      %16 = vector.broadcast %15 : vector<1x64xf32> to vector<4x64xf32>
      %17 = arith.addf %14, %16 : vector<4x64xf32>
      %cst_15 = arith.constant 0.000000e+00 : f32
      %18 = vector.broadcast %cst_15 : f32 to vector<4x64xf32>
      %19 = arith.cmpf oge, %17, %18 : vector<4x64xf32>
      %cst_16 = arith.constant 2.000000e-01 : f32
      %20 = vector.broadcast %cst_16 : f32 to vector<4x64xf32>
      %21 = arith.mulf %20, %17 : vector<4x64xf32>
      %22 = arith.select %19, %17, %21 : vector<4x64xi1>, vector<4x64xf32>
      %cst_17 = arith.constant 1.41421354 : f32
      %23 = vector.broadcast %cst_17 : f32 to vector<4x64xf32>
      %24 = arith.mulf %22, %23 : vector<4x64xf32>
      %25 = arith.truncf %24 : vector<4x64xf32> to vector<4x64xbf16>
      %c0_18 = arith.constant 0 : index
      %c0_19 = arith.constant 0 : index
      %26 = vector.load %arg5[%c0_18, %c0_19] : memref<64x1xbf16, #tpu.memory_space<vmem>>, vector<64x1xbf16>
      %cst_20 = arith.constant dense<0.000000e+00> : vector<4x1xf32>
      %27 = tpu.matmul %25, %26, %cst_20 {dimension_numbers = #tpu.dot_dimension_numbers<[1], [0], [0], [1], [0, 0, 1, 1], [], []>} : vector<4x64xbf16>, vector<64x1xbf16>, vector<4x1xf32> -> vector<4x1xf32>
      %cst_21 = arith.constant 1.250000e-01 : f32
      %28 = vector.broadcast %cst_21 : f32 to vector<4x1xf32>
      %29 = arith.mulf %27, %28 : vector<4x1xf32>
      %c0_22 = arith.constant 0 : index
      %c0_23 = arith.constant 0 : index
      %30 = vector.load %arg6[%c0_22, %c0_23] : memref<1x1xf32, #tpu.memory_space<vmem>>, vector<1x1xf32>
      %31 = vector.broadcast %30 : vector<1x1xf32> to vector<4x1xf32>
      %32 = arith.addf %29, %31 : vector<4x1xf32>
      %c0_24 = arith.constant 0 : index
      %c0_25 = arith.constant 0 : index
      %33 = vector.load %arg7[%c0_24, %c0_25] : memref<4x1xf32, #tpu.memory_space<vmem>>, vector<4x1xf32>
      tpu.vector_store %arg7[%c0_24, %c0_25], %32 {strides = array<i32>} : memref<4x1xf32, #tpu.memory_space<vmem>>, vector<4x1xf32>,
    } else {
    }
    return
  }
  func.func @transform_0(%arg0: i32, %arg1: i32) -> (i32, i32) {
    %c0_i32 = arith.constant 0 : i32
    return %arg0, %arg1 : i32, i32
  }
  func.func @transform_1(%arg0: i32, %arg1: i32) -> (i32, i32) {
    %c0_i32 = arith.constant 0 : i32
    %c0_i32_0 = arith.constant 0 : i32
    return %arg1, %c0_i32 : i32, i32
  }
  func.func @transform_2(%arg0: i32, %arg1: i32) -> (i32, i32) {
    %c0_i32 = arith.constant 0 : i32
    %c0_i32_0 = arith.constant 0 : i32
    %c0_i32_1 = arith.constant 0 : i32
    return %c0_i32, %c0_i32_0 : i32, i32
  }
  func.func @transform_3(%arg0: i32, %arg1: i32) -> (i32, i32) {
    %c0_i32 = arith.constant 0 : i32
    %c0_i32_0 = arith.constant 0 : i32
    %c0_i32_1 = arith.constant 0 : i32
    return %c0_i32, %c0_i32_0 : i32, i32
  }
  func.func @transform_4(%arg0: i32, %arg1: i32) -> (i32, i32) {
    %c0_i32 = arith.constant 0 : i32
    %c0_i32_0 = arith.constant 0 : i32
    %c0_i32_1 = arith.constant 0 : i32
    return %c0_i32, %c0_i32_0 : i32, i32
  }
  func.func @transform_5(%arg0: i32, %arg1: i32) -> (i32, i32) {
    %c0_i32 = arith.constant 0 : i32
    %c0_i32_0 = arith.constant 0 : i32
    return %arg0, %c0_i32 : i32, i32
  }
}

module attributes {stable_mosaic.version = 11 : i64} {
  func.func @_mbstd_conv_fused_kernel(%arg0: i32, %arg1: memref<4x4x4x64xf32, #tpu.memory_space<vmem>>, %arg2: memref<3x3x128x64xbf16, #tpu.memory_space<vmem>>, %arg3: memref<1x64xf32, #tpu.memory_space<vmem>>, %arg4: memref<64x64xbf16, #tpu.memory_space<vmem>>, %arg5: memref<4x6x6x128xbf16, #tpu.memory_space<vmem>>) attributes {dimension_semantics = [#tpu.dimension_semantics<parallel>], iteration_bounds = array<i64: 1>, scalar_prefetch = 0 : i64, scratch_operands = 1 : i64, tpu.core_type = #tpu.core_type<tc>, window_params = [{pipeline_mode = #tpu.pipeline_mode<synchronous>, transform_indices = @transform_0, window_bounds = array<i64: 4, 4, 4, 64>}, {transform_indices = @transform_1, window_bounds = array<i64: 3, 3, 128, 64>}, {transform_indices = @transform_2, window_bounds = array<i64: 1, 64>}, {transform_indices = @transform_3, window_bounds = array<i64: 64, 64>}]} {
    %c0 = arith.constant 0 : index
    %c0_0 = arith.constant 0 : index
    %c0_1 = arith.constant 0 : index
    %c0_2 = arith.constant 0 : index
    %0 = vector.load %arg1[%c0, %c0_0, %c0_1, %c0_2] : memref<4x4x4x64xf32, #tpu.memory_space<vmem>>, vector<4x4x4x64xf32>
    %1 = vector.shape_cast %0 : vector<4x4x4x64xf32> to vector<4x1x4x4x64xf32>
    %cst = arith.constant dense<0.000000e+00> : vector<1x4x4x64xf32>
    %2 = vector.multi_reduction <add>, %1, %cst [0] : vector<4x1x4x4x64xf32> to vector<1x4x4x64xf32>
    %3 = vector.shape_cast %2 : vector<1x4x4x64xf32> to vector<1x1x4x4x64xf32>
    %cst_3 = arith.constant 4.000000e+00 : f32
    %4 = vector.broadcast %cst_3 : f32 to vector<1x1x4x4x64xf32>
    %5 = arith.divf %3, %4 : vector<1x1x4x4x64xf32>
    %6 = vector.broadcast %5 : vector<1x1x4x4x64xf32> to vector<4x1x4x4x64xf32>
    %7 = arith.subf %1, %6 : vector<4x1x4x4x64xf32>
    %8 = arith.mulf %7, %7 : vector<4x1x4x4x64xf32>
    %cst_4 = arith.constant dense<0.000000e+00> : vector<1x4x4x64xf32>
    %9 = vector.multi_reduction <add>, %8, %cst_4 [0] : vector<4x1x4x4x64xf32> to vector<1x4x4x64xf32>
    %cst_5 = arith.constant 4.000000e+00 : f32
    %10 = vector.broadcast %cst_5 : f32 to vector<1x4x4x64xf32>
    %11 = arith.divf %9, %10 : vector<1x4x4x64xf32>
    %cst_6 = arith.constant 9.99999993E-9 : f32
    %12 = vector.broadcast %cst_6 : f32 to vector<1x4x4x64xf32>
    %13 = arith.addf %11, %12 : vector<1x4x4x64xf32>
    %14 = math.sqrt %13 : vector<1x4x4x64xf32>
    %cst_7 = arith.constant dense<0.000000e+00> : vector<1xf32>
    %15 = vector.multi_reduction <add>, %14, %cst_7 [1, 2, 3] : vector<1x4x4x64xf32> to vector<1xf32>
    %16 = vector.shape_cast %15 : vector<1xf32> to vector<1x1x1x1xf32>
    %cst_8 = arith.constant 1.024000e+03 : f32
    %17 = vector.broadcast %cst_8 : f32 to vector<1x1x1x1xf32>
    %18 = arith.divf %16, %17 : vector<1x1x1x1xf32>
    %19 = vector.shape_cast %18 : vector<1x1x1x1xf32> to vector<1x1x1x1x1xf32>
    %20 = vector.shape_cast %19 : vector<1x1x1x1x1xf32> to vector<1x1x1x1x1xf32>
    %21 = vector.broadcast %20 : vector<1x1x1x1x1xf32> to vector<4x1x4x4x1xf32>
    %22 = vector.shape_cast %21 : vector<4x1x4x4x1xf32> to vector<4x4x4x1xf32>
    %cst_9 = arith.constant 0.000000e+00 : bf16
    %23 = vector.broadcast %cst_9 : bf16 to vector<4x6x6x128xbf16>
    %c0_10 = arith.constant 0 : index
    %c0_11 = arith.constant 0 : index
    %c0_12 = arith.constant 0 : index
    %c0_13 = arith.constant 0 : index
    %24 = vector.load %arg5[%c0_10, %c0_11, %c0_12, %c0_13] : memref<4x6x6x128xbf16, #tpu.memory_space<vmem>>, vector<4x6x6x128xbf16>
    tpu.vector_store %arg5[%c0_10, %c0_11, %c0_12, %c0_13], %23 {strides = array<i32>} : memref<4x6x6x128xbf16, #tpu.memory_space<vmem>>, vector<4x6x6x128xbf16>,
    %25 = arith.truncf %0 : vector<4x4x4x64xf32> to vector<4x4x4x64xbf16>
    %c0_14 = arith.constant 0 : index
    %c1 = arith.constant 1 : index
    %c1_15 = arith.constant 1 : index
    %c0_16 = arith.constant 0 : index
    %26 = vector.load %arg5[%c0_14, %c1, %c1_15, %c0_16] : memref<4x6x6x128xbf16, #tpu.memory_space<vmem>>, vector<4x4x4x64xbf16>
    tpu.vector_store %arg5[%c0_14, %c1, %c1_15, %c0_16], %25 {strides = array<i32>} : memref<4x6x6x128xbf16, #tpu.memory_space<vmem>>, vector<4x4x4x64xbf16>,
    %27 = arith.truncf %22 : vector<4x4x4x1xf32> to vector<4x4x4x1xbf16>
    %c0_17 = arith.constant 0 : index
    %c1_18 = arith.constant 1 : index
    %c1_19 = arith.constant 1 : index
    %c64 = arith.constant 64 : index
    %28 = vector.load %arg5[%c0_17, %c1_18, %c1_19, %c64] : memref<4x6x6x128xbf16, #tpu.memory_space<vmem>>, vector<4x4x4x1xbf16>
    tpu.vector_store %arg5[%c0_17, %c1_18, %c1_19, %c64], %27 {strides = array<i32>} : memref<4x6x6x128xbf16, #tpu.memory_space<vmem>>, vector<4x4x4x1xbf16>,
    %cst_20 = arith.constant 0.000000e+00 : f32
    %29 = vector.broadcast %cst_20 : f32 to vector<64x64xf32>
    %c0_21 = arith.constant 0 : index
    %c0_22 = arith.constant 0 : index
    %c0_23 = arith.constant 0 : index
    %c0_24 = arith.constant 0 : index
    %30 = vector.load %arg5[%c0_21, %c0_22, %c0_23, %c0_24] : memref<4x6x6x128xbf16, #tpu.memory_space<vmem>>, vector<4x4x4x128xbf16>
    %31 = vector.shape_cast %30 : vector<4x4x4x128xbf16> to vector<64x128xbf16>
    %c0_25 = arith.constant 0 : index
    %c0_26 = arith.constant 0 : index
    %c0_27 = arith.constant 0 : index
    %c0_28 = arith.constant 0 : index
    %32 = vector.load %arg2[%c0_25, %c0_26, %c0_27, %c0_28] : memref<3x3x128x64xbf16, #tpu.memory_space<vmem>>, vector<1x1x128x64xbf16>
    %33 = vector.shape_cast %32 : vector<1x1x128x64xbf16> to vector<128x64xbf16>
    %cst_29 = arith.constant dense<0.000000e+00> : vector<64x64xf32>
    %34 = tpu.matmul %31, %33, %cst_29 {dimension_numbers = #tpu.dot_dimension_numbers<[1], [0], [0], [1], [0, 0, 1, 1], [], []>} : vector<64x128xbf16>, vector<128x64xbf16>, vector<64x64xf32> -> vector<64x64xf32>
    %35 = arith.addf %29, %34 : vector<64x64xf32>
    %c0_30 = arith.constant 0 : index
    %c0_31 = arith.constant 0 : index
    %c1_32 = arith.constant 1 : index
    %c0_33 = arith.constant 0 : index
    %36 = vector.load %arg5[%c0_30, %c0_31, %c1_32, %c0_33] : memref<4x6x6x128xbf16, #tpu.memory_space<vmem>>, vector<4x4x4x128xbf16>
    %37 = vector.shape_cast %36 : vector<4x4x4x128xbf16> to vector<64x128xbf16>
    %c0_34 = arith.constant 0 : index
    %c1_35 = arith.constant 1 : index
    %c0_36 = arith.constant 0 : index
    %c0_37 = arith.constant 0 : index
    %38 = vector.load %arg2[%c0_34, %c1_35, %c0_36, %c0_37] : memref<3x3x128x64xbf16, #tpu.memory_space<vmem>>, vector<1x1x128x64xbf16>
    %39 = vector.shape_cast %38 : vector<1x1x128x64xbf16> to vector<128x64xbf16>
    %cst_38 = arith.constant dense<0.000000e+00> : vector<64x64xf32>
    %40 = tpu.matmul %37, %39, %cst_38 {dimension_numbers = #tpu.dot_dimension_numbers<[1], [0], [0], [1], [0, 0, 1, 1], [], []>} : vector<64x128xbf16>, vector<128x64xbf16>, vector<64x64xf32> -> vector<64x64xf32>
    %41 = arith.addf %35, %40 : vector<64x64xf32>
    %c0_39 = arith.constant 0 : index
    %c0_40 = arith.constant 0 : index
    %c2 = arith.constant 2 : index
    %c0_41 = arith.constant 0 : index
    %42 = vector.load %arg5[%c0_39, %c0_40, %c2, %c0_41] : memref<4x6x6x128xbf16, #tpu.memory_space<vmem>>, vector<4x4x4x128xbf16>
    %43 = vector.shape_cast %42 : vector<4x4x4x128xbf16> to vector<64x128xbf16>
    %c0_42 = arith.constant 0 : index
    %c2_43 = arith.constant 2 : index
    %c0_44 = arith.constant 0 : index
    %c0_45 = arith.constant 0 : index
    %44 = vector.load %arg2[%c0_42, %c2_43, %c0_44, %c0_45] : memref<3x3x128x64xbf16, #tpu.memory_space<vmem>>, vector<1x1x128x64xbf16>
    %45 = vector.shape_cast %44 : vector<1x1x128x64xbf16> to vector<128x64xbf16>
    %cst_46 = arith.constant dense<0.000000e+00> : vector<64x64xf32>
    %46 = tpu.matmul %43, %45, %cst_46 {dimension_numbers = #tpu.dot_dimension_numbers<[1], [0], [0], [1], [0, 0, 1, 1], [], []>} : vector<64x128xbf16>, vector<128x64xbf16>, vector<64x64xf32> -> vector<64x64xf32>
    %47 = arith.addf %41, %46 : vector<64x64xf32>
    %c0_47 = arith.constant 0 : index
    %c1_48 = arith.constant 1 : index
    %c0_49 = arith.constant 0 : index
    %c0_50 = arith.constant 0 : index
    %48 = vector.load %arg5[%c0_47, %c1_48, %c0_49, %c0_50] : memref<4x6x6x128xbf16, #tpu.memory_space<vmem>>, vector<4x4x4x128xbf16>
    %49 = vector.shape_cast %48 : vector<4x4x4x128xbf16> to vector<64x128xbf16>
    %c1_51 = arith.constant 1 : index
    %c0_52 = arith.constant 0 : index
    %c0_53 = arith.constant 0 : index
    %c0_54 = arith.constant 0 : index
    %50 = vector.load %arg2[%c1_51, %c0_52, %c0_53, %c0_54] : memref<3x3x128x64xbf16, #tpu.memory_space<vmem>>, vector<1x1x128x64xbf16>
    %51 = vector.shape_cast %50 : vector<1x1x128x64xbf16> to vector<128x64xbf16>
    %cst_55 = arith.constant dense<0.000000e+00> : vector<64x64xf32>
    %52 = tpu.matmul %49, %51, %cst_55 {dimension_numbers = #tpu.dot_dimension_numbers<[1], [0], [0], [1], [0, 0, 1, 1], [], []>} : vector<64x128xbf16>, vector<128x64xbf16>, vector<64x64xf32> -> vector<64x64xf32>
    %53 = arith.addf %47, %52 : vector<64x64xf32>
    %c0_56 = arith.constant 0 : index
    %c1_57 = arith.constant 1 : index
    %c1_58 = arith.constant 1 : index
    %c0_59 = arith.constant 0 : index
    %54 = vector.load %arg5[%c0_56, %c1_57, %c1_58, %c0_59] : memref<4x6x6x128xbf16, #tpu.memory_space<vmem>>, vector<4x4x4x128xbf16>
    %55 = vector.shape_cast %54 : vector<4x4x4x128xbf16> to vector<64x128xbf16>
    %c1_60 = arith.constant 1 : index
    %c1_61 = arith.constant 1 : index
    %c0_62 = arith.constant 0 : index
    %c0_63 = arith.constant 0 : index
    %56 = vector.load %arg2[%c1_60, %c1_61, %c0_62, %c0_63] : memref<3x3x128x64xbf16, #tpu.memory_space<vmem>>, vector<1x1x128x64xbf16>
    %57 = vector.shape_cast %56 : vector<1x1x128x64xbf16> to vector<128x64xbf16>
    %cst_64 = arith.constant dense<0.000000e+00> : vector<64x64xf32>
    %58 = tpu.matmul %55, %57, %cst_64 {dimension_numbers = #tpu.dot_dimension_numbers<[1], [0], [0], [1], [0, 0, 1, 1], [], []>} : vector<64x128xbf16>, vector<128x64xbf16>, vector<64x64xf32> -> vector<64x64xf32>
    %59 = arith.addf %53, %58 : vector<64x64xf32>
    %c0_65 = arith.constant 0 : index
    %c1_66 = arith.constant 1 : index
    %c2_67 = arith.constant 2 : index
    %c0_68 = arith.constant 0 : index
    %60 = vector.load %arg5[%c0_65, %c1_66, %c2_67, %c0_68] : memref<4x6x6x128xbf16, #tpu.memory_space<vmem>>, vector<4x4x4x128xbf16>
    %61 = vector.shape_cast %60 : vector<4x4x4x128xbf16> to vector<64x128xbf16>
    %c1_69 = arith.constant 1 : index
    %c2_70 = arith.constant 2 : index
    %c0_71 = arith.constant 0 : index
    %c0_72 = arith.constant 0 : index
    %62 = vector.load %arg2[%c1_69, %c2_70, %c0_71, %c0_72] : memref<3x3x128x64xbf16, #tpu.memory_space<vmem>>, vector<1x1x128x64xbf16>
    %63 = vector.shape_cast %62 : vector<1x1x128x64xbf16> to vector<128x64xbf16>
    %cst_73 = arith.constant dense<0.000000e+00> : vector<64x64xf32>
    %64 = tpu.matmul %61, %63, %cst_73 {dimension_numbers = #tpu.dot_dimension_numbers<[1], [0], [0], [1], [0, 0, 1, 1], [], []>} : vector<64x128xbf16>, vector<128x64xbf16>, vector<64x64xf32> -> vector<64x64xf32>
    %65 = arith.addf %59, %64 : vector<64x64xf32>
    %c0_74 = arith.constant 0 : index
    %c2_75 = arith.constant 2 : index
    %c0_76 = arith.constant 0 : index
    %c0_77 = arith.constant 0 : index
    %66 = vector.load %arg5[%c0_74, %c2_75, %c0_76, %c0_77] : memref<4x6x6x128xbf16, #tpu.memory_space<vmem>>, vector<4x4x4x128xbf16>
    %67 = vector.shape_cast %66 : vector<4x4x4x128xbf16> to vector<64x128xbf16>
    %c2_78 = arith.constant 2 : index
    %c0_79 = arith.constant 0 : index
    %c0_80 = arith.constant 0 : index
    %c0_81 = arith.constant 0 : index
    %68 = vector.load %arg2[%c2_78, %c0_79, %c0_80, %c0_81] : memref<3x3x128x64xbf16, #tpu.memory_space<vmem>>, vector<1x1x128x64xbf16>
    %69 = vector.shape_cast %68 : vector<1x1x128x64xbf16> to vector<128x64xbf16>
    %cst_82 = arith.constant dense<0.000000e+00> : vector<64x64xf32>
    %70 = tpu.matmul %67, %69, %cst_82 {dimension_numbers = #tpu.dot_dimension_numbers<[1], [0], [0], [1], [0, 0, 1, 1], [], []>} : vector<64x128xbf16>, vector<128x64xbf16>, vector<64x64xf32> -> vector<64x64xf32>
    %71 = arith.addf %65, %70 : vector<64x64xf32>
    %c0_83 = arith.constant 0 : index
    %c2_84 = arith.constant 2 : index
    %c1_85 = arith.constant 1 : index
    %c0_86 = arith.constant 0 : index
    %72 = vector.load %arg5[%c0_83, %c2_84, %c1_85, %c0_86] : memref<4x6x6x128xbf16, #tpu.memory_space<vmem>>, vector<4x4x4x128xbf16>
    %73 = vector.shape_cast %72 : vector<4x4x4x128xbf16> to vector<64x128xbf16>
    %c2_87 = arith.constant 2 : index
    %c1_88 = arith.constant 1 : index
    %c0_89 = arith.constant 0 : index
    %c0_90 = arith.constant 0 : index
    %74 = vector.load %arg2[%c2_87, %c1_88, %c0_89, %c0_90] : memref<3x3x128x64xbf16, #tpu.memory_space<vmem>>, vector<1x1x128x64xbf16>
    %75 = vector.shape_cast %74 : vector<1x1x128x64xbf16> to vector<128x64xbf16>
    %cst_91 = arith.constant dense<0.000000e+00> : vector<64x64xf32>
    %76 = tpu.matmul %73, %75, %cst_91 {dimension_numbers = #tpu.dot_dimension_numbers<[1], [0], [0], [1], [0, 0, 1, 1], [], []>} : vector<64x128xbf16>, vector<128x64xbf16>, vector<64x64xf32> -> vector<64x64xf32>
    %77 = arith.addf %71, %76 : vector<64x64xf32>
    %c0_92 = arith.constant 0 : index
    %c2_93 = arith.constant 2 : index
    %c2_94 = arith.constant 2 : index
    %c0_95 = arith.constant 0 : index
    %78 = vector.load %arg5[%c0_92, %c2_93, %c2_94, %c0_95] : memref<4x6x6x128xbf16, #tpu.memory_space<vmem>>, vector<4x4x4x128xbf16>
    %79 = vector.shape_cast %78 : vector<4x4x4x128xbf16> to vector<64x128xbf16>
    %c2_96 = arith.constant 2 : index
    %c2_97 = arith.constant 2 : index
    %c0_98 = arith.constant 0 : index
    %c0_99 = arith.constant 0 : index
    %80 = vector.load %arg2[%c2_96, %c2_97, %c0_98, %c0_99] : memref<3x3x128x64xbf16, #tpu.memory_space<vmem>>, vector<1x1x128x64xbf16>
    %81 = vector.shape_cast %80 : vector<1x1x128x64xbf16> to vector<128x64xbf16>
    %cst_100 = arith.constant dense<0.000000e+00> : vector<64x64xf32>
    %82 = tpu.matmul %79, %81, %cst_100 {dimension_numbers = #tpu.dot_dimension_numbers<[1], [0], [0], [1], [0, 0, 1, 1], [], []>} : vector<64x128xbf16>, vector<128x64xbf16>, vector<64x64xf32> -> vector<64x64xf32>
    %83 = arith.addf %77, %82 : vector<64x64xf32>
    %cst_101 = arith.constant 0.0413449109 : f32
    %84 = vector.broadcast %cst_101 : f32 to vector<64x64xf32>
    %85 = arith.mulf %83, %84 : vector<64x64xf32>
    %c0_102 = arith.constant 0 : index
    %c0_103 = arith.constant 0 : index
    %86 = vector.load %arg3[%c0_102, %c0_103] : memref<1x64xf32, #tpu.memory_space<vmem>>, vector<1x64xf32>
    %87 = vector.broadcast %86 : vector<1x64xf32> to vector<64x64xf32>
    %88 = arith.addf %85, %87 : vector<64x64xf32>
    %cst_104 = arith.constant 0.000000e+00 : f32
    %89 = vector.broadcast %cst_104 : f32 to vector<64x64xf32>
    %90 = arith.cmpf oge, %88, %89 : vector<64x64xf32>
    %cst_105 = arith.constant 2.000000e-01 : f32
    %91 = vector.broadcast %cst_105 : f32 to vector<64x64xf32>
    %92 = arith.mulf %91, %88 : vector<64x64xf32>
    %93 = arith.select %90, %88, %92 : vector<64x64xi1>, vector<64x64xf32>
    %cst_106 = arith.constant 1.41421354 : f32
    %94 = vector.broadcast %cst_106 : f32 to vector<64x64xf32>
    %95 = arith.mulf %93, %94 : vector<64x64xf32>
    %96 = arith.truncf %95 : vector<64x64xf32> to vector<64x64xbf16>
    %c0_107 = arith.constant 0 : index
    %c0_108 = arith.constant 0 : index
    %97 = vector.load %arg4[%c0_107, %c0_108] : memref<64x64xbf16, #tpu.memory_space<vmem>>, vector<64x64xbf16>
    tpu.vector_store %arg4[%c0_107, %c0_108], %96 {strides = array<i32>} : memref<64x64xbf16, #tpu.memory_space<vmem>>, vector<64x64xbf16>,
    return
  }
  func.func @transform_0(%arg0: i32) -> (i32, i32, i32, i32) {
    %c0_i32 = arith.constant 0 : i32
    %c0_i32_0 = arith.constant 0 : i32
    %c0_i32_1 = arith.constant 0 : i32
    %c0_i32_2 = arith.constant 0 : i32
    %c0_i32_3 = arith.constant 0 : i32
    return %c0_i32, %c0_i32_0, %c0_i32_1, %c0_i32_2 : i32, i32, i32, i32
  }
  func.func @transform_1(%arg0: i32) -> (i32, i32, i32, i32) {
    %c0_i32 = arith.constant 0 : i32
    %c0_i32_0 = arith.constant 0 : i32
    %c0_i32_1 = arith.constant 0 : i32
    %c0_i32_2 = arith.constant 0 : i32
    return %c0_i32, %c0_i32_0, %c0_i32_1, %arg0 : i32, i32, i32, i32
  }
  func.func @transform_2(%arg0: i32) -> (i32, i32) {
    %c0_i32 = arith.constant 0 : i32
    %c0_i32_0 = arith.constant 0 : i32
    return %c0_i32, %arg0 : i32, i32
  }
  func.func @transform_3(%arg0: i32) -> (i32, i32) {
    %c0_i32 = arith.constant 0 : i32
    %c0_i32_0 = arith.constant 0 : i32
    return %c0_i32, %arg0 : i32, i32
  }
}

</mosaic_0001>

<bundles_post_ra>
// kernel: _lambda_.3
= control target key start
LH: loop header
LB: loop body
LE: loop exit
PB: predicated region body
PF: predicated region fallthrough
CT: control target
= control target key end

     0   :  { %v1109_v22 = vmov 1983009808   ;;  %v166_v24 = vlaneseq  ;;  %vm27_vm0 = vcmask 519168   ;;  %vm1111_vm1 = vmmov 0   ;;  %s1373_s1 = inlined_call_operand.vmem [shape: bf16[1024,64], index: 1, kind: input, shape index: {}]   ;;  %s1374_s0 = inlined_call_operand.vmem [shape: bf16[4,1024], index: 0, kind: input, shape index: {}]   ;;  %s1375_s3 = inlined_call_operand.vmem [shape: bf16[64,1], index: 3, kind: input, shape index: {}]   ;;  %s1376_s4 = inlined_call_operand.<no memory space> [shape: f32[1,1], index: 4, kind: input, shape index: {}]   ;;  %s1377_s2 = inlined_call_operand.vmem [shape: f32[1,64], index: 2, kind: input, shape index: {}]   ;;  %s1378_s5 = inlined_call_operand.vmem [shape: f32[4,1], index: 5, kind: output, shape index: {}]  }
   0x1   :  { %v1039_v0 = vld [vmem:[%s1373_s1 + $0x40] sm:$0xff]   ;;  %v1043_v4 = vld [vmem:[%s1373_s1 + $0x48] sm:$0xff]   ;;  %v1047_v8 = vld [vmem:[%s1373_s1 + $0x50] sm:$0xff]   ;;  %v164_v23 = vunpack.c.l.s4 %v1109_v22  ;;  %vm801_vm3 = vcmask 523264   ;;  %vm854_vm4 = vcmask 3072  }
   0x2   :  { %v1040_v1 = vld [vmem:[%s1373_s1 + $0xc0] sm:$0xff]   ;;  %931 = vmatprep.subr.bf16.mxu0 %v1039_v0  ;;  %v1044_v5 = vld [vmem:[%s1373_s1 + $0xc8] sm:$0xff]   ;;  %v1048_v9 = vld [vmem:[%s1373_s1 + $0xd0] sm:$0xff]   ;;  %v167_v30 = vshrl.u32 %v166_v24, 7 }
   0x3   :  { %v1041_v2 = vld [vmem:[%s1373_s1] sm:$0xff]   ;;  %953 = vmatprep.subr.bf16.mxu1 %v1040_v1  ;;  %v1045_v6 = vld [vmem:[%s1373_s1 + $0x8] sm:$0xff]   ;;  %v1049_v10 = vld [vmem:[%s1373_s1 + $0x10] sm:$0xff]   ;;  %v165_v29 = vunpack.c.0.s8 %v164_v23  ;;  %v10_v23 = vstv %s1376_s4 }
   0x4   :  { %v1042_v3 = vld [vmem:[%s1373_s1 + $0x80] sm:$0xff]   ;;  %932 = vmatpush3.bf16.msra.mxu0 %v1041_v2  ;;  %v1046_v7 = vld [vmem:[%s1373_s1 + $0x88] sm:$0xff]   ;;  %v1050_v11 = vld [vmem:[%s1373_s1 + $0x90] sm:$0xff]   ;;  %11 = vst [vmem:[#allocation3] sm:$0x1] %v10_v23 }
   0x5   :  { %954 = vmatpush3.bf16.msra.mxu1 %v1042_v3  ;;  %933 = vmatprep.subr.bf16.mxu0 %v1043_v4  ;;  %v1051_v12 = vld [vmem:[%s1373_s1 + $0x58] sm:$0xff]   ;;  %v1055_v16 = vld [vmem:[%s1373_s1 + $0x60] sm:$0xff]   ;;  %v1059_v20 = vld [vmem:[%s1373_s1 + $0x68] sm:$0xff]   ;;  %v168_v35 = vsub.s32 %v165_v29, %v167_v30 }
   0x6   :  { %955 = vmatprep.subr.bf16.mxu1 %v1044_v5  ;;  %v1052_v13 = vld [vmem:[%s1373_s1 + $0xd8] sm:$0xff]   ;;  %v1056_v17 = vld [vmem:[%s1373_s1 + $0xe0] sm:$0xff]   ;;  %v1060_v21 = vld [vmem:[%s1373_s1 + $0xe8] sm:$0xff]  }
   0x7   :  { %v1053_v14 = vld [vmem:[%s1373_s1 + $0x18] sm:$0xff]   ;;  %v1057_v18 = vld [vmem:[%s1373_s1 + $0x20] sm:$0xff]   ;;  %v1061_v25 = vld [vmem:[%s1373_s1 + $0x28] sm:$0xff]  }
   0x8   :  { %934 = vmatpush3.bf16.msra.mxu0 %v1045_v6  ;;  %v1054_v15 = vld [vmem:[%s1373_s1 + $0x98] sm:$0xff]   ;;  %v1058_v19 = vld [vmem:[%s1373_s1 + $0xa0] sm:$0xff]   ;;  %v1062_v26 = vld [vmem:[%s1373_s1 + $0xa8] sm:$0xff]  }
   0x9   :  { %956 = vmatpush3.bf16.msra.mxu1 %v1046_v7  ;;  %935 = vmatprep.subr.bf16.mxu0 %v1047_v8  ;;  %v1063_v27 = vld [vmem:[%s1373_s1 + $0x70] sm:$0xff]   ;;  %v1067_v33 = vld [vmem:[%s1373_s1 + $0x78] sm:$0xff]   ;;  %v30_v38 = vld [vmem:[%s1374_s0] sm:$0xff] }
   0xa   :  { %957 = vmatprep.subr.bf16.mxu1 %v1048_v9  ;;  %v1064_v28 = vld [vmem:[%s1373_s1 + $0xf0] sm:$0xff]   ;;  %v1068_v34 = vld [vmem:[%s1373_s1 + $0xf8] sm:$0xff]   ;;  %v31_v39 = vld [vmem:[%s1374_s0 + $0x8] sm:$0xff]  ;;  %v169_v40 = vrot.slane %v30_v38, %v168_v35  ;;  %v162_v42 = vcombine.high %v30_v38, %v30_v38 }
   0xb   :  { %v1065_v31 = vld [vmem:[%s1373_s1 + $0x30] sm:$0xff]   ;;  %v1069_v36 = vld [vmem:[%s1373_s1 + $0x38] sm:$0xff]   ;;  %v179_v41 = vcombine.high %v31_v39, %v31_v39  ;;  %v1073_v43 = vld [vmem:[%s1373_s1 + $0x140] sm:$0xff]   ;;  %v1247_v44 = vrot.slane %v31_v39, %v168_v35 }
   0xc   :  { %936 = vmatpush3.bf16.msra.mxu0 %v1049_v10  ;;  %v1066_v32 = vld [vmem:[%s1373_s1 + $0xb0] sm:$0xff]   ;;  %v1070_v37 = vld [vmem:[%s1373_s1 + $0xb8] sm:$0xff]   ;;  %v1074_v45 = vld [vmem:[%s1373_s1 + $0x1c0] sm:$0xff]   ;;  %v177_v46 = vcombine.high %v169_v40, %v169_v40  ;;  %v176_v47 = vrot.slane %v162_v42, %v168_v35 }
   0xd   :  { %958 = vmatpush3.bf16.msra.mxu1 %v1050_v11  ;;  %937 = vmatprep.subr.bf16.mxu0 %v1051_v12  ;;  %v1075_v48 = vld [vmem:[%s1373_s1 + $0x100] sm:$0xff]   ;;  %v1255_v49 = vrot.slane %v179_v41, %v168_v35  ;;  %v1077_v52 = vld [vmem:[%s1373_s1 + $0x148] sm:$0xff]   ;;  %v194_v53 = vcombine.high %v1247_v44, %v1247_v44  ;;  %v1081_v58 = vld [vmem:[%s1373_s1 + $0x150] sm:$0xff]  }
   0xe   :  { %959 = vmatprep.subr.bf16.mxu1 %v1052_v13  ;;  %v1076_v50 = vld [vmem:[%s1373_s1 + $0x180] sm:$0xff]   ;;  %620 = vmatprep.mubr.bf16.mxu0 %v177_v46  ;;  %v178_v51 = vcombine.high %v176_v47, %v176_v47  ;;  %v1078_v54 = vld [vmem:[%s1373_s1 + $0x1c8] sm:$0xff]   ;;  %v1082_v59 = vld [vmem:[%s1373_s1 + $0x1d0] sm:$0xff]  }
   0xf   :  { %v195_v55 = vcombine.high %v1255_v49, %v1255_v49  ;;  %v1079_v56 = vld [vmem:[%s1373_s1 + $0x108] sm:$0xff]   ;;  %v1083_v60 = vld [vmem:[%s1373_s1 + $0x110] sm:$0xff]   ;;  %v1085_v62 = vld [vmem:[%s1373_s1 + $0x158] sm:$0xff]  }
  0x10   :  { %938 = vmatpush3.bf16.msra.mxu0 %v1053_v14  ;;  %660 = vmatprep.mubr.bf16.mxu1 %v178_v51  ;;  %v1080_v57 = vld [vmem:[%s1373_s1 + $0x188] sm:$0xff]   ;;  %v1084_v61 = vld [vmem:[%s1373_s1 + $0x190] sm:$0xff]   ;;  %v1086_v63 = vld [vmem:[%s1373_s1 + $0x1d8] sm:$0xff]  }
  0x11   :  { %960 = vmatpush3.bf16.msra.mxu1 %v1054_v15  ;;  %939 = vmatprep.subr.bf16.mxu0 %v1055_v16  ;;  %v1087_v0 = vld [vmem:[%s1373_s1 + $0x118] sm:$0xff]   ;;  %v1089_v2 = vld [vmem:[%s1373_s1 + $0x160] sm:$0xff]   ;;  %v1093_v6 = vld [vmem:[%s1373_s1 + $0x168] sm:$0xff]  }
  0x12   :  { %961 = vmatprep.subr.bf16.mxu1 %v1056_v17  ;;  %v1088_v1 = vld [vmem:[%s1373_s1 + $0x198] sm:$0xff]   ;;  %v1090_v3 = vld [vmem:[%s1373_s1 + $0x1e0] sm:$0xff]   ;;  %v1094_v7 = vld [vmem:[%s1373_s1 + $0x1e8] sm:$0xff]  }
  0x13   :  { %v1091_v4 = vld [vmem:[%s1373_s1 + $0x120] sm:$0xff]   ;;  %v1095_v8 = vld [vmem:[%s1373_s1 + $0x128] sm:$0xff]   ;;  %v1097_v10 = vld [vmem:[%s1373_s1 + $0x170] sm:$0xff]  }
  0x14   :  { %940 = vmatpush3.bf16.msra.mxu0 %v1057_v18  ;;  %v1092_v5 = vld [vmem:[%s1373_s1 + $0x1a0] sm:$0xff]   ;;  %v1096_v9 = vld [vmem:[%s1373_s1 + $0x1a8] sm:$0xff]   ;;  %v1098_v11 = vld [vmem:[%s1373_s1 + $0x1f0] sm:$0xff]   ;;  %v1110_v18 = vmov 0.0  }
  0x15   :  { %962 = vmatpush3.bf16.msra.mxu1 %v1058_v19  ;;  %941 = vmatprep.subr.bf16.mxu0 %v1059_v20  ;;  %v1099_v12 = vld [vmem:[%s1373_s1 + $0x130] sm:$0xff]   ;;  %v1101_v14 = vld [vmem:[%s1373_s1 + $0x178] sm:$0xff]   ;;  %28 = vst.msk [vmem:[#allocation2] sm:$0xf] %vm27_vm0, %v1110_v18  ;;  %v1105_v19 = vld [vmem:[%s1375_s3] sm:$0xff]  }
  0x16   :  { %963 = vmatprep.subr.bf16.mxu1 %v1060_v21  ;;  %v1100_v13 = vld [vmem:[%s1373_s1 + $0x1b0] sm:$0xff]   ;;  %v1102_v15 = vld [vmem:[%s1373_s1 + $0x1f8] sm:$0xff]   ;;  %v1106_v20 = vld [vmem:[%s1375_s3 + $0x8] sm:$0xff]  }
  0x17   :  { %v1103_v16 = vld [vmem:[%s1373_s1 + $0x138] sm:$0xff]   ;;  %v1107_v21 = vld [vmem:[%s1375_s3 + $0x10] sm:$0xff]  }
  0x18   :  { %942 = vmatpush3.bf16.msra.mxu0 %v1061_v25  ;;  %v1104_v17 = vld [vmem:[%s1373_s1 + $0x1b8] sm:$0xff]  }
  0x19   :  { %964 = vmatpush3.bf16.msra.mxu1 %v1062_v26  ;;  %943 = vmatprep.subr.bf16.mxu0 %v1063_v27  ;;  %v1108_v22 = vld [vmem:[%s1375_s3 + $0x18] sm:$0xff]  }
  0x1a   :  { %965 = vmatprep.subr.bf16.mxu1 %v1064_v28 }
  0x1c   :  { %944 = vmatpush3.bf16.msra.mxu0 %v1065_v31 }
  0x1d   :  { %966 = vmatpush3.bf16.msra.mxu1 %v1066_v32  ;;  %945 = vmatprep.subr.bf16.mxu0 %v1067_v33 }
  0x1e   :  { %967 = vmatprep.subr.bf16.mxu1 %v1068_v34 }
  0x20   :  { %946 = vmatpush3.bf16.msra.mxu0 %v1069_v36 }
  0x21   :  { %968 = vmatpush3.bf16.msra.mxu1 %v1070_v37  ;;  %975 = vmatprep.subr.bf16.mxu0 %v1073_v43 }
  0x22   :  { %997 = vmatprep.subr.bf16.mxu1 %v1074_v45  ;;  %v29_v45 = vld [vmem:[#allocation2] sm:$0xf] }
  0x23   :  { %621 = vmatmul.mubr.bf16.vlgmr.msra.gmra.mrb[0].mxu0 %v169_v40 }
  0x24   :  { %976 = vmatpush3.bf16.msra.mxu0 %v1075_v48  ;;  %661 = vmatmul.mubr.bf16.vlgmr.msra.gmra.mrb[0].mxu1 %v176_v47 }
  0x25   :  { %977 = vmatprep.subr.bf16.mxu0 %v1077_v52  ;;  %998 = vmatpush3.bf16.msra.mxu1 %v1076_v50  ;;  %v924_v50 = vld [vmem:[%s1377_s2] ss:$0 sm:$0xff] }
  0x26   :  { %700 = vmatprep.mubr.bf16.mxu0 %v194_v53  ;;  %999 = vmatprep.subr.bf16.mxu1 %v1078_v54 }
  0x27   :  { %740 = vmatprep.mubr.bf16.mxu1 %v195_v55 }
  0x28   :  { %978 = vmatpush3.bf16.msra.mxu0 %v1079_v56 }
  0x29   :  { %979 = vmatprep.subr.bf16.mxu0 %v1081_v58  ;;  %1000 = vmatpush3.bf16.msra.mxu1 %v1080_v57  ;;  %v930_v58 = vld [vmem:[#allocation3] ss:$0 sm:$0xff] }
  0x2a   :  { %1001 = vmatprep.subr.bf16.mxu1 %v1082_v59 }
  0x2c   :  { %980 = vmatpush3.bf16.msra.mxu0 %v1083_v60 }
  0x2d   :  { %981 = vmatprep.subr.bf16.mxu0 %v1085_v62  ;;  %1002 = vmatpush3.bf16.msra.mxu1 %v1084_v61 }
  0x2e   :  { %1003 = vmatprep.subr.bf16.mxu1 %v1086_v63 }
  0x30   :  { %982 = vmatpush3.bf16.msra.mxu0 %v1087_v0 }
  0x31   :  { %983 = vmatprep.subr.bf16.mxu0 %v1089_v2  ;;  %1004 = vmatpush3.bf16.msra.mxu1 %v1088_v1 }
  0x32   :  { %1005 = vmatprep.subr.bf16.mxu1 %v1090_v3 }
  0x34   :  { %984 = vmatpush3.bf16.msra.mxu0 %v1091_v4 }
  0x35   :  { %985 = vmatprep.subr.bf16.mxu0 %v1093_v6  ;;  %1006 = vmatpush3.bf16.msra.mxu1 %v1092_v5 }
  0x36   :  { %1007 = vmatprep.subr.bf16.mxu1 %v1094_v7 }
  0x38   :  { %986 = vmatpush3.bf16.msra.mxu0 %v1095_v8 }
  0x39   :  { %987 = vmatprep.subr.bf16.mxu0 %v1097_v10  ;;  %1008 = vmatpush3.bf16.msra.mxu1 %v1096_v9 }
  0x3a   :  { %1009 = vmatprep.subr.bf16.mxu1 %v1098_v11 }
  0x3c   :  { %988 = vmatpush3.bf16.msra.mxu0 %v1099_v12 }
  0x3d   :  { %989 = vmatprep.subr.bf16.mxu0 %v1101_v14  ;;  %1010 = vmatpush3.bf16.msra.mxu1 %v1100_v13 }
  0x3e   :  { %1011 = vmatprep.subr.bf16.mxu1 %v1102_v15 }
  0x40   :  { %990 = vmatpush3.bf16.msra.mxu0 %v1103_v16 }
  0x41   :  { %1012 = vmatpush3.bf16.msra.mxu1 %v1104_v17  ;;  %1024 = vmatprep.subr.bf16.mxu0 %v1110_v18 }
  0x43   :  { %701 = vmatmul.mubr.bf16.vlgmr.msra.gmra.mrb[4].mxu0 %v1247_v44 }
  0x44   :  { %741 = vmatmul.mubr.bf16.vlgmr.msra.gmra.mrb[4].mxu1 %v1255_v49  ;;  %1032 = vmatprep.mubr.msk.bf16.mxu0 %vm1111_vm1, %v1110_v18 }
  0x45   :  { %1025 = vmatpush3.bf16.msra.mxu0 %v1105_v19 }
  0x46   :  { %1026 = vmatprep.subr.bf16.mxu0 %v1110_v18 }
  0x49   :  { %1027 = vmatpush3.bf16.msra.mxu0 %v1106_v20 }
  0x4a   :  { %1028 = vmatprep.subr.bf16.mxu0 %v1110_v18 }
  0x4d   :  { %1029 = vmatpush3.bf16.msra.mxu0 %v1107_v21 }
  0x4e   :  { %1030 = vmatprep.subr.bf16.mxu0 %v1110_v18 }
  0x51   :  { %1031 = vmatpush3.bf16.msra.mxu0 %v1108_v22 }
  0xf6   :  { %v947_v24 = vpop.f32.mrb[0].mxu0 }
  0xf7   :  { %v948_v25 = vpop.f32.mrb[1].mxu0  ;;  %v969_v26 = vpop.f32.mrb[0].mxu1 }
  0xf8   :  { %v949_v27 = vadd.f32 %v948_v25, %v947_v24  ;;  %v950_v28 = vpop.f32.mrb[2].mxu0  ;;  %v970_v29 = vpop.f32.mrb[1].mxu1 }
  0xf9   :  { %v951_v30 = vpop.f32.mrb[3].mxu0  ;;  %v971_v31 = vadd.f32 %v970_v29, %v969_v26  ;;  %v972_v32 = vpop.f32.mrb[2].mxu1 }
  0xfa   :  { %v973_v33 = vpop.f32.mrb[3].mxu1 }
  0xfb   :  { %v663_v34 = vadd.f32 %v971_v31, %v949_v27 }
 0x116   :  { %v991_v35 = vpop.f32.mrb[4].mxu0 }
 0x117   :  { %v992_v36 = vpop.f32.mrb[5].mxu0  ;;  %v1013_v37 = vpop.f32.mrb[4].mxu1 }
 0x118   :  { %v993_v38 = vadd.f32 %v992_v36, %v991_v35  ;;  %v994_v39 = vpop.f32.mrb[6].mxu0  ;;  %v1014_v40 = vpop.f32.mrb[5].mxu1 }
 0x119   :  { %v995_v41 = vpop.f32.mrb[7].mxu0  ;;  %v1015_v43 = vadd.f32 %v1014_v40, %v1013_v37  ;;  %v1016_v44 = vpop.f32.mrb[6].mxu1 }
 0x11a   :  { %v703_v42 = vadd.f32 %v993_v38, %v663_v34  ;;  %v1017_v46 = vpop.f32.mrb[7].mxu1 }
 0x11c   :  { %v743_v47 = vadd.f32 %v1015_v43, %v703_v42 }
 0x11e   :  { %v748_v48 = vadd.f32 %v743_v47, %v29_v45 }
 0x120   :  { %750 = vst.msk [vmem:[#allocation2] sm:$0xf] %vm27_vm0, %v748_v48 }
 0x127   :  { %v754_v49 = vld [vmem:[#allocation2] sm:$0xf] }
 0x128   :  { %v755_v51 = vmul.f32 0.03125, %v754_v49 }
 0x12a   :  { %v763_v52 = vadd.f32 %v924_v50, %v755_v51 }
 0x12c   :  { %vm764_vm2 = vcmp.ge.f32.partialorder %v763_v52, 0.0  ;;  %v765_v53 = vmul.f32 0.2, %v763_v52 }
 0x12e   :  { %v766_v54 = vsel %vm764_vm2, %v763_v52, %v765_v53 }
 0x12f   :  { %v767_v55 = vmul.f32 1.4142135, %v766_v54 }
 0x131   :  { %v768_v56 = vpack.c.bf16 %v767_v55, %v767_v55 }
 0x133   :  { %1033 = vmatmul.mubr.msk.bf16.vlgmr.msra.gmra.mrb[8].mxu0 %vm801_vm3, %v768_v56 }
 0x206   :  { %v839_v57 = vpop.f32.mrb[8].mxu0 }
 0x207   :  { %v845_v59 = vmul.f32 0.125, %v839_v57  ;;  %v1034_v60 = vpop.f32.mrb[9].mxu0 }
 0x208   :  { %v842_v61 = vpop.f32.mrb[10].mxu0 }
 0x209   :  { %v853_v62 = vadd.f32 %v930_v58, %v845_v59  ;;  %v1035_v63 = vpop.f32.mrb[11].mxu0 }
 0x20b   :  { %855 = vst.msk [vmem:[%s1378_s5] sm:$0xf] %vm854_vm4, %v853_v62 }

// kernel: _lambda_.2
= control target key start
LH: loop header
LB: loop body
LE: loop exit
PB: predicated region body
PF: predicated region fallthrough
CT: control target
= control target key end

     0   :  { %8 = vsyncpa [#allocation4], 0  ;;  %s6303_s0 = inlined_call_operand.hbm [shape: f32[4,4,4,64], index: 0, kind: input, shape index: {}]   ;;  %s6304_s1 = inlined_call_operand.hbm [shape: bf16[3,3,128,64], index: 1, kind: input, shape index: {}]   ;;  %s6305_s2 = inlined_call_operand.vmem [shape: f32[1,64], index: 2, kind: input, shape index: {}]   ;;  %s6306_s3 = inlined_call_operand.vmem [shape: bf16[64,64], index: 3, kind: output, shape index: {}]  }
   0x1   :  { %9 = vsyncpa [#allocation6], 0  ;;  %s5285_s12 = smov [#allocation3]   ;;  %s5237_s16 = scalar_lea.hbm %s6303_s0, 1024 }
   0x2   :  { %s15_s13 = sshll.u32 %s5285_s12, 4  ;;  %p5238_p0 = scmp.ne.s32.totalorder %s6303_s0, %s5237_s16  ;;  %s16_s13 = int_to_ptr.vmem [resolvable:$true] %s15_s13 }
   0x3   :  { %p5241_p1 = scmp.lt.u32.totalorder %s5237_s16, %s6303_s0 }
   0x5   :  { %p5243_p2 = pnand %p5241_p1, %p5238_p0 }
   0x7   :  { %5246 = shalt.err (!%p5243_p2)
}
   0x8   :  { %s5247_s21 = scalar_lea.vmem %s16_s13, 1024  ;;  %p5252_p4 = scmp.lt.s32.totalorder %s16_s13, %s16_s13 }
   0x9   :  { %p5248_p3 = scmp.ne.s32.totalorder %s16_s13, %s5247_s21  ;;  %p5253_p5 = scmp.lt.s32.totalorder %s5247_s21, %s5247_s21 }
   0xb   :  { %p5254_p6 = por %p5253_p5, %p5252_p4 }
   0xd   :  { %p5255_p7 = pnand %p5254_p6, %p5248_p3 }
   0xf   :  { %5258 = shalt.err (!%p5255_p7)
}
  0x10   :  { %s5286_s22 = smov 64   ;;  %s5287_s23 = smov 4  }
  0x11   :  { %21 = dma.hbm_to_vmem [thread:$0]  %s6303_s0, 1024, %s16_s13, [#allocation4], %s5286_s22, %s5286_s22, %s5287_s23  }
  0x12   :  { %s5288_s26 = smov [#allocation5]   ;;  %s5259_s30 = scalar_lea.hbm %s6304_s1, 9216 }
  0x13   :  { %s27_s27 = sshll.u32 %s5288_s26, 4  ;;  %p5260_p8 = scmp.ne.s32.totalorder %s6304_s1, %s5259_s30  ;;  %s28_s27 = int_to_ptr.vmem [resolvable:$true] %s27_s27 }
  0x14   :  { %p5263_p9 = scmp.lt.u32.totalorder %s5259_s30, %s6304_s1 }
  0x16   :  { %p5265_p10 = pnand %p5263_p9, %p5260_p8 }
  0x18   :  { %5268 = shalt.err (!%p5265_p10)
}
  0x19   :  { %s5269_s8 = scalar_lea.vmem %s28_s27, 9216  ;;  %p5274_p12 = scmp.lt.s32.totalorder %s28_s27, %s28_s27 }
  0x1a   :  { %p5270_p11 = scmp.ne.s32.totalorder %s28_s27, %s5269_s8  ;;  %p5275_p13 = scmp.lt.s32.totalorder %s5269_s8, %s5269_s8 }
  0x1c   :  { %p5276_p0 = por %p5275_p13, %p5274_p12 }
  0x1e   :  { %p5277_p1 = pnand %p5276_p0, %p5270_p11 }
  0x20   :  { %5280 = shalt.err (!%p5277_p1)
}
  0x21   :  { %33 = dma.hbm_to_vmem [thread:$0]  %s6304_s1, 9216, %s28_s27, [#allocation6], %s5286_s22, %s5286_s22, %s5287_s23  }
  0x22   :  { %5281 = dma.done.wait [#allocation4], 1024  }
  0x23   :  { %5282 = vsyncadd [#allocation4], 4294966272 }
  0x24   :  { %5283 = dma.done.wait [#allocation6], 9216  }
  0x25   :  { %5284 = vsyncadd [#allocation6], 4294958080  ;;  %v5289_v0 = vmov 0   ;;  %vm59_vm0 = vcmask 519168   ;;  %v43_v1 = vld [vmem:[#allocation3] sm:$0xf] }
  0x26   :  { %207 = vst [vmem:[#allocation2 + $0x4] sm:$0x7] %v5289_v0  ;;  %208 = vst [vmem:[#allocation2 + $0x8] sm:$0x7] %v5289_v0  ;;  %v44_v2 = vld [vmem:[#allocation3 + $0x4] sm:$0xf]  ;;  %v5339_v10 = vpack.c.bf16 %v43_v1, %v43_v1 }
  0x27   :  { %209 = vst [vmem:[#allocation2 + $0xc] sm:$0x7] %v5289_v0  ;;  %210 = vst [vmem:[#allocation2 + $0x10] sm:$0x7] %v5289_v0  ;;  %v5335_v3 = vld [vmem:[#allocation3 + $0x8] sm:$0xf]  ;;  %v5341_v11 = vpack.c.bf16 %v44_v2, %v44_v2 }
  0x28   :  { %213 = vst [vmem:[#allocation2 + $0x1c] sm:$0x7] %v5289_v0  ;;  %214 = vst [vmem:[#allocation2 + $0x20] sm:$0x7] %v5289_v0  ;;  %v5337_v4 = vld [vmem:[#allocation3 + $0xc] sm:$0xf]  ;;  %v5345_v12 = vpack.c.bf16 %v5335_v3, %v5335_v3 }
  0x29   :  { %215 = vst [vmem:[#allocation2 + $0x24] sm:$0x7] %v5289_v0  ;;  %216 = vst [vmem:[#allocation2 + $0x28] sm:$0x7] %v5289_v0  ;;  %v47_v5 = vld [vmem:[#allocation3 + $0x10] sm:$0xf]  ;;  %v5353_v17 = vpack.c.bf16 %v5337_v4, %v5337_v4 }
  0x2a   :  { %219 = vst [vmem:[#allocation2 + $0x34] sm:$0x7] %v5289_v0  ;;  %220 = vst [vmem:[#allocation2 + $0x38] sm:$0x7] %v5289_v0  ;;  %v51_v6 = vld [vmem:[#allocation3 + $0x20] sm:$0xf]  ;;  %v5355_v18 = vpack.c.bf16 %v47_v5, %v47_v5 }
  0x2b   :  { %221 = vst [vmem:[#allocation2 + $0x3c] sm:$0x7] %v5289_v0  ;;  %222 = vst [vmem:[#allocation2 + $0x40] sm:$0x7] %v5289_v0  ;;  %v48_v7 = vld [vmem:[#allocation3 + $0x14] sm:$0xf]  ;;  %v5391_v50 = vpack.c.bf16 %v51_v6, %v51_v6 }
  0x2c   :  { %225 = vst [vmem:[#allocation2 + $0x4c] sm:$0x7] %v5289_v0  ;;  %226 = vst [vmem:[#allocation2 + $0x50] sm:$0x7] %v5289_v0  ;;  %v49_v8 = vld [vmem:[#allocation3 + $0x18] sm:$0xf]  ;;  %v5357_v19 = vpack.c.bf16 %v48_v7, %v48_v7 }
  0x2d   :  { %227 = vst [vmem:[#allocation2 + $0x54] sm:$0x7] %v5289_v0  ;;  %228 = vst [vmem:[#allocation2 + $0x58] sm:$0x7] %v5289_v0  ;;  %v52_v9 = vld [vmem:[#allocation3 + $0x24] sm:$0xf]  ;;  %v5359_v20 = vpack.c.bf16 %v49_v8, %v49_v8 }
  0x2e   :  { %206 = vst [vmem:[#allocation2] sm:$0x7] %v5289_v0  ;;  %211 = vst [vmem:[#allocation2 + $0x14] sm:$0x7] %v5289_v0  ;;  %v5347_v13 = vld [vmem:[#allocation3 + $0x1c] sm:$0xf]  ;;  %v5393_v51 = vpack.c.bf16 %v52_v9, %v52_v9 }
  0x2f   :  { %212 = vst [vmem:[#allocation2 + $0x18] sm:$0x7] %v5289_v0  ;;  %217 = vst [vmem:[#allocation2 + $0x2c] sm:$0x7] %v5289_v0  ;;  %v53_v14 = vld [vmem:[#allocation3 + $0x28] sm:$0xf]  ;;  %v5387_v47 = vpack.c.bf16 %v5347_v13, %v5347_v13 }
  0x30   :  { %218 = vst [vmem:[#allocation2 + $0x30] sm:$0x7] %v5289_v0  ;;  %223 = vst [vmem:[#allocation2 + $0x44] sm:$0x7] %v5289_v0  ;;  %v55_v15 = vld [vmem:[#allocation3 + $0x30] sm:$0xf]  ;;  %v5395_v55 = vpack.c.bf16 %v53_v14, %v53_v14 }
  0x31   :  { %224 = vst [vmem:[#allocation2 + $0x48] sm:$0x7] %v5289_v0  ;;  %229 = vst [vmem:[#allocation2 + $0x5c] sm:$0x7] %v5289_v0  ;;  %v5349_v16 = vld [vmem:[#allocation3 + $0x34] sm:$0xf]  ;;  %v5399_v58 = vpack.c.bf16 %v55_v15, %v55_v15 }
  0x32   :  { %v5361_v21 = vld [vmem:[#allocation3 + $0x38] sm:$0xf]  ;;  %v60_v22 = vsel %vm59_vm0, %v43_v1, 0.0  ;;  %v61_v23 = vsel %vm59_vm0, %v47_v5, 0.0  ;;  %v63_v24 = vsel %vm59_vm0, %v51_v6, 0.0  ;;  %v65_v25 = vsel %vm59_vm0, %v55_v15, 0.0 }
  0x33   :  { %v54_v26 = vld [vmem:[#allocation3 + $0x2c] sm:$0xf]  ;;  %v62_v27 = vadd.f32 %v61_v23, %v60_v22  ;;  %v67_v28 = vsel %vm59_vm0, %v44_v2, 0.0  ;;  %v68_v29 = vsel %vm59_vm0, %v48_v7, 0.0  ;;  %v70_v30 = vsel %vm59_vm0, %v52_v9, 0.0 }
  0x34   :  { %v69_v31 = vadd.f32 %v68_v29, %v67_v28  ;;  %v72_v32 = vsel %vm59_vm0, %v5349_v16, 0.0  ;;  %v74_v33 = vsel %vm59_vm0, %v5335_v3, 0.0  ;;  %v75_v34 = vsel %vm59_vm0, %v49_v8, 0.0  ;;  %v5375_v35 = vld [vmem:[#allocation3 + $0x3c] sm:$0xf] }
  0x35   :  { %v64_v36 = vadd.f32 %v63_v24, %v62_v27  ;;  %v76_v37 = vadd.f32 %v75_v34, %v74_v33  ;;  %v77_v38 = vsel %vm59_vm0, %v53_v14, 0.0  ;;  %v79_v39 = vsel %vm59_vm0, %v5361_v21, 0.0 }
  0x36   :  { %v71_v40 = vadd.f32 %v70_v30, %v69_v31  ;;  %v81_v41 = vsel %vm59_vm0, %v5337_v4, 0.0  ;;  %v82_v42 = vsel %vm59_vm0, %v5347_v13, 0.0  ;;  %v84_v43 = vsel %vm59_vm0, %v54_v26, 0.0 }
  0x37   :  { %v66_v44 = vadd.f32 %v65_v25, %v64_v36  ;;  %v78_v45 = vadd.f32 %v77_v38, %v76_v37  ;;  %v83_v46 = vadd.f32 %v82_v42, %v81_v41  ;;  %v86_v49 = vsel %vm59_vm0, %v5375_v35, 0.0 }
  0x38   :  { %v73_v48 = vadd.f32 %v72_v32, %v71_v40  ;;  %v5397_v57 = vpack.c.bf16 %v54_v26, %v54_v26  ;;  %v295_v59 = vshrl.u32 %v5339_v10, 16  ;;  %v302_v63 = vshrl.u32 %v5341_v11, 16 }
  0x39   :  { %v80_v52 = vadd.f32 %v79_v39, %v78_v45  ;;  %v85_v53 = vadd.f32 %v84_v43, %v83_v46  ;;  %v89_v54 = vmul.f32 0.25, %v66_v44  ;;  %vm423_vm8 = vcmask 518144  }
  0x3a   :  { %v90_v56 = vmul.f32 0.25, %v73_v48  ;;  %vm424_vm9 = vsmask.f32 2306  ;;  %vm475_vm12 = vcmask 526848   ;;  %vm717_vm13 = vsmask.f32 1280 }
  0x3b   :  { %v87_v60 = vadd.f32 %v86_v49, %v85_v53  ;;  %v91_v61 = vmul.f32 0.25, %v80_v52  ;;  %v93_v62 = vsub.f32 %v43_v1, %v89_v54  ;;  %v97_v22 = vsub.f32 %v47_v5, %v89_v54  ;;  %vm5539_vm11 = vmand %vm423_vm8, %vm424_vm9 }
  0x3c   :  { %v94_v0 = vsub.f32 %v44_v2, %v90_v56  ;;  %v98_v23 = vsub.f32 %v48_v7, %v90_v56  ;;  %v101_v24 = vsub.f32 %v51_v6, %v89_v54  ;;  %v102_v29 = vsub.f32 %v52_v9, %v90_v56 }
  0x3d   :  { %v92_v25 = vmul.f32 0.25, %v87_v60  ;;  %v95_v27 = vsub.f32 %v5335_v3, %v91_v61  ;;  %v99_v28 = vsub.f32 %v49_v8, %v91_v61  ;;  %v103_v30 = vsub.f32 %v53_v14, %v91_v61 }
  0x3e   :  { %v105_v31 = vsub.f32 %v55_v15, %v89_v54  ;;  %v106_v32 = vsub.f32 %v5349_v16, %v90_v56  ;;  %v107_v33 = vsub.f32 %v5361_v21, %v91_v61  ;;  %v109_v2 = vmul.f32 %v93_v62, %v93_v62 }
  0x3f   :  { %v96_v34 = vsub.f32 %v5337_v4, %v92_v25  ;;  %v100_v1 = vsub.f32 %v5347_v13, %v92_v25  ;;  %v104_v36 = vsub.f32 %v54_v26, %v92_v25  ;;  %v108_v5 = vsub.f32 %v5375_v35, %v92_v25 }
  0x40   :  { %v110_v6 = vmul.f32 %v94_v0, %v94_v0  ;;  %v111_v7 = vmul.f32 %v95_v27, %v95_v27  ;;  %v113_v37 = vmul.f32 %v97_v22, %v97_v22  ;;  %v114_v8 = vmul.f32 %v98_v23, %v98_v23 }
  0x41   :  { %v112_v3 = vmul.f32 %v96_v34, %v96_v34  ;;  %v115_v9 = vmul.f32 %v99_v28, %v99_v28  ;;  %v117_v14 = vmul.f32 %v101_v24, %v101_v24  ;;  %v116_v15 = vmul.f32 %v100_v1, %v100_v1 }
  0x42   :  { %v118_v38 = vmul.f32 %v102_v29, %v102_v29  ;;  %v119_v39 = vmul.f32 %v103_v30, %v103_v30  ;;  %v121_v40 = vmul.f32 %v105_v31, %v105_v31  ;;  %v120_v41 = vmul.f32 %v104_v36, %v104_v36 }
  0x43   :  { %v122_v42 = vmul.f32 %v106_v32, %v106_v32  ;;  %v123_v4 = vmul.f32 %v107_v33, %v107_v33  ;;  %v125_v13 = vsel %vm59_vm0, %v109_v2, 0.0  ;;  %v124_v26 = vmul.f32 %v108_v5, %v108_v5 }
  0x44   :  { %v126_v43 = vsel %vm59_vm0, %v113_v37, 0.0  ;;  %v128_v44 = vsel %vm59_vm0, %v117_v14, 0.0  ;;  %v132_v45 = vsel %vm59_vm0, %v110_v6, 0.0  ;;  %v130_v48 = vsel %vm59_vm0, %v121_v40, 0.0 }
  0x45   :  { %v127_v46 = vadd.f32 %v126_v43, %v125_v13  ;;  %v133_v49 = vsel %vm59_vm0, %v114_v8, 0.0  ;;  %v135_v52 = vsel %vm59_vm0, %v118_v38, 0.0  ;;  %v139_v54 = vsel %vm59_vm0, %v111_v7, 0.0 }
  0x46   :  { %v134_v53 = vadd.f32 %v133_v49, %v132_v45  ;;  %v140_v56 = vsel %vm59_vm0, %v115_v9, 0.0  ;;  %v142_v60 = vsel %vm59_vm0, %v119_v39, 0.0  ;;  %v137_v62 = vsel %vm59_vm0, %v122_v42, 0.0 }
  0x47   :  { %v129_v61 = vadd.f32 %v128_v44, %v127_v46  ;;  %v141_v0 = vadd.f32 %v140_v56, %v139_v54  ;;  %v146_v22 = vsel %vm59_vm0, %v112_v3, 0.0  ;;  %v144_v24 = vsel %vm59_vm0, %v123_v4, 0.0 }
  0x48   :  { %v136_v23 = vadd.f32 %v135_v52, %v134_v53  ;;  %v147_v25 = vsel %vm59_vm0, %v116_v15, 0.0  ;;  %v149_v27 = vsel %vm59_vm0, %v120_v41, 0.0  ;;  %v5426_v31 = vpack.c.bf16 %v5349_v16, %v5349_v16 }
  0x49   :  { %v131_v28 = vadd.f32 %v130_v48, %v129_v61  ;;  %v143_v29 = vadd.f32 %v142_v60, %v141_v0  ;;  %v148_v30 = vadd.f32 %v147_v25, %v146_v22  ;;  %v151_v33 = vsel %vm59_vm0, %v124_v26, 0.0 }
  0x4a   :  { %v138_v32 = vadd.f32 %v137_v62, %v136_v23  ;;  %v298_v34 = vshll.u32 %v5339_v10, 16  ;;  %v309_v1 = vshrl.u32 %v5345_v12, 16  ;;  %v297_v6 = vrot.slane %v295_v59, 7 }
  0x4b   :  { %v145_v36 = vadd.f32 %v144_v24, %v143_v29  ;;  %v150_v2 = vadd.f32 %v149_v27, %v148_v30  ;;  %v153_v5 = vmul.f32 0.25, %v131_v28  ;;  %v304_v37 = vrot.slane %v302_v63, 7 }
  0x4c   :  { %v154_v7 = vmul.f32 0.25, %v138_v32  ;;  %v305_v16 = vshll.u32 %v5341_v11, 16  ;;  %v311_v3 = vrot.slane %v309_v1, 7  ;;  %v312_v15 = vshll.u32 %v5345_v12, 16 }
  0x4d   :  { %v152_v8 = vadd.f32 %v151_v33, %v150_v2  ;;  %v155_v9 = vmul.f32 0.25, %v145_v36  ;;  %v5436_v14 = vadd.f32 1e-08, %v153_v5  ;;  %v5443_v39 = vpack.c.bf16 %v5361_v21, %v5361_v21 }
  0x4e   :  { %v5439_v38 = vadd.f32 1e-08, %v154_v7  ;;  %v5447_v10 = vpack.c.bf16 %v5375_v35, %v5375_v35  ;;  %v316_v59 = vshrl.u32 %v5353_v17, 16  ;;  %v5453_v40 = vor.u32 %v298_v34, %v297_v6 }
  0x4f   :  { %v156_v11 = vmul.f32 0.25, %v152_v8  ;;  %v5450_v63 = vadd.f32 1e-08, %v155_v9  ;;  %5205 = vrsqrt.f32 %v5436_v14  ;;  %v5456_v12 = vor.u32 %v305_v16, %v304_v37 }
  0x50   :  { %5207 = vrsqrt.f32 %v5439_v38  ;;  %v319_v21 = vshll.u32 %v5353_v17, 16  ;;  %v323_v41 = vshrl.u32 %v5355_v18, 16  ;;  %vm163_vm1 = vcmp.eq.f32.partialorder %v5436_v14, inf }
  0x51   :  { %v5460_v42 = vadd.f32 1e-08, %v156_v11  ;;  %5209 = vrsqrt.f32 %v5450_v63  ;;  %v5464_v35 = vor.u32 %v312_v15, %v311_v3  ;;  %vm165_vm2 = vcmp.eq.f32.partialorder %v5436_v14, 0.0 }
  0x52   :  { %v166_v4 = vand.u32 2147483648, %v5436_v14  ;;  %vm170_vm3 = vcmp.eq.f32.partialorder %v5439_v38, inf  ;;  %v173_v13 = vand.u32 2147483648, %v5439_v38  ;;  %v318_v26 = vrot.slane %v316_v59, 7 }
  0x53   :  { %vm172_vm4 = vcmp.eq.f32.partialorder %v5439_v38, 0.0  ;;  %vm177_vm5 = vcmp.eq.f32.partialorder %v5450_v63, inf  ;;  %v180_v17 = vand.u32 2147483648, %v5450_v63  ;;  %5211 = vrsqrt.f32 %v5460_v42 }
  0x54   :  { %v187_v43 = vand.u32 2147483648, %v5460_v42  ;;  %vm179_vm6 = vcmp.eq.f32.partialorder %v5450_v63, 0.0  ;;  %v5476_v44 = vor.u32 %v319_v21, %v318_v26  ;;  %v325_v45 = vrot.slane %v323_v41, 7 }
  0x55   :  { %v326_v46 = vshll.u32 %v5355_v18, 16  ;;  %v330_v48 = vshrl.u32 %v5357_v19, 16  ;;  %vm184_vm7 = vcmp.eq.f32.partialorder %v5460_v42, inf  ;;  %v333_v49 = vshll.u32 %v5357_v19, 16 }
  0x56   :  { %v337_v52 = vshrl.u32 %v5359_v20, 16  ;;  %v340_v53 = vshll.u32 %v5359_v20, 16  ;;  %v344_v54 = vshrl.u32 %v5387_v47, 16  ;;  %vm186_vm10 = vcmp.eq.f32.partialorder %v5460_v42, 0.0 }
  0x57   :  { %v5486_v56 = vor.u32 %v326_v46, %v325_v45  ;;  %v332_v60 = vrot.slane %v330_v48, 7  ;;  %v347_v18 = vshll.u32 %v5387_v47, 16  ;;  %v351_v61 = vshrl.u32 %v5391_v50, 16  ;;  %v432_v48 = vld [vmem:[#allocation2 + $0xc] sm:$0x7] }
  0x58   :  { %v339_v62 = vrot.slane %v337_v52, 7  ;;  %v346_v0 = vrot.slane %v344_v54, 7  ;;  %v354_v19 = vshll.u32 %v5391_v50, 16  ;;  %v358_v22 = vshrl.u32 %v5393_v51, 16  ;;  %v441_v54 = vld [vmem:[#allocation2 + $0x20] sm:$0x7] }
  0x59   :  { %v5492_v20 = vor.u32 %v333_v49, %v332_v60  ;;  %v353_v23 = vrot.slane %v351_v61, 7  ;;  %v361_v24 = vshll.u32 %v5393_v51, 16  ;;  %v365_v25 = vshrl.u32 %v5395_v55, 16  ;;  %v5206_v27 = vpop.eup %5205 }
  0x5a   :  { %v5496_v28 = vor.u32 %v340_v53, %v339_v62  ;;  %v5498_v29 = vor.u32 %v347_v18, %v346_v0  ;;  %v360_v47 = vrot.slane %v358_v22, 7  ;;  %v368_v30 = vshll.u32 %v5395_v55, 16  ;;  %v5208_v32 = vpop.eup %5207  ;;  %v444_v0 = vld [vmem:[#allocation2 + $0x24] sm:$0x7]  ;;  %v450_v22 = vld [vmem:[#allocation2 + $0x34] sm:$0x7] }
  0x5b   :  { %v162_v50 = vmul.f32 %v5206_v27, %v5436_v14  ;;  %v5502_v33 = vor.u32 %v354_v19, %v353_v23  ;;  %v367_v34 = vrot.slane %v365_v25, 7  ;;  %v372_v1 = vshrl.u32 %v5397_v57, 16  ;;  %v5210_v36 = vpop.eup %5209  ;;  %v447_v19 = vld [vmem:[#allocation2 + $0x28] sm:$0x7] }
  0x5c   :  { %v169_v51 = vmul.f32 %v5208_v32, %v5439_v38  ;;  %v5506_v2 = vor.u32 %v361_v24, %v360_v47  ;;  %v375_v5 = vshll.u32 %v5397_v57, 16  ;;  %v379_v6 = vshrl.u32 %v5399_v58, 16  ;;  %v453_v47 = vld [vmem:[#allocation2 + $0x38] sm:$0x7]  ;;  %v459_v32 = vld [vmem:[#allocation2 + $0x40] sm:$0x7] }
  0x5d   :  { %v164_v55 = vsel %vm163_vm1, %v5436_v14, %v162_v50  ;;  %v176_v7 = vmul.f32 %v5210_v36, %v5450_v63  ;;  %v5514_v37 = vor.u32 %v368_v30, %v367_v34  ;;  %v374_v16 = vrot.slane %v372_v1, 7  ;;  %v5212_v3 = vpop.eup %5211  ;;  %v426_v14 = vld [vmem:[#allocation2 + $0x4] sm:$0x7]  ;;  %v456_v30 = vld [vmem:[#allocation2 + $0x3c] sm:$0x7] }
  0x5e   :  { %v167_v8 = vsel %vm165_vm2, %v166_v4, %v164_v55  ;;  %v171_v9 = vsel %vm170_vm3, %v5439_v38, %v169_v51  ;;  %v381_v57 = vrot.slane %v379_v6, 7  ;;  %v382_v15 = vshll.u32 %v5399_v58, 16  ;;  %v429_v4 = vld [vmem:[#allocation2 + $0x8] sm:$0x7]  ;;  %v465_v34 = vld [vmem:[#allocation2 + $0x50] sm:$0x7] }
  0x5f   :  { %v174_v59 = vsel %vm172_vm4, %v173_v13, %v171_v9  ;;  %v178_v11 = vsel %vm177_vm5, %v5450_v63, %v176_v7  ;;  %v183_v21 = vmul.f32 %v5212_v3, %v5460_v42  ;;  %v189_v41 = vsel %vm59_vm0, %v167_v8, 0.0  ;;  %v435_v63 = vld [vmem:[#allocation2 + $0x10] sm:$0x7]  ;;  %v468_v1 = vld [vmem:[#allocation2 + $0x54] sm:$0x7]  ;;  %v5110_v9 = vld [vmem:[#allocation5 + $0x100] sm:$0xff]  }
  0x60   :  { %v181_v26 = vsel %vm179_vm6, %v180_v17, %v178_v11  ;;  %v190_v45 = vsel %vm59_vm0, %v174_v59, 0.0  ;;  %v377_v46 = vor.u32 %v375_v5, %v374_v16  ;;  %v384_v58 = vor.u32 %v382_v15, %v381_v57  ;;  %v438_v17 = vld [vmem:[#allocation2 + $0x1c] sm:$0x7]  ;;  %v471_v36 = vld [vmem:[#allocation2 + $0x58] sm:$0x7]  ;;  %4903 = vmatprep.subr.bf16.mxu0 %v5110_v9  ;;  %v5111_v57 = vld [vmem:[#allocation5 + $0x48] sm:$0xff]  }
  0x61   :  { %v185_v38 = vsel %vm184_vm7, %v5460_v42, %v183_v21  ;;  %v191_v13 = vadd.f32 %v190_v45, %v189_v41  ;;  %v192_v49 = vsel %vm59_vm0, %v181_v26, 0.0  ;;  %v386_v52 = vshrl.u32 %v5426_v31, 16  ;;  %v462_v42 = vld [vmem:[#allocation2 + $0x4c] sm:$0x7]  ;;  %4904 = vmatpush3.bf16.msra.mxu0 %v5110_v9  ;;  %v5113_v59 = vld [vmem:[#allocation5 + $0x50] sm:$0xff]   ;;  %v5115_v21 = vld [vmem:[#allocation5 + $0x58] sm:$0xff]  }
  0x62   :  { %v188_v60 = vsel %vm186_vm10, %v187_v43, %v185_v38  ;;  %v389_v18 = vshll.u32 %v5426_v31, 16  ;;  %v393_v61 = vshrl.u32 %v5443_v39, 16  ;;  %v396_v62 = vshll.u32 %v5443_v39, 16  ;;  %v5112_v15 = vld [vmem:[#allocation5 + $0x108] sm:$0xff]   ;;  %v5114_v11 = vld [vmem:[#allocation5 + $0x110] sm:$0xff]   ;;  %v5116_v41 = vld [vmem:[#allocation5 + $0x118] sm:$0xff]  }
  0x63   :  { %v193_v23 = vadd.f32 %v192_v49, %v191_v13  ;;  %v194_v24 = vsel %vm59_vm0, %v188_v60, 0.0  ;;  %v388_v25 = vrot.slane %v386_v52, 7  ;;  %v400_v27 = vshrl.u32 %v5447_v10, 16  ;;  %4905 = vmatprep.subr.bf16.mxu0 %v5112_v15  ;;  %v5119_v26 = vld [vmem:[#allocation5 + $0x68] sm:$0xff]   ;;  %v5124_v38 = vld [vmem:[#allocation5 + $0x138] sm:$0xff]   ;;  %v5596_v13 = vld [vmem:[#allocation5] sm:$0xff]  }
  0x64   :  { %v395_v43 = vrot.slane %v393_v61, 7  ;;  %v403_v31 = vshll.u32 %v5447_v10, 16  ;;  %v427_v39 = vsel %vm5539_vm11, %v5453_v40, %v426_v14  ;;  %v430_v50 = vsel %vm5539_vm11, %v5456_v12, %v429_v4  ;;  %v5117_v14 = vld [vmem:[#allocation5 + $0x60] sm:$0xff]   ;;  %v5120_v45 = vld [vmem:[#allocation5 + $0x128] sm:$0xff]   ;;  %vm5662_vm7 = vmand %vm475_vm12, %vm424_vm9 }
  0x65   :  { %v195_v51 = vadd.f32 %v194_v24, %v193_v23  ;;  %v391_v5 = vor.u32 %v389_v18, %v388_v25  ;;  %v402_v6 = vrot.slane %v400_v27, 7  ;;  %v433_v55 = vsel %vm5539_vm11, %v5464_v35, %v432_v48  ;;  %428 = vst [vmem:[#allocation2 + $0x4] sm:$0x7] %v427_v39  ;;  %431 = vst [vmem:[#allocation2 + $0x8] sm:$0x7] %v430_v50  ;;  %v5118_v4 = vld [vmem:[#allocation5 + $0x120] sm:$0xff]  }
  0x66   :  { %v398_v10 = vor.u32 %v396_v62, %v395_v43  ;;  %434 = vst [vmem:[#allocation2 + $0xc] sm:$0x7] %v433_v55  ;;  %v436_v40 = vsel %vm5539_vm11, %v5476_v44, %v435_v63  ;;  %v439_v12 = vsel %vm5539_vm11, %v5486_v56, %v438_v17  ;;  %v442_v7 = vsel %vm5539_vm11, %v5492_v20, %v441_v54  ;;  %v5123_v48 = vld [vmem:[#allocation5 + $0x78] sm:$0xff]   ;;  %v5599_v49 = vld [vmem:[#allocation5 + $0x140] sm:$0xff]  }
  0x67   :  { %196 = vadd.xlane.f32.xlu0 %v195_v51  ;;  %v405_v16 = vor.u32 %v403_v31, %v402_v6  ;;  %437 = vst [vmem:[#allocation2 + $0x10] sm:$0x7] %v436_v40  ;;  %440 = vst [vmem:[#allocation2 + $0x1c] sm:$0x7] %v439_v12  ;;  %v445_v35 = vsel %vm5539_vm11, %v5496_v28, %v444_v0  ;;  %v448_v44 = vsel %vm5539_vm11, %v5498_v29, %v447_v19  ;;  %v970_v27 = vlaneseq }
  0x68   :  { %443 = vst [vmem:[#allocation2 + $0x20] sm:$0x7] %v442_v7  ;;  %v451_v56 = vsel %vm5539_vm11, %v5502_v33, %v450_v22  ;;  %446 = vst [vmem:[#allocation2 + $0x24] sm:$0x7] %v445_v35  ;;  %v454_v20 = vsel %vm5539_vm11, %v5506_v2, %v453_v47  ;;  %v457_v3 = vsel %vm5539_vm11, %v5514_v37, %v456_v30  ;;  %v5109_v37 = vld [vmem:[#allocation5 + $0x40] sm:$0xff]   ;;  %4906 = vmatpush3.bf16.msra.mxu0 %v5112_v15  ;;  %vm1511_vm2 = vcmask 1040384  }
  0x69   :  { %449 = vst [vmem:[#allocation2 + $0x28] sm:$0x7] %v448_v44  ;;  %452 = vst [vmem:[#allocation2 + $0x34] sm:$0x7] %v451_v56  ;;  %v460_v28 = vsel %vm5539_vm11, %v377_v46, %v459_v32  ;;  %v463_v29 = vsel %vm5539_vm11, %v384_v58, %v462_v42  ;;  %v466_v33 = vsel %vm5539_vm11, %v391_v5, %v465_v34  ;;  %4807 = vmatprep.subr.bf16.mxu1 %v5109_v37  ;;  %v5121_v46 = vld [vmem:[#allocation5 + $0x70] sm:$0xff]   ;;  %vm1512_vm3 = vcmask 1042434  }
  0x6a   :  { %455 = vst [vmem:[#allocation2 + $0x38] sm:$0x7] %v454_v20  ;;  %458 = vst [vmem:[#allocation2 + $0x3c] sm:$0x7] %v457_v3  ;;  %v469_v2 = vsel %vm5539_vm11, %v398_v10, %v468_v1  ;;  %v472_v8 = vsel %vm5539_vm11, %v405_v16, %v471_v36  ;;  %4808 = vmatpush3.bf16.msra.mxu1 %v5109_v37  ;;  %4907 = vmatprep.subr.bf16.mxu0 %v5114_v11  ;;  %v5122_v58 = vld [vmem:[#allocation5 + $0x130] sm:$0xff]   ;;  %v5604_v6 = vshrl.u32 %v970_v27, 7 }
  0x6b   :  { %461 = vst [vmem:[#allocation2 + $0x40] sm:$0x7] %v460_v28  ;;  %464 = vst [vmem:[#allocation2 + $0x4c] sm:$0x7] %v463_v29  ;;  %4809 = vmatprep.subr.bf16.mxu1 %v5111_v57  ;;  %vm718_vm14 = vsmask.f32 3336 }
  0x6c   :  { %467 = vst [vmem:[#allocation2 + $0x50] sm:$0x7] %v466_v33  ;;  %470 = vst [vmem:[#allocation2 + $0x54] sm:$0x7] %v469_v2  ;;  %4908 = vmatpush3.bf16.msra.mxu0 %v5114_v11  ;;  %vm720_vm15 = vsmask.f32 5392 }
  0x6d   :  { %473 = vst [vmem:[#allocation2 + $0x58] sm:$0x7] %v472_v8  ;;  %4909 = vmatprep.subr.bf16.mxu0 %v5116_v41  ;;  %v4450_v52 = vld.sshfl [vmem:[#allocation2] sm:$0x13 pattern:$0x76325410]  ;;  %vm5646_vm6 = vmor %vm717_vm13, %vm718_vm14 }
  0x6e   :  { %4810 = vmatpush3.bf16.msra.mxu1 %v5111_v57  ;;  %v4454_v53 = vld.sshfl [vmem:[#allocation2 + $0x18] sm:$0x13 pattern:$0x76325410]  ;;  %v725_v63 = vshrl.u32 %v4450_v52, 16  ;;  %v728_v17 = vshll.u32 %v4450_v52, 16  ;;  %v596_v62 = vcombine.high %v4450_v52, %v4450_v52  ;;  %vm5676_vm8 = vmor %vm5646_vm6, %vm720_vm15 }
  0x6f   :  { %4811 = vmatprep.subr.bf16.mxu1 %v5113_v59  ;;  %v4458_v54 = vld.sshfl [vmem:[#allocation2 + $0x30] sm:$0x13 pattern:$0x76325410]  ;;  %v781_v60 = vshrl.u32 %v4454_v53, 16  ;;  %v784_v18 = vshll.u32 %v4454_v53, 16  ;;  %v628_v47 = vcombine.high %v4454_v53, %v4454_v53  ;;  %vm5688_vm9 = vmor %vm1511_vm2, %vm1512_vm3 }
  0x70   :  { %4910 = vmatpush3.bf16.msra.mxu0 %v5116_v41  ;;  %v4462_v61 = vld.sshfl [vmem:[#allocation2 + $0x48] sm:$0x13 pattern:$0x76325410]  ;;  %v727_v0 = vrot.slane %v725_v63, 6  ;;  %v730_v19 = vrot.slane %v728_v17, 7  ;;  %v660_v39 = vcombine.high %v4458_v54, %v4458_v54 }
  0x71   :  { %4911 = vmatprep.subr.bf16.mxu0 %v5118_v4  ;;  %v837_v22 = vshrl.u32 %v4458_v54, 16  ;;  %v840_v23 = vshll.u32 %v4458_v54, 16  ;;  %v893_v24 = vshrl.u32 %v4462_v61, 16  ;;  %v896_v25 = vshll.u32 %v4462_v61, 16  ;;  %v477_v17 = vld [vmem:[#allocation2 + $0x4] sm:$0x7] }
  0x72   :  { %4812 = vmatpush3.bf16.msra.mxu1 %v5113_v59  ;;  %v783_v30 = vrot.slane %v781_v60, 6  ;;  %v786_v32 = vrot.slane %v784_v18, 7  ;;  %v5602_v42 = vshll.u32 %v596_v62, 16  ;;  %v731_v31 = vor.u32 %v730_v19, %v727_v0  ;;  %v480_v54 = vld [vmem:[#allocation2 + $0x8] sm:$0x7] }
  0x73   :  { %4813 = vmatprep.subr.bf16.mxu1 %v5115_v21  ;;  %v839_v50 = vrot.slane %v837_v22, 6  ;;  %v842_v34 = vrot.slane %v840_v23, 7  ;;  %v692_v36 = vcombine.high %v4462_v61, %v4462_v61  ;;  %v895_v51 = vrot.slane %v893_v24, 6  ;;  %v483_v60 = vld [vmem:[#allocation2 + $0xc] sm:$0x7] }
  0x74   :  { %4912 = vmatpush3.bf16.msra.mxu0 %v5118_v4  ;;  %v898_v5 = vrot.slane %v896_v25, 7  ;;  %v787_v55 = vor.u32 %v786_v32, %v783_v30  ;;  %v5606_v10 = vshll.u32 %v628_v47, 16  ;;  %v736_v12 = vrot.slane %v5602_v42, 7  ;;  %v486_v61 = vld [vmem:[#allocation2 + $0x10] sm:$0x7] }
  0x75   :  { %4913 = vmatprep.subr.bf16.mxu0 %v5120_v45  ;;  %v5609_v7 = vrot.slane %v731_v31, 2  ;;  %v843_v16 = vor.u32 %v842_v34, %v839_v50  ;;  %v5611_v35 = vshll.u32 %v660_v39, 16  ;;  %v4605_v44 = vld.sshfl [vmem:[#allocation2 + $0x14] sm:$0x13 pattern:$0x76325410] }
  0x76   :  { %4814 = vmatpush3.bf16.msra.mxu1 %v5115_v21  ;;  %v899_v20 = vor.u32 %v898_v5, %v895_v51  ;;  %v5613_v3 = vshll.u32 %v692_v36, 16  ;;  %v5615_v28 = vld.sshfl [vmem:[#allocation2 + $0x2c] sm:$0x13 pattern:$0x76325410]  ;;  %v5617_v29 = vrot.slane %v787_v55, 2  ;;  %v3368_v52 = vcombine.high %v4605_v44, %v4605_v44 }
  0x77   :  { %4815 = vmatprep.subr.bf16.mxu1 %v5117_v14  ;;  %v792_v33 = vrot.slane %v5606_v10, 7  ;;  %v5620_v2 = vld.sshfl [vmem:[#allocation2] sm:$0x12 pattern:$0x76325410]  ;;  %v3508_v15 = vshrl.u32 %v4605_v44, 16 }
  0x78   :  { %4914 = vmatpush3.bf16.msra.mxu0 %v5120_v45  ;;  %vm722_vm1 = vsmask.f32 7448  ;;  %v5290_v37 = vmov 1983009808   ;;  %v3511_v59 = vshll.u32 %v4605_v44, 16  ;;  %v5626_v11 = vrot.slane %v843_v16, 2 }
  0x79   :  { %4915 = vmatprep.subr.bf16.mxu0 %v5122_v58  ;;  %v5622_v9 = vunpack.c.l.s4 %v5290_v37  ;;  %v5624_v57 = vld.sshfl [vmem:[#allocation2 + $0x18] sm:$0x12 pattern:$0x76325410]  ;;  %v848_v21 = vrot.slane %v5611_v35, 7  ;;  %v3564_v41 = vshrl.u32 %v5615_v28, 16  ;;  %v3400_v37 = vcombine.high %v5615_v28, %v5615_v28  ;;  %vm5709_vm10 = vmor %vm5676_vm8, %vm722_vm1 }
  0x7a   :  { %4816 = vmatpush3.bf16.msra.mxu1 %v5117_v14  ;;  %v3567_v14 = vshll.u32 %v5615_v28, 16  ;;  %v904_v45 = vrot.slane %v5613_v3, 7  ;;  %vm1514_vm4 = vcmask 1044484   ;;  %vm1516_vm5 = vcmask 1046534   ;;  %v489_v24 = vld [vmem:[#allocation2 + $0x1c] sm:$0x7] }
  0x7b   :  { %4817 = vmatprep.subr.bf16.mxu1 %v5119_v26  ;;  %v5640_v53 = vrot.slane %v3508_v15, 6  ;;  %v5642_v63 = vrot.slane %v3511_v59, 7  ;;  %v5650_v62 = vld.sshfl [vmem:[#allocation2 + $0x48] sm:$0x12 pattern:$0x76325410]  ;;  %v969_v23 = vunpack.c.0.s8 %v5622_v9  ;;  %vm5732_vm11 = vmor %vm5688_vm9, %vm1514_vm4  ;;  %v5762_v42 = vsel %vm5709_vm10, %v5617_v29, %v792_v33 }
  0x7c   :  { %4916 = vmatpush3.bf16.msra.mxu0 %v5122_v58  ;;  %v1422_v58 = vcombine.high %v5624_v57, %v5624_v57  ;;  %v5652_v0 = vrot.slane %v3564_v41, 6  ;;  %v5654_v19 = vrot.slane %v3567_v14, 7  ;;  %v492_v25 = vld [vmem:[#allocation2 + $0x20] sm:$0x7]  ;;  %v495_v27 = vld [vmem:[#allocation2 + $0x24] sm:$0x7]  ;;  %vm5774_vm12 = vmor %vm5732_vm11, %vm1516_vm5 }
  0x7d   :  { %4917 = vmatprep.subr.bf16.mxu0 %v5124_v38  ;;  %v498_v47 = vld [vmem:[#allocation2 + $0x28] sm:$0x7]  ;;  %v4498_v30 = vrot.slane %v5620_v2, 9  ;;  %v501_v31 = vld [vmem:[#allocation2 + $0x34] sm:$0x7]  ;;  %v4502_v50 = vrot.slane %v5624_v57, 9  ;;  %v3514_v16 = vor.u32 %v5642_v63, %v5640_v53 }
  0x7e   :  { %4818 = vmatpush3.bf16.msra.mxu1 %v5119_v26  ;;  %v5631_v26 = vrot.slane %v899_v20, 2  ;;  %v5658_v32 = vld.sshfl [vmem:[#allocation2 + $0x44] sm:$0x13 pattern:$0x76325410]  ;;  %v5669_v34 = vrot.slane %v1422_v58, 7  ;;  %v3570_v9 = vor.u32 %v5654_v19, %v5652_v0 }
  0x7f   :  { %4819 = vmatprep.subr.bf16.mxu1 %v5121_v46  ;;  %v504_v5 = vld [vmem:[#allocation2 + $0x38] sm:$0x7]  ;;  %v507_v55 = vld [vmem:[#allocation2 + $0x3c] sm:$0x7]  ;;  %v5684_v44 = vshll.u32 %v3368_v52, 16  ;;  %v3620_v15 = vshrl.u32 %v5658_v32, 16 }
  0x80   :  { %4918 = vmatpush3.bf16.msra.mxu0 %v5124_v38  ;;  %v5638_v38 = vld.sshfl [vmem:[#allocation2 + $0x30] sm:$0x12 pattern:$0x76325410]  ;;  %v513_v20 = vld [vmem:[#allocation2 + $0x4c] sm:$0x7] }
  0x81   :  { %4927 = vmatprep.subr.bf16.mxu0 %v5599_v49  ;;  %v3623_v59 = vshll.u32 %v5658_v32, 16  ;;  %v516_v28 = vld [vmem:[#allocation2 + $0x50] sm:$0x7]  ;;  %v519_v58 = vld [vmem:[#allocation2 + $0x54] sm:$0x7]  ;;  %v4506_v51 = vrot.slane %v5638_v38, 9 }
  0x82   :  { %4820 = vmatpush3.bf16.msra.mxu1 %v5121_v46  ;;  %v1390_v46 = vcombine.high %v5620_v2, %v5620_v2  ;;  %v4510_v10 = vrot.slane %v5650_v62, 9  ;;  %v3519_v29 = vrot.slane %v5684_v44, 7  ;;  %v5782_v35 = vrot.slane %v3570_v9, 2 }
  0x83   :  { %4821 = vmatprep.subr.bf16.mxu1 %v5123_v48  ;;  %v5784_v33 = vshll.u32 %v3400_v37, 16 }
  0x84   :  { %v5666_v39 = vrot.slane %v1390_v46, 7 }
  0x86   :  { %4822 = vmatpush3.bf16.msra.mxu1 %v5123_v48 }
  0x87   :  { %4831 = vmatprep.subr.bf16.mxu1 %v5596_v13 }
  0xf4   :  { %v197_v43 = vpop.xlane.xlu0 %196 }
  0xf5   :  { %v198_v1 = vrot.slane %v197_v43, 4 }
  0xf7   :  { %v199_v40 = vadd.f32 %v198_v1, %v197_v43  ;;  %v1454_v1 = vcombine.high %v5638_v38, %v5638_v38  ;;  %v5779_v38 = vrot.slane %v3514_v16, 2 }
  0xf9   :  { %v200_v56 = vrot.slane %v199_v40, 2 }
  0xfb   :  { %v201_v8 = vadd.f32 %v200_v56, %v199_v40  ;;  %v1486_v40 = vcombine.high %v5650_v62, %v5650_v62  ;;  %v510_v56 = vld [vmem:[#allocation2 + $0x40] sm:$0x7]  ;;  %v5797_v62 = vsel %vm5709_vm10, %v5631_v26, %v904_v45 }
  0xfd   :  { %v202_v4 = vrot.slane %v201_v8, 1 }
  0xff   :  { %v203_v48 = vadd.f32 %v202_v4, %v201_v8 }
 0x101   :  { %v205_v22 = vmul.f32 0.0009765625, %v203_v48  ;;  %v522_v48 = vld [vmem:[#allocation2 + $0x58] sm:$0x7] }
 0x103   :  { %v474_v36 = vpack.c.bf16 %v205_v22, %v205_v22 }
 0x105   :  { %v478_v41 = vsel %vm5662_vm7, %v474_v36, %v477_v17  ;;  %v481_v14 = vsel %vm5662_vm7, %v474_v36, %v480_v54  ;;  %v484_v4 = vsel %vm5662_vm7, %v474_v36, %v483_v60  ;;  %v487_v46 = vsel %vm5662_vm7, %v474_v36, %v486_v61 }
 0x106   :  { %479 = vst [vmem:[#allocation2 + $0x4] sm:$0x7] %v478_v41  ;;  %482 = vst [vmem:[#allocation2 + $0x8] sm:$0x7] %v481_v14  ;;  %v490_v53 = vsel %vm5662_vm7, %v474_v36, %v489_v24  ;;  %v493_v63 = vsel %vm5662_vm7, %v474_v36, %v492_v25  ;;  %v496_v17 = vsel %vm5662_vm7, %v474_v36, %v495_v27 }
 0x107   :  { %485 = vst [vmem:[#allocation2 + $0xc] sm:$0x7] %v484_v4  ;;  %488 = vst [vmem:[#allocation2 + $0x10] sm:$0x7] %v487_v46  ;;  %v499_v54 = vsel %vm5662_vm7, %v474_v36, %v498_v47  ;;  %v502_v60 = vsel %vm5662_vm7, %v474_v36, %v501_v31  ;;  %v505_v18 = vsel %vm5662_vm7, %v474_v36, %v504_v5  ;;  %v1552_v5 = vrot.slane %v1454_v1, 7 }
 0x108   :  { %491 = vst [vmem:[#allocation2 + $0x1c] sm:$0x7] %v490_v53  ;;  %494 = vst [vmem:[#allocation2 + $0x20] sm:$0x7] %v493_v63  ;;  %v508_v61 = vsel %vm5662_vm7, %v474_v36, %v507_v55  ;;  %v511_v0 = vsel %vm5662_vm7, %v474_v36, %v510_v56  ;;  %v514_v22 = vsel %vm5662_vm7, %v474_v36, %v513_v20 }
 0x109   :  { %497 = vst [vmem:[#allocation2 + $0x24] sm:$0x7] %v496_v17  ;;  %500 = vst [vmem:[#allocation2 + $0x28] sm:$0x7] %v499_v54  ;;  %v517_v24 = vsel %vm5662_vm7, %v474_v36, %v516_v28  ;;  %v520_v25 = vsel %vm5662_vm7, %v474_v36, %v519_v58  ;;  %v523_v27 = vsel %vm5662_vm7, %v474_v36, %v522_v48 }
 0x10a   :  { %503 = vst [vmem:[#allocation2 + $0x34] sm:$0x7] %v502_v60  ;;  %506 = vst [vmem:[#allocation2 + $0x38] sm:$0x7] %v505_v18  ;;  %v5749_v47 = vsel %vm5709_vm10, %v5609_v7, %v736_v12  ;;  %v5752_v31 = vsub.s32 %v969_v23, %v5604_v6  ;;  %v5769_v6 = vsel %vm5709_vm10, %v5626_v11, %v848_v21  ;;  %v1568_v7 = vrot.slane %v1486_v40, 7 }
 0x10b   :  { %509 = vst [vmem:[#allocation2 + $0x3c] sm:$0x7] %v508_v61  ;;  %512 = vst [vmem:[#allocation2 + $0x40] sm:$0x7] %v511_v0  ;;  %v5786_v11 = vrot.slane %v3620_v15, 6  ;;  %v5788_v21 = vrot.slane %v3623_v59, 7  ;;  %v5804_v36 = vsel %vm5774_vm12, %v4498_v30, %v5666_v39  ;;  %v5811_v40 = vsel %vm5774_vm12, %v4502_v50, %v5669_v34 }
 0x10c   :  { %515 = vst [vmem:[#allocation2 + $0x4c] sm:$0x7] %v514_v22  ;;  %518 = vst [vmem:[#allocation2 + $0x50] sm:$0x7] %v517_v24  ;;  %v5815_v3 = vsel %vm5774_vm12, %v4506_v51, %v1552_v5  ;;  %v5819_v2 = vsel %vm5774_vm12, %v4510_v10, %v1568_v7  ;;  %v3432_v50 = vcombine.high %v5658_v32, %v5658_v32 }
 0x10d   :  { %521 = vst [vmem:[#allocation2 + $0x54] sm:$0x7] %v520_v25  ;;  %524 = vst [vmem:[#allocation2 + $0x58] sm:$0x7] %v523_v27  ;;  %v3626_v60 = vor.u32 %v5788_v21, %v5786_v11 }
 0x10e   :  { %v5755_v55 = vld.sshfl [vmem:[#allocation2 + $0x5c] sm:$0x13 pattern:$0x76325410] }
 0x10f   :  { %v3676_v23 = vshrl.u32 %v5755_v55, 16  ;;  %v3679_v43 = vshll.u32 %v5755_v55, 16  ;;  %v4451_v1 = vld.sshfl [vmem:[#allocation2 + $0x4] sm:$0x13 pattern:$0x76325410] }
 0x110   :  { %v4452_v26 = vld.sshfl [vmem:[#allocation2 + $0x8] sm:$0x13 pattern:$0x76325410]  ;;  %v604_v45 = vcombine.high %v4451_v1, %v4451_v1  ;;  %v739_v16 = vshrl.u32 %v4451_v1, 16  ;;  %v742_v56 = vshll.u32 %v4451_v1, 16 }
 0x111   :  { %v4453_v30 = vld.sshfl [vmem:[#allocation2 + $0xc] sm:$0x13 pattern:$0x76325410]  ;;  %v612_v39 = vcombine.high %v4452_v26, %v4452_v26  ;;  %v753_v20 = vshrl.u32 %v4452_v26, 16  ;;  %v756_v57 = vshll.u32 %v4452_v26, 16 }
 0x112   :  { %v620_v34 = vcombine.high %v4453_v30, %v4453_v30  ;;  %v741_v8 = vrot.slane %v739_v16, 6  ;;  %v744_v37 = vrot.slane %v742_v56, 7  ;;  %v748_v9 = vshll.u32 %v604_v45, 16 }
 0x113   :  { %v755_v15 = vrot.slane %v753_v20, 6  ;;  %v758_v59 = vrot.slane %v756_v57, 7  ;;  %v762_v41 = vshll.u32 %v612_v39, 16  ;;  %v767_v14 = vshrl.u32 %v4453_v30, 16 }
 0x114   :  { %v745_v4 = vor.u32 %v744_v37, %v741_v8  ;;  %v750_v46 = vrot.slane %v748_v9, 7  ;;  %v770_v28 = vshll.u32 %v4453_v30, 16  ;;  %v776_v58 = vshll.u32 %v620_v34, 16 }
 0x115   :  { %v5823_v48 = vld.sshfl [vmem:[#allocation2] sm:$0xf pattern:$0x76325410]  ;;  %v759_v53 = vor.u32 %v758_v59, %v755_v15  ;;  %v764_v63 = vrot.slane %v762_v41, 7  ;;  %v769_v17 = vrot.slane %v767_v14, 6 }
 0x116   :  { %v4533_v54 = vld.sshfl [vmem:[#allocation2 + $0x10] sm:$0x13 pattern:$0x76325410]  ;;  %v746_v18 = vrot.slane %v745_v4, 2  ;;  %v772_v61 = vrot.slane %v770_v28, 7 }
 0x117   :  { %v778_v0 = vrot.slane %v776_v58, 7  ;;  %v2097_v19 = vcombine.high %v4533_v54, %v4533_v54  ;;  %v5827_v22 = vld.sshfl [vmem:[#allocation2 + $0x8] sm:$0xf pattern:$0x76325410]  ;;  %v760_v24 = vrot.slane %v759_v53, 2 }
 0x118   :  { %v2237_v25 = vshrl.u32 %v4533_v54, 16  ;;  %v2240_v27 = vshll.u32 %v4533_v54, 16  ;;  %v751_v51 = vsel %vm5709_vm10, %v746_v18, %v750_v46  ;;  %v773_v5 = vor.u32 %v772_v61, %v769_v17  ;;  %v4455_v7 = vld.sshfl [vmem:[#allocation2 + $0x1c] sm:$0x13 pattern:$0x76325410] }
 0x119   :  { %v2246_v10 = vshll.u32 %v2097_v19, 16  ;;  %v765_v1 = vsel %vm5709_vm10, %v760_v24, %v764_v63  ;;  %v965_v26 = vcombine.low %v5749_v47, %v751_v51  ;;  %v4456_v56 = vld.sshfl [vmem:[#allocation2 + $0x20] sm:$0x13 pattern:$0x76325410]  ;;  %v636_v34 = vcombine.high %v4455_v7, %v4455_v7 }
 0x11a   :  { %v2239_v45 = vrot.slane %v2237_v25, 6  ;;  %v2242_v16 = vrot.slane %v2240_v27, 7  ;;  %v774_v30 = vrot.slane %v773_v5, 2  ;;  %v2435_v20 = vcombine.low %v751_v51, %v765_v1 }
 0x11b   :  { %v2248_v39 = vrot.slane %v2246_v10, 7  ;;  %v4457_v57 = vld.sshfl [vmem:[#allocation2 + $0x24] sm:$0x13 pattern:$0x76325410]  ;;  %v973_v8 = vrot.slane %v965_v26, %v5752_v31  ;;  %v644_v9 = vcombine.high %v4456_v56, %v4456_v56  ;;  %v795_v14 = vshrl.u32 %v4455_v7, 16 }
 0x11c   :  { %v2243_v37 = vor.u32 %v2242_v16, %v2239_v45  ;;  %v652_v15 = vcombine.high %v4457_v57, %v4457_v57  ;;  %v779_v59 = vsel %vm5709_vm10, %v774_v30, %v778_v0  ;;  %v2443_v41 = vrot.slane %v2435_v20, %v5752_v31  ;;  %v4537_v0 = vld.sshfl [vmem:[#allocation2 + $0x28] sm:$0x13 pattern:$0x76325410] }
 0x11d   :  { %v798_v47 = vshll.u32 %v4455_v7, 16  ;;  %v966_v4 = vcombine.low %v765_v1, %v779_v59  ;;  %v804_v28 = vshll.u32 %v636_v34, 16  ;;  %v809_v58 = vshrl.u32 %v4456_v56, 16 }
 0x11e   :  { %v2244_v46 = vrot.slane %v2243_v37, 2  ;;  %v797_v53 = vrot.slane %v795_v14, 6  ;;  %v812_v17 = vshll.u32 %v4456_v56, 16  ;;  %v818_v54 = vshll.u32 %v644_v9, 16 }
 0x11f   :  { %v800_v63 = vrot.slane %v798_v47, 7  ;;  %v980_v18 = vrot.slane %v966_v4, %v5752_v31  ;;  %v806_v19 = vrot.slane %v804_v28, 7  ;;  %v811_v24 = vrot.slane %v809_v58, 6 }
 0x120   :  { %v2249_v61 = vsel %vm5709_vm10, %v2244_v46, %v2248_v39  ;;  %v814_v51 = vrot.slane %v812_v17, 7  ;;  %v820_v5 = vrot.slane %v818_v54, 7  ;;  %v823_v7 = vshrl.u32 %v4457_v57, 16 }
 0x121   :  { %v2436_v25 = vcombine.low %v779_v59, %v2249_v61  ;;  %v801_v27 = vor.u32 %v800_v63, %v797_v53  ;;  %v981_v10 = vcombine.low %v973_v8, %v980_v18  ;;  %v826_v1 = vshll.u32 %v4457_v57, 16  ;;  %v4459_v45 = vld.sshfl [vmem:[#allocation2 + $0x34] sm:$0x13 pattern:$0x76325410] }
 0x122   :  { %v832_v26 = vshll.u32 %v652_v15, 16  ;;  %v815_v30 = vor.u32 %v814_v51, %v811_v24  ;;  %v2129_v20 = vcombine.high %v4537_v0, %v4537_v0  ;;  %v4460_v34 = vld.sshfl [vmem:[#allocation2 + $0x38] sm:$0x13 pattern:$0x76325410]  ;;  %v825_v39 = vrot.slane %v823_v7, 6 }
 0x123   :  { %v2450_v16 = vrot.slane %v2436_v25, %v5752_v31  ;;  %v802_v56 = vrot.slane %v801_v27, 2  ;;  %4823 = vmatprep.mubr.bf16.mxu1 %v981_v10  ;;  %v828_v37 = vrot.slane %v826_v1, 7  ;;  %v2293_v14 = vshrl.u32 %v4537_v0, 16 }
 0x124   :  { %v834_v9 = vrot.slane %v832_v26, 7  ;;  %v816_v8 = vrot.slane %v815_v30, 2  ;;  %v2296_v4 = vshll.u32 %v4537_v0, 16  ;;  %v2302_v28 = vshll.u32 %v2129_v20, 16 }
 0x125   :  { %v2451_v59 = vcombine.low %v2443_v41, %v2450_v16  ;;  %v807_v47 = vsel %vm5709_vm10, %v802_v56, %v806_v19  ;;  %v829_v57 = vor.u32 %v828_v37, %v825_v39  ;;  %v2295_v46 = vrot.slane %v2293_v14, 6  ;;  %v4461_v58 = vld.sshfl [vmem:[#allocation2 + $0x3c] sm:$0x13 pattern:$0x76325410] }
 0x126   :  { %v982_v15 = vcombine.low %v5762_v42, %v807_v47  ;;  %v821_v53 = vsel %vm5709_vm10, %v816_v8, %v820_v5  ;;  %v2298_v63 = vrot.slane %v2296_v4, 7  ;;  %v668_v17 = vcombine.high %v4459_v45, %v4459_v45  ;;  %v6008_v32 = vld.sshfl [vmem:[#allocation2 + $0x20] sm:$0xf pattern:$0x76325410] }
 0x127   :  { %4919 = vmatprep.mubr.bf16.mxu0 %v2451_v59  ;;  %v676_v54 = vcombine.high %v4460_v34, %v4460_v34  ;;  %v830_v18 = vrot.slane %v829_v57, 2  ;;  %v2304_v61 = vrot.slane %v2302_v28, 7  ;;  %v2452_v19 = vcombine.low %v807_v47, %v821_v53 }
 0x128   :  { %v990_v41 = vrot.slane %v982_v15, %v5752_v31  ;;  %v2299_v24 = vor.u32 %v2298_v63, %v2295_v46  ;;  %v684_v0 = vcombine.high %v4461_v58, %v4461_v58  ;;  %v851_v25 = vshrl.u32 %v4459_v45, 16  ;;  %v4463_v15 = vld.sshfl [vmem:[#allocation2 + $0x4c] sm:$0x13 pattern:$0x76325410] }
 0x129   :  { %v854_v27 = vshll.u32 %v4459_v45, 16  ;;  %v835_v42 = vsel %vm5709_vm10, %v830_v18, %v834_v9  ;;  %v2460_v51 = vrot.slane %v2452_v19, %v5752_v31  ;;  %v860_v10 = vshll.u32 %v668_v17, 16  ;;  %v4541_v9 = vld.sshfl [vmem:[#allocation2 + $0x40] sm:$0x13 pattern:$0x76325410] }
 0x12a   :  { %v865_v7 = vshrl.u32 %v4460_v34, 16  ;;  %v983_v5 = vcombine.low %v821_v53, %v835_v42  ;;  %v2300_v1 = vrot.slane %v2299_v24, 2  ;;  %v853_v26 = vrot.slane %v851_v25, 6  ;;  %v5127_v17 = vld [vmem:[#allocation5 + $0x8] sm:$0xff]  }
 0x12b   :  { %v856_v16 = vrot.slane %v854_v27, 7  ;;  %v862_v56 = vrot.slane %v860_v10, 7  ;;  %v868_v20 = vshll.u32 %v4460_v34, 16  ;;  %v874_v39 = vshll.u32 %v676_v54, 16 }
 0x12c   :  { %v867_v30 = vrot.slane %v865_v7, 6  ;;  %v997_v37 = vrot.slane %v983_v5, %v5752_v31  ;;  %v2305_v45 = vsel %vm5709_vm10, %v2300_v1, %v2304_v61  ;;  %v879_v59 = vshrl.u32 %v4461_v58, 16  ;;  %v4464_v24 = vld.sshfl [vmem:[#allocation2 + $0x50] sm:$0x13 pattern:$0x76325410] }
 0x12d   :  { %v857_v14 = vor.u32 %v856_v16, %v853_v26  ;;  %v2453_v47 = vcombine.low %v835_v42, %v2305_v45  ;;  %v870_v8 = vrot.slane %v868_v20, 7  ;;  %v876_v4 = vrot.slane %v874_v39, 7  ;;  %v5128_v7 = vld [vmem:[#allocation5 + $0x148] sm:$0xff]  }
 0x12e   :  { %v882_v57 = vshll.u32 %v4461_v58, 16  ;;  %v998_v46 = vcombine.low %v990_v41, %v997_v37  ;;  %v881_v53 = vrot.slane %v879_v59, 6  ;;  %v888_v63 = vshll.u32 %v684_v0, 16 }
 0x12f   :  { %v858_v28 = vrot.slane %v857_v14, 2  ;;  %v2467_v34 = vrot.slane %v2453_v47, %v5752_v31  ;;  %v871_v54 = vor.u32 %v870_v8, %v867_v30  ;;  %v2161_v19 = vcombine.high %v4541_v9, %v4541_v9  ;;  %v4465_v5 = vld.sshfl [vmem:[#allocation2 + $0x54] sm:$0x13 pattern:$0x76325410] }
 0x130   :  { %v884_v18 = vrot.slane %v882_v57, 7  ;;  %4824 = vmatmul.mubr.bf16.vlgmr.msra.gmra.mrb[0].mxu1 %v998_v46  ;;  %v890_v25 = vrot.slane %v888_v63, 7  ;;  %v2349_v27 = vshrl.u32 %v4541_v9, 16  ;;  %v2352_v42 = vshll.u32 %v4541_v9, 16  ;;  %v5129_v30 = vld [vmem:[#allocation5 + $0x10] sm:$0xff]  }
 0x131   :  { %v863_v61 = vsel %vm5709_vm10, %v858_v28, %v862_v56  ;;  %4832 = vmatpush3.bf16.msra.mxu1 %v5596_v13  ;;  %v2468_v58 = vcombine.low %v2460_v51, %v2467_v34  ;;  %v872_v41 = vrot.slane %v871_v54, 2  ;;  %v2358_v16 = vshll.u32 %v2161_v19, 16  ;;  %v5130_v9 = vld [vmem:[#allocation5 + $0x150] sm:$0xff]  }
 0x132   :  { %v885_v10 = vor.u32 %v884_v18, %v881_v53  ;;  %v999_v0 = vcombine.low %v5769_v6, %v863_v61  ;;  %v2351_v1 = vrot.slane %v2349_v27, 6  ;;  %v2354_v26 = vrot.slane %v2352_v42, 7  ;;  %4833 = vmatprep.subr.bf16.mxu1 %v5127_v17 }
 0x133   :  { %v700_v20 = vcombine.high %v4463_v15, %v4463_v15  ;;  %4920 = vmatmul.mubr.bf16.vlgmr.msra.gmra.mrb[0].mxu0 %v2468_v58  ;;  %v877_v56 = vsel %vm5709_vm10, %v872_v41, %v876_v4  ;;  %v708_v51 = vcombine.high %v4464_v24, %v4464_v24  ;;  %v2360_v6 = vrot.slane %v2358_v16, 7  ;;  %v5135_v16 = vld [vmem:[#allocation5 + $0x20] sm:$0xff]  }
 0x134   :  { %v886_v39 = vrot.slane %v885_v10, 2  ;;  %v1007_v13 = vrot.slane %v999_v0, %v5752_v31  ;;  %4928 = vmatpush3.bf16.msra.mxu0 %v5599_v49  ;;  %v2355_v37 = vor.u32 %v2354_v26, %v2351_v1  ;;  %v2469_v45 = vcombine.low %v863_v61, %v877_v56  ;;  %v5133_v49 = vld [vmem:[#allocation5 + $0x18] sm:$0xff]  }
 0x135   :  { %v716_v14 = vcombine.high %v4465_v5, %v4465_v5  ;;  %4929 = vmatprep.subr.bf16.mxu0 %v5128_v7  ;;  %4834 = vmatpush3.bf16.msra.mxu1 %v5127_v17  ;;  %v907_v47 = vshrl.u32 %v4463_v15, 16  ;;  %v910_v8 = vshll.u32 %v4463_v15, 16  ;;  %v916_v57 = vshll.u32 %v700_v20, 16 }
 0x136   :  { %v891_v59 = vsel %vm5709_vm10, %v886_v39, %v890_v25  ;;  %v2356_v46 = vrot.slane %v2355_v37, 2  ;;  %v2477_v28 = vrot.slane %v2469_v45, %v5752_v31  ;;  %4835 = vmatprep.subr.bf16.mxu1 %v5129_v30  ;;  %v921_v53 = vshrl.u32 %v4464_v24, 16  ;;  %v5134_v25 = vld [vmem:[#allocation5 + $0x158] sm:$0xff]  }
 0x137   :  { %v1000_v4 = vcombine.low %v877_v56, %v891_v59  ;;  %v909_v63 = vrot.slane %v907_v47, 6  ;;  %v912_v34 = vrot.slane %v910_v8, 7  ;;  %v918_v54 = vrot.slane %v916_v57, 7  ;;  %v5136_v47 = vld [vmem:[#allocation5 + $0x160] sm:$0xff]  }
 0x138   :  { %v924_v18 = vshll.u32 %v4464_v24, 16  ;;  %v2361_v17 = vsel %vm5709_vm10, %v2356_v46, %v2360_v6  ;;  %4930 = vmatpush3.bf16.msra.mxu0 %v5128_v7  ;;  %v923_v61 = vrot.slane %v921_v53, 6  ;;  %v930_v15 = vshll.u32 %v708_v51, 16 }
 0x139   :  { %v1014_v19 = vrot.slane %v1000_v4, %v5752_v31  ;;  %v2470_v27 = vcombine.low %v891_v59, %v2361_v17  ;;  %4931 = vmatprep.subr.bf16.mxu0 %v5130_v9  ;;  %v913_v42 = vor.u32 %v912_v34, %v909_v63  ;;  %v935_v41 = vshrl.u32 %v4465_v5, 16  ;;  %4836 = vmatpush3.bf16.msra.mxu1 %v5129_v30  ;;  %v4545_v10 = vld.sshfl [vmem:[#allocation2 + $0x58] sm:$0x13 pattern:$0x76325410] }
 0x13a   :  { %v926_v58 = vrot.slane %v924_v18, 7  ;;  %v932_v1 = vrot.slane %v930_v15, 7  ;;  %v938_v26 = vshll.u32 %v4465_v5, 16  ;;  %v944_v24 = vshll.u32 %v716_v14, 16  ;;  %4837 = vmatprep.subr.bf16.mxu1 %v5133_v49 }
 0x13b   :  { %v1015_v0 = vcombine.low %v1007_v13, %v1014_v19  ;;  %v2484_v20 = vrot.slane %v2470_v27, %v5752_v31  ;;  %v914_v56 = vrot.slane %v913_v42, 2  ;;  %v937_v39 = vrot.slane %v935_v41, 6  ;;  %v4554_v51 = vld.sshfl [vmem:[#allocation2 + $0x4] sm:$0x12 pattern:$0x76325410] }
 0x13c   :  { %v927_v7 = vor.u32 %v926_v58, %v923_v61  ;;  %v940_v37 = vrot.slane %v938_v26, 7  ;;  %v946_v6 = vrot.slane %v944_v24, 7  ;;  %v2193_v45 = vcombine.high %v4545_v10, %v4545_v10  ;;  %4932 = vmatpush3.bf16.msra.mxu0 %v5130_v9  ;;  %v4555_v30 = vld.sshfl [vmem:[#allocation2 + $0x8] sm:$0x12 pattern:$0x76325410] }
 0x13d   :  { %4827 = vmatprep.mubr.bf16.mxu1 %v1015_v0  ;;  %v2405_v59 = vshrl.u32 %v4545_v10, 16  ;;  %v2485_v13 = vcombine.low %v2477_v28, %v2484_v20  ;;  %v919_v5 = vsel %vm5709_vm10, %v914_v56, %v918_v54  ;;  %v2408_v8 = vshll.u32 %v4545_v10, 16  ;;  %v4556_v57 = vld.sshfl [vmem:[#allocation2 + $0xc] sm:$0x12 pattern:$0x76325410]  ;;  %4933 = vmatprep.subr.bf16.mxu0 %v5134_v25 }
 0x13e   :  { %v928_v14 = vrot.slane %v927_v7, 2  ;;  %4838 = vmatpush3.bf16.msra.mxu1 %v5133_v49  ;;  %v941_v4 = vor.u32 %v940_v37, %v937_v39  ;;  %v1016_v46 = vcombine.low %v5797_v62, %v919_v5  ;;  %v2414_v63 = vshll.u32 %v2193_v45, 16  ;;  %v4557_v34 = vld.sshfl [vmem:[#allocation2 + $0x10] sm:$0x12 pattern:$0x76325410] }
 0x13f   :  { %v2407_v53 = vrot.slane %v2405_v59, 6  ;;  %4839 = vmatprep.subr.bf16.mxu1 %v5135_v16  ;;  %4923 = vmatprep.mubr.bf16.mxu0 %v2485_v13  ;;  %v2410_v28 = vrot.slane %v2408_v8, 7  ;;  %v1182_v54 = vcombine.low %v5823_v48, %v5827_v22  ;;  %v2667_v18 = vcombine.high %v4554_v51, %v4554_v51  ;;  %v5137_v19 = vld [vmem:[#allocation5 + $0x28] sm:$0xff]   ;;  %v5139_v37 = vld [vmem:[#allocation5 + $0x30] sm:$0xff]  }
 0x140   :  { %v933_v9 = vsel %vm5709_vm10, %v928_v14, %v932_v1  ;;  %v942_v17 = vrot.slane %v941_v4, 2  ;;  %v1024_v49 = vrot.slane %v1016_v46, %v5752_v31  ;;  %v2416_v61 = vrot.slane %v2414_v63, 7  ;;  %4934 = vmatpush3.bf16.msra.mxu0 %v5134_v25  ;;  %v5138_v41 = vld [vmem:[#allocation5 + $0x168] sm:$0xff]   ;;  %v5140_v46 = vld [vmem:[#allocation5 + $0x170] sm:$0xff]  }
 0x141   :  { %v2486_v15 = vcombine.low %v919_v5, %v933_v9  ;;  %v2411_v62 = vor.u32 %v2410_v28, %v2407_v53  ;;  %v2675_v27 = vcombine.high %v4555_v30, %v4555_v30  ;;  %v2683_v42 = vcombine.high %v4556_v57, %v4556_v57  ;;  %4935 = vmatprep.subr.bf16.mxu0 %v5136_v47  ;;  %v5883_v24 = vld.sshfl [vmem:[#allocation2 + $0x18] sm:$0xf pattern:$0x76325410] }
 0x142   :  { %v2691_v58 = vcombine.high %v4557_v34, %v4557_v34  ;;  %v947_v10 = vsel %vm5709_vm10, %v942_v17, %v946_v6  ;;  %v4570_v1 = vrot.slane %v4554_v51, 9  ;;  %v2790_v26 = vrot.slane %v2667_v18, 7  ;;  %4840 = vmatpush3.bf16.msra.mxu1 %v5135_v16  ;;  %v5885_v20 = vld.sshfl [vmem:[#allocation2 + $0x1c] sm:$0x12 pattern:$0x76325410] }
 0x143   :  { %v5881_v0 = vrot.slane %v2486_v15, %v5752_v31  ;;  %v1017_v25 = vcombine.low %v933_v9, %v947_v10  ;;  %v2412_v56 = vrot.slane %v2411_v62, 2  ;;  %v4571_v7 = vrot.slane %v4555_v30, 9  ;;  %4841 = vmatprep.subr.bf16.mxu1 %v5137_v19  ;;  %v5887_v45 = vld.sshfl [vmem:[#allocation2 + $0x20] sm:$0xf pattern:$0x76325410] }
 0x144   :  { %v2794_v39 = vrot.slane %v2675_v27, 7  ;;  %v4559_v59 = vld.sshfl [vmem:[#allocation2 + $0x20] sm:$0x12 pattern:$0x76325410]  ;;  %v5891_v6 = vsel %vm5774_vm12, %v4570_v1, %v2790_v26  ;;  %v4572_v51 = vrot.slane %v4556_v57, 9  ;;  %4936 = vmatpush3.bf16.msra.mxu0 %v5136_v47  ;;  %v2699_v18 = vcombine.high %v5885_v20, %v5885_v20 }
 0x145   :  { %v2798_v13 = vrot.slane %v2683_v42, 7  ;;  %v4573_v16 = vrot.slane %v4557_v34, 9  ;;  %v4560_v5 = vld.sshfl [vmem:[#allocation2 + $0x24] sm:$0x12 pattern:$0x76325410]  ;;  %v1031_v14 = vrot.slane %v1017_v25, %v5752_v31  ;;  %v2417_v30 = vsel %vm5709_vm10, %v2412_v56, %v2416_v61  ;;  %4937 = vmatprep.subr.bf16.mxu0 %v5138_v41 }
 0x146   :  { %v5898_v8 = vsel %vm5774_vm12, %v4571_v7, %v2794_v39  ;;  %v2802_v4 = vrot.slane %v2691_v58, 7  ;;  %v2487_v53 = vcombine.low %v947_v10, %v2417_v30  ;;  %4842 = vmatpush3.bf16.msra.mxu1 %v5137_v19  ;;  %v4561_v63 = vld.sshfl [vmem:[#allocation2 + $0x28] sm:$0x12 pattern:$0x76325410]  ;;  %v5141_v28 = vld [vmem:[#allocation5 + $0x38] sm:$0xff]   ;;  %v2707_v62 = vcombine.high %v4559_v59, %v4559_v59 }
 0x147   :  { %v5902_v57 = vsel %vm5774_vm12, %v4572_v51, %v2798_v13  ;;  %v2869_v47 = vcombine.low %v5891_v6, %v5898_v8  ;;  %v1032_v34 = vcombine.low %v1024_v49, %v1031_v14  ;;  %4843 = vmatprep.subr.bf16.mxu1 %v5139_v37  ;;  %v5913_v27 = vld.sshfl [vmem:[#allocation2 + $0x30] sm:$0xf pattern:$0x76325410]  ;;  %v1199_v49 = vcombine.low %v5883_v24, %v5887_v45  ;;  %v5142_v56 = vld [vmem:[#allocation5 + $0x178] sm:$0xff]  }
 0x148   :  { %v2803_v9 = vsel %vm5774_vm12, %v4573_v16, %v2802_v4  ;;  %v2501_v17 = vrot.slane %v2487_v53, %v5752_v31  ;;  %4938 = vmatpush3.bf16.msra.mxu0 %v5138_v41  ;;  %v5915_v19 = vld.sshfl [vmem:[#allocation2 + $0x34] sm:$0x12 pattern:$0x76325410]  ;;  %v2715_v42 = vcombine.high %v4560_v5, %v4560_v5  ;;  %v2723_v58 = vcombine.high %v4561_v63, %v4561_v63 }
 0x149   :  { %v2870_v61 = vcombine.low %v5902_v57, %v2803_v9  ;;  %v2877_v15 = vrot.slane %v2869_v47, %v5752_v31  ;;  %4828 = vmatmul.mubr.bf16.gmra.mrb[4].mxu1 %v1032_v34  ;;  %4939 = vmatprep.subr.bf16.mxu0 %v5140_v46  ;;  %v4574_v10 = vrot.slane %v5885_v20, 9  ;;  %v5218_v1 = vld.sshfl [vmem:[#allocation2 + $0x38] sm:$0xf pattern:$0x76325410]  ;;  %v2806_v7 = vrot.slane %v2699_v18, 7 }
 0x14a   :  { %v4563_v26 = vld.sshfl [vmem:[#allocation2 + $0x38] sm:$0x12 pattern:$0x76325410]  ;;  %v2502_v25 = vcombine.low %v5881_v0, %v2501_v17  ;;  %4847 = vmatprep.mubr.bf16.mxu1 %v1182_v54  ;;  %4844 = vmatpush3.bf16.msra.mxu1 %v5139_v37  ;;  %v4575_v39 = vrot.slane %v4559_v59, 9  ;;  %v2810_v45 = vrot.slane %v2707_v62, 7  ;;  %v2731_v59 = vcombine.high %v5915_v19, %v5915_v19 }
 0x14b   :  { %v2884_v41 = vrot.slane %v2870_v61, %v5752_v31  ;;  %v4564_v51 = vld.sshfl [vmem:[#allocation2 + $0x3c] sm:$0x12 pattern:$0x76325410]  ;;  %4845 = vmatprep.subr.bf16.mxu1 %v5141_v28  ;;  %v4576_v13 = vrot.slane %v4560_v5, 9  ;;  %v2814_v20 = vrot.slane %v2715_v42, 7  ;;  %v5927_v48 = vsel %vm5774_vm12, %v4574_v10, %v2806_v7 }
 0x14c   :  { %v4565_v24 = vld.sshfl [vmem:[#allocation2 + $0x40] sm:$0x12 pattern:$0x76325410]  ;;  %v4577_v16 = vrot.slane %v4561_v63, 9  ;;  %4924 = vmatmul.mubr.bf16.gmra.mrb[4].mxu0 %v2502_v25  ;;  %v2818_v22 = vrot.slane %v2723_v58, 7  ;;  %v5931_v54 = vsel %vm5774_vm12, %v4575_v39, %v2810_v45  ;;  %v2739_v53 = vcombine.high %v4563_v26, %v4563_v26 }
 0x14d   :  { %v2885_v14 = vcombine.low %v2877_v15, %v2884_v41  ;;  %v5145_v0 = vld [vmem:[#allocation5 + $0x80] sm:$0xff]   ;;  %4940 = vmatpush3.bf16.msra.mxu0 %v5140_v46  ;;  %v5935_v37 = vsel %vm5774_vm12, %v4576_v13, %v2814_v20  ;;  %v5939_v5 = vld.sshfl [vmem:[#allocation2 + $0x48] sm:$0xf pattern:$0x76325410]  ;;  %v2886_v4 = vcombine.low %v5927_v48, %v5931_v54  ;;  %v4578_v47 = vrot.slane %v5915_v19, 9 }
 0x14e   :  { %4941 = vmatprep.subr.bf16.mxu0 %v5142_v56  ;;  %v2819_v30 = vsel %vm5774_vm12, %v4577_v16, %v2818_v22  ;;  %v5146_v46 = vld [vmem:[#allocation5 + $0x180] sm:$0xff]   ;;  %v5946_v63 = vld.sshfl [vmem:[#allocation2 + $0x50] sm:$0xf pattern:$0x76325410]  ;;  %4846 = vmatpush3.bf16.msra.mxu1 %v5141_v28  ;;  %v1216_v18 = vcombine.low %v5913_v27, %v5218_v1  ;;  %v2747_v17 = vcombine.high %v4564_v51, %v4564_v51  ;;  %v2822_v42 = vrot.slane %v2731_v59, 7 }
 0x14f   :  { %4943 = vmatprep.mubr.bf16.mxu0 %v2885_v14  ;;  %v4566_v34 = vld.sshfl [vmem:[#allocation2 + $0x4c] sm:$0x12 pattern:$0x76325410]  ;;  %v2887_v9 = vcombine.low %v5935_v37, %v2819_v30  ;;  %v2755_v61 = vcombine.high %v4565_v24, %v4565_v24  ;;  %4855 = vmatprep.subr.bf16.mxu1 %v5145_v0  ;;  %v2894_v62 = vrot.slane %v2886_v4, %v5752_v31  ;;  %v4579_v58 = vrot.slane %v4563_v26, 9  ;;  %v5153_v16 = vld [vmem:[#allocation5 + $0x90] sm:$0xff]  }
 0x150   :  { %v4567_v15 = vld.sshfl [vmem:[#allocation2 + $0x50] sm:$0x12 pattern:$0x76325410]  ;;  %v2826_v10 = vrot.slane %v2739_v53, 7  ;;  %v5149_v25 = vld [vmem:[#allocation5 + $0x88] sm:$0xff]   ;;  %v5954_v27 = vsel %vm5774_vm12, %v4578_v47, %v2822_v42  ;;  %v2763_v14 = vcombine.high %v4566_v34, %v4566_v34  ;;  %v1233_v53 = vcombine.low %v5939_v5, %v5946_v63 }
 0x151   :  { %v4568_v41 = vld.sshfl [vmem:[#allocation2 + $0x54] sm:$0x12 pattern:$0x76325410]  ;;  %4942 = vmatpush3.bf16.msra.mxu0 %v5142_v56  ;;  %v2901_v19 = vrot.slane %v2887_v9, %v5752_v31  ;;  %v4580_v7 = vrot.slane %v4564_v51, 9  ;;  %v2830_v28 = vrot.slane %v2747_v17, 7  ;;  %4848 = vmatmul.mubr.bf16.vlgmr.msra.gmra.mrb[0].mxu1 %v1199_v49  ;;  %v2771_v22 = vcombine.high %v4567_v15, %v4567_v15 }
 0x152   :  { %v4581_v39 = vrot.slane %v4565_v24, 9  ;;  %4951 = vmatprep.subr.bf16.mxu0 %v5146_v46  ;;  %v5958_v1 = vsel %vm5774_vm12, %v4579_v58, %v2826_v10  ;;  %v2834_v26 = vrot.slane %v2755_v61, 7  ;;  %v4569_v45 = vld.sshfl [vmem:[#allocation2 + $0x58] sm:$0x12 pattern:$0x76325410]  ;;  %4851 = vmatprep.mubr.bf16.mxu1 %v1216_v18  ;;  %v2779_v30 = vcombine.high %v4568_v41, %v4568_v41 }
 0x153   :  { %v2902_v13 = vcombine.low %v2894_v62, %v2901_v19  ;;  %4856 = vmatpush3.bf16.msra.mxu1 %v5145_v0  ;;  %v5962_v56 = vsel %vm5774_vm12, %v4580_v7, %v2830_v28  ;;  %v2903_v49 = vcombine.low %v5954_v27, %v5958_v1  ;;  %v5150_v51 = vld [vmem:[#allocation5 + $0x188] sm:$0xff]   ;;  %v4582_v24 = vrot.slane %v4566_v34, 9  ;;  %v5154_v42 = vld [vmem:[#allocation5 + $0x190] sm:$0xff]   ;;  %v5157_v28 = vld [vmem:[#allocation5 + $0x98] sm:$0xff]  }
 0x154   :  { %v2835_v20 = vsel %vm5774_vm12, %v4581_v39, %v2834_v26  ;;  %4857 = vmatprep.subr.bf16.mxu1 %v5149_v25  ;;  %v2787_v4 = vcombine.high %v4569_v45, %v4569_v45  ;;  %v2838_v47 = vrot.slane %v2763_v14, 7  ;;  %v4583_v9 = vrot.slane %v4567_v15, 9  ;;  %v5221_v15 = vld.sshfl [vmem:[#allocation2 + $0x8] sm:$0xf pattern:$0x76325410] }
 0x155   :  { %4944 = vmatmul.mubr.bf16.vlgmr.msra.gmra.mrb[0].mxu0 %v2902_v13  ;;  %v2904_v59 = vcombine.low %v5962_v56, %v2835_v20  ;;  %v2911_v0 = vrot.slane %v2903_v49, %v5752_v31  ;;  %v2842_v18 = vrot.slane %v2771_v22, 7  ;;  %v4584_v34 = vrot.slane %v4568_v41, 9  ;;  %v5222_v10 = vld.sshfl [vmem:[#allocation2 + $0x10] sm:$0xf pattern:$0x76325410] }
 0x156   :  { %4952 = vmatpush3.bf16.msra.mxu0 %v5146_v46  ;;  %v2846_v61 = vrot.slane %v2779_v30, 7  ;;  %v4585_v62 = vrot.slane %v4569_v45, 9  ;;  %v5975_v58 = vsel %vm5774_vm12, %v4582_v24, %v2838_v47  ;;  %v2850_v5 = vrot.slane %v2787_v4, 7  ;;  %v5158_v39 = vld [vmem:[#allocation5 + $0x198] sm:$0xff]   ;;  %v5160_v30 = vld [vmem:[#allocation5 + $0x1a0] sm:$0xff]  }
 0x157   :  { %v2918_v17 = vrot.slane %v2904_v59, %v5752_v31  ;;  %4953 = vmatprep.subr.bf16.mxu0 %v5150_v51  ;;  %4858 = vmatpush3.bf16.msra.mxu1 %v5149_v25  ;;  %v5979_v46 = vsel %vm5774_vm12, %v4583_v9, %v2842_v18  ;;  %v1599_v63 = vcombine.low %v5804_v36, %v5891_v6  ;;  %v5994_v26 = vld.sshfl [vmem:[#allocation2 + $0x8] sm:$0x13 pattern:$0x76325410]  ;;  %v3629_v45 = vshll.u32 %v3432_v50, 16 }
 0x158   :  { %4859 = vmatprep.subr.bf16.mxu1 %v5153_v16  ;;  %v5985_v41 = vsel %vm5774_vm12, %v4584_v34, %v2846_v61  ;;  %v2920_v19 = vcombine.low %v5975_v58, %v5979_v46  ;;  %v1600_v7 = vcombine.low %v5898_v8, %v5902_v57  ;;  %v2851_v36 = vsel %vm5774_vm12, %v4585_v62, %v2850_v5  ;;  %v6006_v20 = vld.sshfl [vmem:[#allocation2 + $0x14] sm:$0x12 pattern:$0x76325410]  ;;  %v5161_v18 = vld [vmem:[#allocation5 + $0xa8] sm:$0xff]  }
 0x159   :  { %v2919_v25 = vcombine.low %v2911_v0, %v2918_v17  ;;  %4852 = vmatmul.mubr.bf16.gmra.mrb[4].mxu1 %v1233_v53  ;;  %v1607_v6 = vrot.slane %v1599_v63, %v5752_v31  ;;  %v3678_v13 = vrot.slane %v3676_v23, 6  ;;  %v2921_v8 = vcombine.low %v5985_v41, %v2851_v36  ;;  %v6010_v50 = vld.sshfl [vmem:[#allocation2 + $0x28] sm:$0xf pattern:$0x76325410] }
 0x15a   :  { %4954 = vmatpush3.bf16.msra.mxu0 %v5150_v51  ;;  %v2928_v57 = vrot.slane %v2920_v19, %v5752_v31  ;;  %v1614_v49 = vrot.slane %v1600_v7, %v5752_v31  ;;  %v5159_v51 = vld [vmem:[#allocation5 + $0xa0] sm:$0xff]   ;;  %v3681_v24 = vrot.slane %v3679_v43, 7  ;;  %v6017_v23 = vsel %vm5709_vm10, %v5779_v38, %v3519_v29  ;;  %v4603_v47 = vld.sshfl [vmem:[#allocation2 + $0xc] sm:$0x13 pattern:$0x76325410] }
 0x15b   :  { %4947 = vmatprep.mubr.bf16.mxu0 %v2919_v25  ;;  %4955 = vmatprep.subr.bf16.mxu0 %v5154_v42  ;;  %v3464_v14 = vcombine.high %v5755_v55, %v5755_v55  ;;  %v2935_v22 = vrot.slane %v2921_v8, %v5752_v31  ;;  %v3469_v59 = vshll.u32 %v5994_v26, 16  ;;  %v3575_v0 = vrot.slane %v5784_v33, 7  ;;  %v5162_v62 = vld [vmem:[#allocation5 + $0x1a8] sm:$0xff]   ;;  %v5165_v8 = vld [vmem:[#allocation5 + $0xb8] sm:$0xff]  }
 0x15c   :  { %4860 = vmatpush3.bf16.msra.mxu1 %v5153_v16  ;;  %v1615_v43 = vcombine.low %v1607_v6, %v1614_v49  ;;  %v3466_v16 = vshrl.u32 %v5994_v26, 16  ;;  %v3627_v44 = vrot.slane %v3626_v60, 2  ;;  %v3631_v38 = vrot.slane %v3629_v45, 7 }
 0x15d   :  { %4861 = vmatprep.subr.bf16.mxu1 %v5157_v28  ;;  %v3962_v29 = vcombine.high %v6006_v20, %v6006_v20  ;;  %v2936_v55 = vcombine.low %v2928_v57, %v2935_v22  ;;  %v1616_v4 = vcombine.low %v5811_v40, %v5927_v48  ;;  %v1617_v53 = vcombine.low %v5931_v54, %v5935_v37  ;;  %v6037_v60 = vld.sshfl [vmem:[#allocation2 + $0x44] sm:$0x12 pattern:$0x76325410] }
 0x15e   :  { %4956 = vmatpush3.bf16.msra.mxu0 %v5154_v42  ;;  %4871 = vmatprep.mubr.bf16.mxu1 %v1615_v43  ;;  %v3128_v33 = vcombine.low %v5221_v15, %v5222_v10  ;;  %v3682_v9 = vor.u32 %v3681_v24, %v3678_v13  ;;  %v6034_v11 = vshll.u32 %v3464_v14, 16  ;;  %v4645_v21 = vrot.slane %v6006_v20, 9  ;;  %v4604_v40 = vld.sshfl [vmem:[#allocation2 + $0x10] sm:$0x13 pattern:$0x76325410] }
 0x15f   :  { %4957 = vmatprep.subr.bf16.mxu0 %v5158_v39  ;;  %4948 = vmatmul.mubr.bf16.gmra.mrb[4].mxu0 %v2936_v55  ;;  %v3468_v17 = vrot.slane %v3466_v16, 6  ;;  %v3471_v34 = vrot.slane %v3469_v59, 7  ;;  %v3480_v48 = vshrl.u32 %v4603_v47, 16  ;;  %v6042_v54 = vsel %vm5709_vm10, %v5782_v35, %v3575_v0  ;;  %v5188_v20 = vld [vmem:[#allocation5 + $0x1f0] sm:$0xff]  }
 0x160   :  { %4862 = vmatpush3.bf16.msra.mxu1 %v5157_v28  ;;  %4967 = vmatprep.mubr.bf16.mxu0 %v3128_v33  ;;  %v6046_v37 = vsel %vm5709_vm10, %v3627_v44, %v3631_v38  ;;  %v6048_v61 = vrot.slane %v3962_v29, 7  ;;  %v6051_v42 = vrot.slane %v1616_v4, %v5752_v31  ;;  %v6054_v5 = vrot.slane %v1617_v53, %v5752_v31  ;;  %v6062_v10 = vld.sshfl [vmem:[#allocation2 + $0x38] sm:$0xf pattern:$0x76325410]  ;;  %v5163_v28 = vld [vmem:[#allocation5 + $0xb0] sm:$0xff]  }
 0x161   :  { %4863 = vmatprep.subr.bf16.mxu1 %v5159_v51  ;;  %v1633_v63 = vcombine.low %v5815_v3, %v5954_v27  ;;  %v4026_v35 = vcombine.high %v6037_v60, %v6037_v60  ;;  %v1634_v15 = vcombine.low %v5958_v1, %v5962_v56  ;;  %v3344_v25 = vcombine.high %v5994_v26, %v5994_v26  ;;  %v6070_v27 = vld.sshfl [vmem:[#allocation2 + $0x40] sm:$0xf pattern:$0x76325410]  ;;  %v5164_v26 = vld [vmem:[#allocation5 + $0x1b0] sm:$0xff]  }
 0x162   :  { %4958 = vmatpush3.bf16.msra.mxu0 %v5158_v39  ;;  %v3352_v19 = vcombine.high %v4603_v47, %v4603_v47  ;;  %v6066_v7 = vrot.slane %v3682_v9, 2  ;;  %v3145_v3 = vcombine.low %v6008_v32, %v6010_v50  ;;  %v3360_v39 = vcombine.high %v4604_v40, %v4604_v40  ;;  %v4606_v16 = vld.sshfl [vmem:[#allocation2 + $0x20] sm:$0x13 pattern:$0x76325410] }
 0x163   :  { %4959 = vmatprep.subr.bf16.mxu0 %v5160_v30  ;;  %v3472_v36 = vor.u32 %v3471_v34, %v3468_v17  ;;  %v3687_v6 = vrot.slane %v6034_v11, 7  ;;  %v3475_v1 = vshll.u32 %v3344_v25, 16  ;;  %v3482_v56 = vrot.slane %v3480_v48, 6 }
 0x164   :  { %4864 = vmatpush3.bf16.msra.mxu1 %v5159_v51  ;;  %v3483_v45 = vshll.u32 %v4603_v47, 16  ;;  %v3494_v13 = vshrl.u32 %v4604_v40, 16  ;;  %v1632_v57 = vcombine.low %v6051_v42, %v6054_v5  ;;  %v6076_v49 = vrot.slane %v1633_v63, %v5752_v31  ;;  %v4607_v38 = vld.sshfl [vmem:[#allocation2 + $0x24] sm:$0x13 pattern:$0x76325410] }
 0x165   :  { %4865 = vmatprep.subr.bf16.mxu1 %v5161_v18  ;;  %v3489_v51 = vshll.u32 %v3352_v19, 16  ;;  %v3497_v24 = vshll.u32 %v4604_v40, 16  ;;  %v6079_v14 = vrot.slane %v1634_v15, %v5752_v31  ;;  %v1650_v59 = vcombine.low %v5819_v2, %v5975_v58  ;;  %v6085_v55 = vld.sshfl [vmem:[#allocation2 + $0x50] sm:$0xf pattern:$0x76325410] }
 0x166   :  { %4960 = vmatpush3.bf16.msra.mxu0 %v5160_v30  ;;  %v3485_v22 = vrot.slane %v3483_v45, 7  ;;  %v3496_v43 = vrot.slane %v3494_v13, 6  ;;  %v3473_v0 = vrot.slane %v3472_v36, 2  ;;  %v1651_v29 = vcombine.low %v5979_v46, %v5985_v41  ;;  %v5166_v47 = vld [vmem:[#allocation5 + $0x1b8] sm:$0xff]   ;;  %v5167_v58 = vld [vmem:[#allocation5 + $0xc0] sm:$0xff]   ;;  %v5175_v5 = vld [vmem:[#allocation5 + $0xd0] sm:$0xff]  }
 0x167   :  { %4961 = vmatprep.subr.bf16.mxu0 %v5162_v62  ;;  %v3499_v44 = vrot.slane %v3497_v24, 7  ;;  %v3477_v30 = vrot.slane %v3475_v1, 7  ;;  %v3503_v53 = vshll.u32 %v3360_v39, 16  ;;  %v3491_v9 = vrot.slane %v3489_v51, 7  ;;  %v5173_v24 = vld [vmem:[#allocation5 + $0xc8] sm:$0xff]  }
 0x168   :  { %4866 = vmatpush3.bf16.msra.mxu1 %v5161_v18  ;;  %v3486_v4 = vor.u32 %v3485_v22, %v3482_v56  ;;  %v6087_v33 = vld.sshfl [vmem:[#allocation2 + $0x58] sm:$0xf pattern:$0x76325410]  ;;  %v3522_v17 = vshrl.u32 %v4606_v16, 16  ;;  %v3525_v2 = vshll.u32 %v4606_v16, 16  ;;  %v3376_v40 = vcombine.high %v4606_v16, %v4606_v16 }
 0x169   :  { %4867 = vmatprep.subr.bf16.mxu1 %v5163_v28  ;;  %v3500_v18 = vor.u32 %v3499_v44, %v3496_v43  ;;  %v3536_v48 = vshrl.u32 %v4607_v38, 16  ;;  %v3478_v46 = vsel %vm5709_vm10, %v3473_v0, %v3477_v30  ;;  %v6091_v63 = vld.sshfl [vmem:[#allocation2 + $0x28] sm:$0x13 pattern:$0x76325410]  ;;  %v3384_v15 = vcombine.high %v4607_v38, %v4607_v38  ;;  %v5170_v56 = vld [vmem:[#allocation5 + $0x1c0] sm:$0xff]  }
 0x16a   :  { %4962 = vmatpush3.bf16.msra.mxu0 %v5162_v62  ;;  %v3487_v34 = vrot.slane %v3486_v4, 2  ;;  %v3539_v62 = vshll.u32 %v4607_v38, 16  ;;  %v3524_v25 = vrot.slane %v3522_v17, 6  ;;  %v3527_v39 = vrot.slane %v3525_v2, 7  ;;  %v5174_v38 = vld [vmem:[#allocation5 + $0x1c8] sm:$0xff]  }
 0x16b   :  { %4963 = vmatprep.subr.bf16.mxu0 %v5164_v26  ;;  %v3501_v41 = vrot.slane %v3500_v18, 2  ;;  %v6093_v19 = vld.sshfl [vmem:[#allocation2 + $0x4] sm:$0xf pattern:$0x76325410]  ;;  %v3538_v36 = vrot.slane %v3536_v48, 6  ;;  %v1649_v45 = vcombine.low %v6076_v49, %v6079_v14  ;;  %v6105_v22 = vrot.slane %v1651_v29, %v5752_v31 }
 0x16c   :  { %4868 = vmatpush3.bf16.msra.mxu1 %v5163_v28  ;;  %v3492_v28 = vsel %vm5709_vm10, %v3487_v34, %v3491_v9  ;;  %v3541_v1 = vrot.slane %v3539_v62, 7  ;;  %v6099_v13 = vld.sshfl [vmem:[#allocation2 + $0xc] sm:$0xf pattern:$0x76325410]  ;;  %v3505_v51 = vrot.slane %v3503_v53, 7  ;;  %v3528_v29 = vor.u32 %v3527_v39, %v3524_v25 }
 0x16d   :  { %4869 = vmatprep.subr.bf16.mxu1 %v5165_v8  ;;  %v3550_v43 = vshrl.u32 %v6091_v63, 16  ;;  %v3553_v16 = vshll.u32 %v6091_v63, 16  ;;  %v3706_v49 = vcombine.low %v3478_v46, %v3492_v28  ;;  %v3531_v14 = vshll.u32 %v3376_v40, 16  ;;  %v5178_v48 = vld [vmem:[#allocation5 + $0x1d0] sm:$0xff]   ;;  %v5182_v39 = vld [vmem:[#allocation5 + $0x1d8] sm:$0xff]  }
 0x16e   :  { %4964 = vmatpush3.bf16.msra.mxu0 %v5164_v26  ;;  %v6102_v26 = vrot.slane %v1650_v59, %v5752_v31  ;;  %v3506_v0 = vsel %vm5709_vm10, %v3501_v41, %v3505_v51  ;;  %v6111_v44 = vshll.u32 %v3384_v15, 16  ;;  %v3162_v59 = vcombine.low %v6062_v10, %v6070_v27  ;;  %v4611_v18 = vld.sshfl [vmem:[#allocation2 + $0x3c] sm:$0x13 pattern:$0x76325410] }
 0x16f   :  { %4965 = vmatprep.subr.bf16.mxu0 %v5166_v47  ;;  %v3542_v30 = vor.u32 %v3541_v1, %v3538_v36  ;;  %v3179_v4 = vcombine.low %v6085_v55, %v6087_v33  ;;  %v3552_v53 = vrot.slane %v3550_v43, 6  ;;  %v3555_v9 = vrot.slane %v3553_v16, 7  ;;  %v4612_v17 = vld.sshfl [vmem:[#allocation2 + $0x40] sm:$0x13 pattern:$0x76325410] }
 0x170   :  { %4870 = vmatpush3.bf16.msra.mxu1 %v5165_v8  ;;  %v4610_v8 = vld.sshfl [vmem:[#allocation2 + $0x38] sm:$0x13 pattern:$0x76325410]  ;;  %v3707_v10 = vcombine.low %v3506_v0, %v6017_v23  ;;  %v3392_v27 = vcombine.high %v6091_v63, %v6091_v63  ;;  %v3533_v55 = vrot.slane %v3531_v14, 7  ;;  %v3547_v33 = vrot.slane %v6111_v44, 7 }
 0x171   :  { %4879 = vmatprep.subr.bf16.mxu1 %v5167_v58  ;;  %v3578_v42 = vshrl.u32 %v4610_v8, 16  ;;  %v3581_v2 = vshll.u32 %v4610_v8, 16  ;;  %v3529_v23 = vrot.slane %v3528_v29, 2  ;;  %v3408_v34 = vcombine.high %v4610_v8, %v4610_v8  ;;  %v5181_v41 = vld [vmem:[#allocation5 + $0xd8] sm:$0xff]   ;;  %v5183_v29 = vld [vmem:[#allocation5 + $0xe0] sm:$0xff]  }
 0x172   :  { %4966 = vmatpush3.bf16.msra.mxu0 %v5166_v47  ;;  %v1666_v47 = vcombine.low %v6102_v26, %v6105_v22  ;;  %v3556_v62 = vor.u32 %v3555_v9, %v3552_v53  ;;  %v3592_v32 = vshrl.u32 %v4611_v18, 16  ;;  %v3595_v50 = vshll.u32 %v4611_v18, 16  ;;  %v6131_v63 = vld.sshfl [vmem:[#allocation2 + $0x1c] sm:$0xf pattern:$0x76325410] }
 0x173   :  { %4872 = vmatmul.mubr.bf16.vlgmr.msra.gmra.mrb[0].mxu1 %v1632_v57  ;;  %4975 = vmatprep.subr.bf16.mxu0 %v5170_v56  ;;  %v3714_v57 = vrot.slane %v3706_v49, %v5752_v31  ;;  %v3580_v40 = vrot.slane %v3578_v42, 6  ;;  %v3583_v46 = vrot.slane %v3581_v2, 7  ;;  %v3416_v15 = vcombine.high %v4611_v18, %v4611_v18  ;;  %v6133_v36 = vld.sshfl [vmem:[#allocation2 + $0x24] sm:$0xf pattern:$0x76325410] }
 0x174   :  { %4875 = vmatprep.mubr.bf16.mxu1 %v1649_v45  ;;  %4880 = vmatpush3.bf16.msra.mxu1 %v5167_v58  ;;  %v3543_v58 = vrot.slane %v3542_v30, 2  ;;  %v3424_v25 = vcombine.high %v4612_v17, %v4612_v17  ;;  %v3606_v28 = vshrl.u32 %v4612_v17, 16  ;;  %v3559_v1 = vshll.u32 %v3392_v27, 16 }
 0x175   :  { %4968 = vmatmul.mubr.bf16.vlgmr.msra.gmra.mrb[0].mxu0 %v3145_v3  ;;  %4881 = vmatprep.subr.bf16.mxu1 %v5173_v24  ;;  %v3721_v3 = vrot.slane %v3707_v10, %v5752_v31  ;;  %v3594_v45 = vrot.slane %v3592_v32, 6  ;;  %v3597_v51 = vrot.slane %v3595_v50, 7  ;;  %v6139_v26 = vsel %vm5709_vm10, %v3529_v23, %v3533_v55  ;;  %v6141_v16 = vld.sshfl [vmem:[#allocation2 + $0x50] sm:$0x13 pattern:$0x76325410] }
 0x176   :  { %4971 = vmatprep.mubr.bf16.mxu0 %v3162_v59  ;;  %4976 = vmatpush3.bf16.msra.mxu0 %v5170_v56  ;;  %v3584_v56 = vor.u32 %v3583_v46, %v3580_v40  ;;  %v3608_v22 = vrot.slane %v3606_v28, 6  ;;  %v3609_v43 = vshll.u32 %v4612_v17, 16  ;;  %v6145_v0 = vsel %vm5709_vm10, %v3543_v58, %v3547_v33  ;;  %v4615_v8 = vld.sshfl [vmem:[#allocation2 + $0x54] sm:$0x13 pattern:$0x76325410] }
 0x177   :  { %4977 = vmatprep.subr.bf16.mxu0 %v5174_v38  ;;  %v3557_v49 = vrot.slane %v3556_v62, 2  ;;  %v3587_v14 = vshll.u32 %v3408_v34, 16  ;;  %v3598_v44 = vor.u32 %v3597_v51, %v3594_v45  ;;  %v3561_v30 = vrot.slane %v3559_v1, 7  ;;  %v5184_v17 = vld [vmem:[#allocation5 + $0x1e0] sm:$0xff]   ;;  %v5185_v58 = vld [vmem:[#allocation5 + $0xe8] sm:$0xff]  }
 0x178   :  { %4882 = vmatpush3.bf16.msra.mxu1 %v5173_v24  ;;  %v1857_v24 = vcombine.low %v6093_v19, %v6099_v13  ;;  %v3722_v19 = vcombine.low %v3714_v57, %v3721_v3  ;;  %v3601_v13 = vshll.u32 %v3416_v15, 16  ;;  %v3611_v59 = vrot.slane %v3609_v43, 7  ;;  %v4616_v10 = vld.sshfl [vmem:[#allocation2 + $0x58] sm:$0x13 pattern:$0x76325410] }
 0x179   :  { %4883 = vmatprep.subr.bf16.mxu1 %v5175_v5  ;;  %v3585_v53 = vrot.slane %v3584_v56, 2  ;;  %v3723_v9 = vcombine.low %v6139_v26, %v6145_v0  ;;  %v3599_v18 = vrot.slane %v3598_v44, 2  ;;  %v3634_v27 = vshrl.u32 %v6141_v16, 16  ;;  %v5187_v0 = vld [vmem:[#allocation5 + $0xf0] sm:$0xff]  }
 0x17a   :  { %4978 = vmatpush3.bf16.msra.mxu0 %v5174_v38  ;;  %v3615_v38 = vshll.u32 %v3424_v25, 16  ;;  %v3562_v42 = vsel %vm5709_vm10, %v3557_v49, %v3561_v30  ;;  %v3648_v57 = vshrl.u32 %v4615_v8, 16  ;;  %v3603_v55 = vrot.slane %v3601_v13, 7  ;;  %v5186_v25 = vld [vmem:[#allocation5 + $0x1e8] sm:$0xff]  }
 0x17b   :  { %4876 = vmatmul.mubr.bf16.gmra.mrb[4].mxu1 %v1666_v47  ;;  %4979 = vmatprep.subr.bf16.mxu0 %v5178_v48  ;;  %v3612_v47 = vor.u32 %v3611_v59, %v3608_v22  ;;  %v3651_v23 = vshll.u32 %v4615_v8, 16  ;;  %v6153_v34 = vld.sshfl [vmem:[#allocation2 + $0x34] sm:$0xf pattern:$0x76325410]  ;;  %v3448_v62 = vcombine.high %v4615_v8, %v4615_v8  ;;  %v3456_v46 = vcombine.high %v4616_v10, %v4616_v10 }
 0x17c   :  { %4884 = vmatpush3.bf16.msra.mxu1 %v5175_v5  ;;  %4895 = vmatprep.mubr.bf16.mxu1 %v1857_v24  ;;  %v3637_v5 = vshll.u32 %v6141_v16, 16  ;;  %v3617_v2 = vrot.slane %v3615_v38, 7  ;;  %v6159_v32 = vld.sshfl [vmem:[#allocation2 + $0x3c] sm:$0xf pattern:$0x76325410]  ;;  %v3604_v50 = vsel %vm5709_vm10, %v3599_v18, %v3603_v55  ;;  %v6175_v22 = vsel %vm5709_vm10, %v6066_v7, %v3687_v6 }
 0x17d   :  { %4972 = vmatmul.mubr.bf16.gmra.mrb[4].mxu0 %v3179_v4  ;;  %4885 = vmatprep.subr.bf16.mxu1 %v5181_v41  ;;  %v3589_v4 = vrot.slane %v3587_v14, 7  ;;  %v3613_v33 = vrot.slane %v3612_v47, 2  ;;  %v3636_v3 = vrot.slane %v3634_v27, 6  ;;  %v3662_v15 = vshrl.u32 %v4616_v10, 16 }
 0x17e   :  { %4980 = vmatpush3.bf16.msra.mxu0 %v5178_v48  ;;  %4991 = vmatprep.mubr.bf16.mxu0 %v3722_v19  ;;  %v3440_v48 = vcombine.high %v6141_v16, %v6141_v16  ;;  %v3650_v1 = vrot.slane %v3648_v57, 6  ;;  %v3653_v56 = vrot.slane %v3651_v23, 7  ;;  %v3665_v45 = vshll.u32 %v4616_v10, 16 }
 0x17f   :  { %4981 = vmatprep.subr.bf16.mxu0 %v5182_v39  ;;  %v3590_v40 = vsel %vm5709_vm10, %v3585_v53, %v3589_v4  ;;  %v3618_v28 = vsel %vm5709_vm10, %v3613_v33, %v3617_v2  ;;  %v6165_v51 = vld.sshfl [vmem:[#allocation2 + $0x8] sm:$0x12 pattern:$0x76325410]  ;;  %v3664_v26 = vrot.slane %v3662_v15, 6  ;;  %v6184_v16 = vsel %vm5774_vm12, %v4645_v21, %v6048_v61  ;;  %v5189_v53 = vld [vmem:[#allocation5 + $0xf8] sm:$0xff]  }
 0x180   :  { %4886 = vmatpush3.bf16.msra.mxu1 %v5181_v41  ;;  %v3639_v41 = vrot.slane %v3637_v5, 7  ;;  %v6167_v24 = vld.sshfl [vmem:[#allocation2 + $0xc] sm:$0x12 pattern:$0x76325410]  ;;  %v3643_v49 = vshll.u32 %v3440_v48, 16  ;;  %v1874_v7 = vcombine.low %v6131_v63, %v6133_v36  ;;  %v3741_v6 = vcombine.low %v3618_v28, %v6046_v37 }
 0x181   :  { %4887 = vmatprep.subr.bf16.mxu1 %v5183_v29  ;;  %v6177_v43 = vld.sshfl [vmem:[#allocation2 + $0x10] sm:$0x12 pattern:$0x76325410]  ;;  %v3657_v14 = vshll.u32 %v3448_v62, 16  ;;  %v3667_v11 = vrot.slane %v3665_v45, 7  ;;  %v6190_v19 = vrot.slane %v3723_v9, %v5752_v31  ;;  %v3654_v61 = vor.u32 %v3653_v56, %v3650_v1 }
 0x182   :  { %4982 = vmatpush3.bf16.msra.mxu0 %v5182_v39  ;;  %v3724_v39 = vcombine.low %v3562_v42, %v6042_v54  ;;  %v3740_v54 = vcombine.low %v3590_v40, %v3604_v50  ;;  %v4634_v44 = vld.sshfl [vmem:[#allocation2 + $0x38] sm:$0x12 pattern:$0x76325410]  ;;  %v3640_v21 = vor.u32 %v3639_v41, %v3636_v3  ;;  %v3671_v13 = vshll.u32 %v3456_v46, 16  ;;  %v5193_v62 = vld [vmem:[#allocation5 + $0x200] sm:$0xff]  }
 0x183   :  { %4983 = vmatprep.subr.bf16.mxu0 %v5184_v17  ;;  %v4635_v8 = vld.sshfl [vmem:[#allocation2 + $0x3c] sm:$0x12 pattern:$0x76325410]  ;;  %v3938_v30 = vcombine.high %v6165_v51, %v6165_v51  ;;  %v3946_v37 = vcombine.high %v6167_v24, %v6167_v24  ;;  %v3645_v18 = vrot.slane %v3643_v49, 7  ;;  %v3659_v47 = vrot.slane %v3657_v14, 7 }
 0x184   :  { %4888 = vmatpush3.bf16.msra.mxu1 %v5183_v29  ;;  %v4636_v59 = vld.sshfl [vmem:[#allocation2 + $0x40] sm:$0x12 pattern:$0x76325410]  ;;  %v6193_v38 = vrot.slane %v3724_v39, %v5752_v31  ;;  %v3668_v29 = vor.u32 %v3667_v11, %v3664_v26  ;;  %v6200_v9 = vrot.slane %v3740_v54, %v5752_v31  ;;  %v3954_v10 = vcombine.high %v6177_v43, %v6177_v43  ;;  %v5190_v5 = vld [vmem:[#allocation5 + $0x1f8] sm:$0xff]   ;;  %v5196_v54 = vld [vmem:[#allocation5 + $0x208] sm:$0xff]  }
 0x185   :  { %4889 = vmatprep.subr.bf16.mxu1 %v5185_v58  ;;  %v3755_v27 = vrot.slane %v3741_v6, %v5752_v31  ;;  %v4010_v42 = vcombine.high %v4635_v8, %v4635_v8  ;;  %v4018_v4 = vcombine.high %v4636_v59, %v4636_v59  ;;  %v3641_v57 = vrot.slane %v3640_v21, 2  ;;  %v5235_v49 = vld.sshfl [vmem:[#allocation2 + $0x4c] sm:$0xf pattern:$0x76325410] }
 0x186   :  { %4984 = vmatpush3.bf16.msra.mxu0 %v5184_v17  ;;  %v4002_v17 = vcombine.high %v4634_v44, %v4634_v44  ;;  %v3655_v55 = vrot.slane %v3654_v61, 2  ;;  %v3673_v33 = vrot.slane %v3671_v13, 7  ;;  %v4642_v2 = vrot.slane %v6165_v51, 9 }
 0x187   :  { %4985 = vmatprep.subr.bf16.mxu0 %v5186_v25  ;;  %v3669_v23 = vrot.slane %v3668_v29, 2  ;;  %v4065_v40 = vrot.slane %v3946_v37, 7  ;;  %v4069_v46 = vrot.slane %v3954_v10, 7  ;;  %v4650_v50 = vrot.slane %v4634_v44, 9 }
 0x188   :  { %4890 = vmatpush3.bf16.msra.mxu1 %v5185_v58  ;;  %v4061_v58 = vrot.slane %v3938_v30, 7  ;;  %v4093_v48 = vrot.slane %v4002_v17, 7  ;;  %v4651_v3 = vrot.slane %v4635_v8, 9  ;;  %v4097_v41 = vrot.slane %v4010_v42, 7  ;;  %v5200_v30 = vld [vmem:[#allocation5 + $0x218] sm:$0xff]  }
 0x189   :  { %4891 = vmatprep.subr.bf16.mxu1 %v5187_v0  ;;  %v4643_v15 = vrot.slane %v6167_v24, 9  ;;  %v4652_v28 = vrot.slane %v4636_v59, 9  ;;  %v4101_v1 = vrot.slane %v4018_v4, 7  ;;  %v4653_v51 = vrot.slane %v6037_v60, 9  ;;  %v5201_v4 = vld [vmem:[#allocation5 + $0x220] sm:$0xff]  }
 0x18a   :  { %4986 = vmatpush3.bf16.msra.mxu0 %v5186_v25  ;;  %v4644_v25 = vrot.slane %v6177_v43, 9  ;;  %v4094_v56 = vsel %vm5774_vm12, %v4650_v50, %v4093_v48  ;;  %v4098_v45 = vsel %vm5774_vm12, %v4651_v3, %v4097_v41  ;;  %v4105_v39 = vrot.slane %v4026_v35, 7  ;;  %v5236_v14 = vld.sshfl [vmem:[#allocation2 + $0x54] sm:$0xf pattern:$0x76325410] }
 0x18b   :  { %4987 = vmatprep.subr.bf16.mxu0 %v5188_v20  ;;  %v3646_v24 = vsel %vm5709_vm10, %v3641_v57, %v3645_v18  ;;  %v3660_v26 = vsel %vm5709_vm10, %v3655_v55, %v3659_v47  ;;  %v3674_v43 = vsel %vm5709_vm10, %v3669_v23, %v3673_v33  ;;  %v4062_v60 = vsel %vm5774_vm12, %v4642_v2, %v4061_v58  ;;  %v4639_v37 = vld.sshfl [vmem:[#allocation2 + $0x54] sm:$0x12 pattern:$0x76325410] }
 0x18c   :  { %4892 = vmatpush3.bf16.msra.mxu1 %v5187_v0  ;;  %v4102_v0 = vsel %vm5774_vm12, %v4652_v28, %v4101_v1  ;;  %v4066_v35 = vsel %vm5774_vm12, %v4643_v15, %v4065_v40  ;;  %v4070_v11 = vsel %vm5774_vm12, %v4644_v25, %v4069_v46  ;;  %v4106_v52 = vsel %vm5774_vm12, %v4653_v51, %v4105_v39  ;;  %v4631_v18 = vld.sshfl [vmem:[#allocation2 + $0x24] sm:$0x12 pattern:$0x76325410] }
 0x18d   :  { %4893 = vmatprep.subr.bf16.mxu1 %v5189_v53  ;;  %v1891_v44 = vcombine.low %v6153_v34, %v6159_v32  ;;  %v4174_v6 = vcombine.low %v4094_v56, %v4098_v45  ;;  %v4175_v8 = vcombine.low %v4102_v0, %v4106_v52  ;;  %v3757_v21 = vcombine.low %v3646_v24, %v3660_v26  ;;  %v5199_v32 = vld [vmem:[#allocation5 + $0x210] sm:$0xff]   ;;  %v4640_v47 = vld.sshfl [vmem:[#allocation2 + $0x58] sm:$0x12 pattern:$0x76325410] }
 0x18e   :  { %4988 = vmatpush3.bf16.msra.mxu0 %v5188_v20  ;;  %v3739_v20 = vcombine.low %v6190_v19, %v6193_v38  ;;  %v3758_v61 = vcombine.low %v3674_v43, %v6175_v22  ;;  %v3756_v13 = vcombine.low %v6200_v9, %v3755_v27  ;;  %v4140_v59 = vcombine.low %v4062_v60, %v4066_v35  ;;  %v4630_v9 = vld.sshfl [vmem:[#allocation2 + $0x20] sm:$0x12 pattern:$0x76325410]  ;;  %v5203_v26 = vld [vmem:[#allocation5 + $0x230] sm:$0xff]  }
 0x18f   :  { %4989 = vmatprep.subr.bf16.mxu0 %v5190_v5  ;;  %v4141_v34 = vcombine.low %v4070_v11, %v6184_v16  ;;  %v4182_v63 = vrot.slane %v4174_v6, %v5752_v31  ;;  %v4189_v36 = vrot.slane %v4175_v8, %v5752_v31  ;;  %v4638_v16 = vld.sshfl [vmem:[#allocation2 + $0x50] sm:$0x12 pattern:$0x76325410]  ;;  %v1908_v29 = vcombine.low %v5235_v49, %v5236_v14  ;;  %v5204_v8 = vld [vmem:[#allocation5 + $0x238] sm:$0xff]  }
 0x190   :  { %4894 = vmatpush3.bf16.msra.mxu1 %v5189_v53  ;;  %v3772_v22 = vrot.slane %v3758_v61, %v5752_v31  ;;  %v4148_v19 = vrot.slane %v4140_v59, %v5752_v31  ;;  %v4641_v27 = vld.sshfl [vmem:[#allocation2 + $0x5c] sm:$0x12 pattern:$0x76325410]  ;;  %v4034_v57 = vcombine.high %v4638_v16, %v4638_v16  ;;  %v4042_v55 = vcombine.high %v4639_v37, %v4639_v37 }
 0x191   :  { %5023 = vmatprep.subr.bf16.mxu1 %v5193_v62  ;;  %v4155_v38 = vrot.slane %v4141_v34, %v5752_v31  ;;  %v4190_v53 = vcombine.low %v4182_v63, %v4189_v36  ;;  %v4632_v42 = vld.sshfl [vmem:[#allocation2 + $0x28] sm:$0x12 pattern:$0x76325410]  ;;  %v4050_v33 = vcombine.high %v4640_v47, %v4640_v47  ;;  %v4058_v2 = vcombine.high %v4641_v27, %v4641_v27 }
 0x192   :  { %4990 = vmatpush3.bf16.msra.mxu0 %v5190_v5  ;;  %v4633_v5 = vld.sshfl [vmem:[#allocation2 + $0x2c] sm:$0x12 pattern:$0x76325410]  ;;  %v3970_v23 = vcombine.high %v4630_v9, %v4630_v9  ;;  %v3978_v58 = vcombine.high %v4631_v18, %v4631_v18  ;;  %v3986_v40 = vcombine.high %v4632_v42, %v4632_v42  ;;  %v4109_v46 = vrot.slane %v4034_v57, 7 }
 0x193   :  { %4896 = vmatmul.mubr.bf16.vlgmr.msra.gmra.mrb[0].mxu1 %v1874_v7  ;;  %4999 = vmatprep.subr.bf16.mxu0 %v5193_v62  ;;  %v3765_v7 = vrot.slane %v3757_v21, %v5752_v31  ;;  %v4156_v17 = vcombine.low %v4148_v19, %v4155_v38  ;;  %v3994_v48 = vcombine.high %v4633_v5, %v4633_v5  ;;  %v4113_v50 = vrot.slane %v4042_v55, 7  ;;  %v4666_v55 = vld [vmem:[%s6305_s2] ss:$0 sm:$0xff] }
 0x194   :  { %4899 = vmatprep.mubr.bf16.mxu1 %v1891_v44  ;;  %5031 = vmatpush3.bf16.msra.mxu1 %v5193_v62  ;;  %v4117_v3 = vrot.slane %v4050_v33, 7  ;;  %v4657_v41 = vrot.slane %v4641_v27, 9  ;;  %v4121_v15 = vrot.slane %v4058_v2, 7  ;;  %v4077_v25 = vrot.slane %v3970_v23, 7 }
 0x195   :  { %4992 = vmatmul.mubr.bf16.vlgmr.msra.gmra.mrb[0].mxu0 %v3739_v20  ;;  %5024 = vmatprep.subr.bf16.mxu1 %v5196_v54  ;;  %v3773_v10 = vcombine.low %v3765_v7, %v3772_v22  ;;  %v4081_v28 = vrot.slane %v3978_v58, 7  ;;  %v4085_v1 = vrot.slane %v3986_v40, 7  ;;  %v4649_v56 = vrot.slane %v4633_v5, 9 }
 0x196   :  { %4995 = vmatprep.mubr.bf16.mxu0 %v3756_v13  ;;  %5000 = vmatpush3.bf16.msra.mxu0 %v5193_v62  ;;  %v5202_v62 = vld [vmem:[#allocation5 + $0x228] sm:$0xff]   ;;  %v4089_v45 = vrot.slane %v3994_v48, 7  ;;  %v4654_v51 = vrot.slane %v4638_v16, 9  ;;  %v4655_v39 = vrot.slane %v4639_v37, 9  ;;  %v4656_v24 = vrot.slane %v4640_v47, 9 }
 0x197   :  { %5001 = vmatprep.subr.bf16.mxu0 %v5196_v54  ;;  %v4646_v43 = vrot.slane %v4630_v9, 9  ;;  %v4647_v0 = vrot.slane %v4631_v18, 9  ;;  %v4122_v35 = vsel %vm5774_vm12, %v4657_v41, %v4121_v15 }
 0x198   :  { %5032 = vmatpush3.bf16.msra.mxu1 %v5196_v54  ;;  %v4110_v49 = vsel %vm5774_vm12, %v4654_v51, %v4109_v46  ;;  %v4114_v14 = vsel %vm5774_vm12, %v4655_v39, %v4113_v50  ;;  %v4118_v60 = vsel %vm5774_vm12, %v4656_v24, %v4117_v3  ;;  %v4090_v6 = vsel %vm5774_vm12, %v4649_v56, %v4089_v45 }
 0x199   :  { %5025 = vmatprep.subr.bf16.mxu1 %v5199_v32  ;;  %v4078_v11 = vsel %vm5774_vm12, %v4646_v43, %v4077_v25  ;;  %v4082_v52 = vsel %vm5774_vm12, %v4647_v0, %v4081_v28  ;;  %v4191_v20 = vcombine.low %v4110_v49, %v4114_v14  ;;  %v4192_v21 = vcombine.low %v4118_v60, %v4122_v35 }
 0x19a   :  { %5002 = vmatpush3.bf16.msra.mxu0 %v5196_v54  ;;  %v4648_v54 = vrot.slane %v4632_v42, 9  ;;  %v4157_v61 = vcombine.low %v4078_v11, %v4082_v52 }
 0x19b   :  { %4900 = vmatmul.mubr.bf16.gmra.mrb[4].mxu1 %v1908_v29  ;;  %5003 = vmatprep.subr.bf16.mxu0 %v5199_v32  ;;  %v4199_v59 = vrot.slane %v4191_v20, %v5752_v31  ;;  %v4206_v34 = vrot.slane %v4192_v21, %v5752_v31 }
 0x19c   :  { %5033 = vmatpush3.bf16.msra.mxu1 %v5199_v32  ;;  %5019 = vmatprep.mubr.bf16.mxu1 %v4190_v53  ;;  %v4086_v44 = vsel %vm5774_vm12, %v4648_v54, %v4085_v1 }
 0x19d   :  { %4996 = vmatmul.mubr.bf16.gmra.mrb[4].mxu0 %v3773_v10  ;;  %5026 = vmatprep.subr.bf16.mxu1 %v5200_v30  ;;  %v4158_v13 = vcombine.low %v4086_v44, %v4090_v6  ;;  %v4207_v63 = vcombine.low %v4199_v59, %v4206_v34 }
 0x19e   :  { %5004 = vmatpush3.bf16.msra.mxu0 %v5199_v32  ;;  %5015 = vmatprep.mubr.bf16.mxu0 %v4156_v17  ;;  %v4165_v32 = vrot.slane %v4157_v61, %v5752_v31 }
 0x19f   :  { %5005 = vmatprep.subr.bf16.mxu0 %v5200_v30  ;;  %v4172_v12 = vrot.slane %v4158_v13, %v5752_v31 }
 0x1a0   :  { %5034 = vmatpush3.bf16.msra.mxu1 %v5200_v30 }
 0x1a1   :  { %5027 = vmatprep.subr.bf16.mxu1 %v5201_v4  ;;  %v4173_v36 = vcombine.low %v4165_v32, %v4172_v12 }
 0x1a2   :  { %5006 = vmatpush3.bf16.msra.mxu0 %v5200_v30 }
 0x1a3   :  { %5007 = vmatprep.subr.bf16.mxu0 %v5201_v4 }
 0x1a4   :  { %5035 = vmatpush3.bf16.msra.mxu1 %v5201_v4 }
 0x1a5   :  { %5028 = vmatprep.subr.bf16.mxu1 %v5202_v62 }
 0x1a6   :  { %5008 = vmatpush3.bf16.msra.mxu0 %v5201_v4 }
 0x1a7   :  { %5009 = vmatprep.subr.bf16.mxu0 %v5202_v62 }
 0x1a8   :  { %5036 = vmatpush3.bf16.msra.mxu1 %v5202_v62 }
 0x1a9   :  { %5029 = vmatprep.subr.bf16.mxu1 %v5203_v26 }
 0x1aa   :  { %5010 = vmatpush3.bf16.msra.mxu0 %v5202_v62 }
 0x1ab   :  { %5011 = vmatprep.subr.bf16.mxu0 %v5203_v26 }
 0x1ac   :  { %5037 = vmatpush3.bf16.msra.mxu1 %v5203_v26 }
 0x1ad   :  { %5030 = vmatprep.subr.bf16.mxu1 %v5204_v8 }
 0x1ae   :  { %5012 = vmatpush3.bf16.msra.mxu0 %v5203_v26 }
 0x1af   :  { %5013 = vmatprep.subr.bf16.mxu0 %v5204_v8 }
 0x1b0   :  { %5038 = vmatpush3.bf16.msra.mxu1 %v5204_v8 }
 0x1b2   :  { %5014 = vmatpush3.bf16.msra.mxu0 %v5204_v8 }
 0x1b3   :  { %5020 = vmatmul.mubr.bf16.vlgmr.msra.gmra.mrb[8].mxu1 %v4207_v63 }
 0x1b5   :  { %5016 = vmatmul.mubr.bf16.vlgmr.msra.gmra.mrb[0].mxu0 %v4173_v36 }
 0x266   :  { %v4897_v7 = vpop.f32.mrb[0].mxu1 }
 0x267   :  { %v1995_v22 = vpop.f32.mrb[1].mxu1 }
 0x268   :  { %v4898_v19 = vpop.f32.mrb[2].mxu1 }
 0x269   :  { %v1998_v38 = vpop.f32.mrb[3].mxu1 }
 0x26e   :  { %v4901_v16 = vpop.f32.mrb[4].mxu1 }
 0x26f   :  { %v2011_v29 = vpop.f32.mrb[5].mxu1 }
 0x270   :  { %v4997_v30 = vpop.f32.mrb[4].mxu0  ;;  %v4902_v37 = vpop.f32.mrb[6].mxu1 }
 0x271   :  { %v5043_v53 = vadd.f32 %v4997_v30, %v4901_v16  ;;  %v3876_v9 = vpop.f32.mrb[5].mxu0  ;;  %v2014_v18 = vpop.f32.mrb[7].mxu1 }
 0x272   :  { %v5045_v47 = vadd.f32 %v3876_v9, %v2011_v29  ;;  %v4998_v10 = vpop.f32.mrb[6].mxu0 }
 0x273   :  { %v5047_v31 = vadd.f32 %v4998_v10, %v4902_v37  ;;  %v3879_v27 = vpop.f32.mrb[7].mxu0 }
 0x274   :  { %v5049_v17 = vadd.f32 %v3879_v27, %v2014_v18 }
 0x286   :  { %v5021_v42 = vpop.f32.mrb[8].mxu1 }
 0x287   :  { %v5044_v4 = vadd.f32 %v5043_v53, %v5021_v42  ;;  %v4310_v5 = vpop.f32.mrb[9].mxu1 }
 0x288   :  { %v5017_v57 = vpop.f32.mrb[0].mxu0  ;;  %v5046_v33 = vadd.f32 %v5045_v47, %v4310_v5  ;;  %v5022_v2 = vpop.f32.mrb[10].mxu1 }
 0x289   :  { %v5039_v23 = vadd.f32 %v5017_v57, %v4897_v7  ;;  %v4339_v58 = vmul.f32 0.04134491, %v5044_v4  ;;  %v4294_v40 = vpop.f32.mrb[1].mxu0  ;;  %v5048_v48 = vadd.f32 %v5047_v31, %v5022_v2  ;;  %v4313_v62 = vpop.f32.mrb[11].mxu1 }
 0x28a   :  { %v5040_v46 = vadd.f32 %v4294_v40, %v1995_v22  ;;  %v4337_v50 = vmul.f32 0.04134491, %v5046_v33  ;;  %v5018_v3 = vpop.f32.mrb[2].mxu0  ;;  %v5050_v41 = vadd.f32 %v5049_v17, %v4313_v62 }
 0x28b   :  { %v4335_v15 = vmul.f32 0.04134491, %v5039_v23  ;;  %v4354_v25 = vadd.f32 %v4666_v55, %v4339_v58  ;;  %v5041_v28 = vadd.f32 %v5018_v3, %v4898_v19  ;;  %v4340_v1 = vmul.f32 0.04134491, %v5048_v48  ;;  %v4297_v56 = vpop.f32.mrb[3].mxu0 }
 0x28c   :  { %v4333_v45 = vmul.f32 0.04134491, %v5040_v46  ;;  %v4352_v51 = vadd.f32 %v4666_v55, %v4337_v50  ;;  %v5042_v39 = vadd.f32 %v4297_v56, %v1998_v38  ;;  %v4338_v24 = vmul.f32 0.04134491, %v5050_v41 }
 0x28d   :  { %v4350_v26 = vadd.f32 %v4666_v55, %v4335_v15  ;;  %vm4362_vm13 = vcmp.ge.f32.partialorder %v4354_v25, 0.0  ;;  %v4370_v43 = vmul.f32 0.2, %v4354_v25  ;;  %v4336_v0 = vmul.f32 0.04134491, %v5041_v28 }
 0x28e   :  { %v4348_v54 = vadd.f32 %v4666_v55, %v4333_v45  ;;  %vm4360_vm14 = vcmp.ge.f32.partialorder %v4352_v51, 0.0  ;;  %v4368_v49 = vmul.f32 0.2, %v4352_v51  ;;  %v4355_v14 = vadd.f32 %v4666_v55, %v4340_v1 }
 0x28f   :  { %vm4358_vm15 = vcmp.ge.f32.partialorder %v4350_v26, 0.0  ;;  %v4366_v60 = vmul.f32 0.2, %v4350_v26  ;;  %v4378_v35 = vsel %vm4362_vm13, %v4354_v25, %v4370_v43  ;;  %v4351_v11 = vadd.f32 %v4666_v55, %v4336_v0 }
 0x290   :  { %v4386_v52 = vmul.f32 1.4142135, %v4378_v35  ;;  %vm4356_vm1 = vcmp.ge.f32.partialorder %v4348_v54, 0.0  ;;  %v4364_v44 = vmul.f32 0.2, %v4348_v54  ;;  %v4376_v6 = vsel %vm4360_vm14, %v4352_v51, %v4368_v49 }
 0x291   :  { %v4374_v8 = vsel %vm4358_vm15, %v4350_v26, %v4366_v60  ;;  %v4384_v20 = vmul.f32 1.4142135, %v4376_v6  ;;  %vm4359_vm2 = vcmp.ge.f32.partialorder %v4351_v11, 0.0  ;;  %v4367_v21 = vmul.f32 0.2, %v4351_v11 }
 0x292   :  { %v4382_v61 = vmul.f32 1.4142135, %v4374_v8  ;;  %v4697_v13 = vpack.c.bf16 %v4386_v52, %v4386_v52  ;;  %v4372_v59 = vsel %vm4356_vm1, %v4348_v54, %v4364_v44  ;;  %vm4363_vm3 = vcmp.ge.f32.partialorder %v4355_v14, 0.0 }
 0x293   :  { %v4380_v34 = vmul.f32 1.4142135, %v4372_v59  ;;  %v4695_v32 = vpack.c.bf16 %v4384_v20, %v4384_v20  ;;  %v4375_v12 = vsel %vm4359_vm2, %v4351_v11, %v4367_v21  ;;  %v4371_v63 = vmul.f32 0.2, %v4355_v14 }
 0x294   :  { %v4693_v36 = vpack.c.bf16 %v4382_v61, %v4382_v61  ;;  %4426 = vst.msk [vmem:[%s6306_s3 + $0x18] sm:$0xf] %vm59_vm0, %v4697_v13  ;;  %v4383_v7 = vmul.f32 1.4142135, %v4375_v12  ;;  %v4334_v22 = vmul.f32 0.04134491, %v5042_v39  ;;  %v4353_v19 = vadd.f32 %v4666_v55, %v4338_v24 }
 0x295   :  { %v4691_v38 = vpack.c.bf16 %v4380_v34, %v4380_v34  ;;  %4424 = vst.msk [vmem:[%s6306_s3 + $0x10] sm:$0xf] %vm59_vm0, %v4695_v32  ;;  %v4379_v16 = vsel %vm4363_vm3, %v4355_v14, %v4371_v63 }
 0x296   :  { %4422 = vst.msk [vmem:[%s6306_s3 + $0x8] sm:$0xf] %vm59_vm0, %v4693_v36  ;;  %v4694_v29 = vpack.c.bf16 %v4383_v7, %v4383_v7  ;;  %v4387_v30 = vmul.f32 1.4142135, %v4379_v16  ;;  %v4349_v37 = vadd.f32 %v4666_v55, %v4334_v22  ;;  %vm4361_vm4 = vcmp.ge.f32.partialorder %v4353_v19, 0.0 }
 0x297   :  { %4420 = vst.msk [vmem:[%s6306_s3] sm:$0xf] %vm59_vm0, %v4691_v38  ;;  %v4369_v53 = vmul.f32 0.2, %v4353_v19 }
 0x298   :  { %4423 = vst.msk [vmem:[%s6306_s3 + $0xc] sm:$0xf] %vm59_vm0, %v4694_v29  ;;  %v4698_v9 = vpack.c.bf16 %v4387_v30, %v4387_v30  ;;  %vm4357_vm5 = vcmp.ge.f32.partialorder %v4349_v37, 0.0  ;;  %v4365_v18 = vmul.f32 0.2, %v4349_v37 }
 0x299   :  { %v4377_v47 = vsel %vm4361_vm4, %v4353_v19, %v4369_v53 }
 0x29a   :  { %4427 = vst.msk [vmem:[%s6306_s3 + $0x1c] sm:$0xf] %vm59_vm0, %v4698_v9  ;;  %v4373_v10 = vsel %vm4357_vm5, %v4349_v37, %v4365_v18  ;;  %v4385_v31 = vmul.f32 1.4142135, %v4377_v47 }
 0x29b   :  { %v4381_v27 = vmul.f32 1.4142135, %v4373_v10 }
 0x29c   :  { %v4696_v17 = vpack.c.bf16 %v4385_v31, %v4385_v31 }
 0x29d   :  { %v4692_v42 = vpack.c.bf16 %v4381_v27, %v4381_v27 }
 0x29e   :  { %4425 = vst.msk [vmem:[%s6306_s3 + $0x14] sm:$0xf] %vm59_vm0, %v4696_v17 }
 0x29f   :  { %4421 = vst.msk [vmem:[%s6306_s3 + $0x4] sm:$0xf] %vm59_vm0, %v4692_v42 }
 0x2a0   :  { %4432 = vsyncpa [#allocation4], 1 }
 0x2a1   :  { %4433 = vsyncpa [#allocation6], 1 }

</bundles_post_ra>
